<compile_context>
chip_gen: v7x
topology: tpu7x:2x2x1
jax: 0.10.0
libtpu: 0.0.40
codegen_flags: <defaults>
</compile_context>

<pallas_src>
import functools

import jax
import jax.numpy as jnp
from jax.experimental import pallas as pl
from jax.experimental.pallas import tpu as pltpu

EPS = 1e-5
LRELU_SLOPE = 0.2


# ----------------------------------------------------------------------------
# Fused kernel: entire prm_generator forward for one batch element.
# All activations live in VMEM / vregs as (C, S) tiles (C on sublanes,
# S = H*W*Z on lanes).
# ----------------------------------------------------------------------------
def _fused_prm_kernel(pos_ref, x1_ref, x2_ref, m_ref,
                      e1w_ref, e1b_ref, e2w_ref, e2b_ref,
                      e3w_ref, e3b_ref, p1w_ref, p1b_ref,
                      p2w_ref, p2b_ref, o_ref, *, H, W, Z):
    f32 = jnp.float32
    bf16 = jnp.bfloat16
    S = x2_ref.shape[-1]
    C = x1_ref.shape[1]

    pos = pos_ref[...]                  # (3, S) int32: h / w / z index per voxel
    ph = pos[0:1, :]
    pw = pos[1:2, :]
    pz = pos[2:3, :]

    def roll_lanes(x, k):
        # np.roll semantics along the last (lane) axis: out[:, i] = x[:, (i-k) % S]
        k = k % S
        if k == 0:
            return x
        return jnp.concatenate([x[:, S - k:], x[:, :S - k]], axis=-1)

    def shift_pm(x, stride, p, extent):
        """Reflect-padded -1 / +1 shifts along one spatial axis of the
        flattened (C, S) layout (stride = lane stride of that axis)."""
        fwd = roll_lanes(x, stride)     # out[i] = x[i - stride]
        bwd = roll_lanes(x, -stride)    # out[i] = x[i + stride]
        minus = jnp.where(p == 0, bwd, fwd)           # reflect: idx -1 -> 1
        plus = jnp.where(p == extent - 1, fwd, bwd)   # reflect: idx N -> N-2
        return minus, plus

    def mm(w, x):
        # bf16 MXU operands, f32 accumulation.
        return jnp.dot(w.astype(bf16), x.astype(bf16),
                       preferred_element_type=f32)

    def inorm_lrelu(z):
        # InstanceNorm3d (no affine, biased var over spatial, eps=1e-5)
        # + LeakyReLU(0.2).  One-pass stats in f32.
        inv_n = 1.0 / S
        mean = jnp.sum(z, axis=-1, keepdims=True) * inv_n
        var = jnp.sum(z * z, axis=-1, keepdims=True) * inv_n - mean * mean
        zn = (z - mean) * jax.lax.rsqrt(var + EPS)
        return jnp.where(zn >= 0, zn, LRELU_SLOPE * zn)

    # ---- embedding_layer[0]: masked 1x1x1 conv (K*C -> C//4) ----------------
    y = x2_ref[0] * m_ref[0]                                   # (KC, S) f32
    h1 = inorm_lrelu(mm(e1w_ref[...], y) + e1b_ref[...])       # (c4, S)

    # ---- embedding_layer[1]: 3x3x3 reflect conv, 27-tap gather in VMEM ------
    acc2 = jnp.zeros(h1.shape, f32)
    zm, zp = shift_pm(h1, 1, pz, Z)
    for dz_i, xz in enumerate((zm, h1, zp)):                   # kw = dz_i
        wm, wp = shift_pm(xz, Z, pw, W)
        for dw_i, xzw in enumerate((wm, xz, wp)):              # kh = dw_i
            hm, hp = shift_pm(xzw, W * Z, ph, H)
            for dh_i, xzwh in enumerate((hm, xzw, hp)):        # kd = dh_i
                t = dh_i * 9 + dw_i * 3 + dz_i                 # PyTorch tap order
                acc2 = acc2 + mm(e2w_ref[t], xzwh)
    h2 = inorm_lrelu(acc2 + e2b_ref[...])                      # (c4, S)

    # ---- embedding_layer[2]: 1x1x1 conv (C//4 -> C) -------------------------
    h3 = inorm_lrelu(mm(e3w_ref[...], h2) + e3b_ref[...])      # (C, S)

    # ---- prm_layer[0]: 1x1x1 conv on concat(x1, h3)  (2C -> 16) -------------
    p1w = p1w_ref[...]
    z4 = mm(p1w[:, :C], x1_ref[0]) + mm(p1w[:, C:], h3) + p1b_ref[...]
    h4 = inorm_lrelu(z4)                                       # (16, S)

    # ---- prm_layer[1:]: 1x1x1 conv (16 -> num_cls) + softmax over channels --
    z5 = mm(p2w_ref[...], h4) + p2b_ref[...]                   # (Ncls, S)
    zmax = jnp.max(z5, axis=0, keepdims=True)
    e = jnp.exp(z5 - zmax)
    denom = jnp.sum(e, axis=0, keepdims=True)
    o_ref[0] = e * pl.reciprocal(denom, approx=True)


# ----------------------------------------------------------------------------
# Wrapper: only free reshapes (NCDHW is already channels-first) + pallas_call.
# ----------------------------------------------------------------------------
def prm_generator_forward(x1, x2, mask, params):
    """x1: (B,C,H,W,Z), x2: (B,K,C,H,W,Z) f32, mask: (B,K) bool
       -> seg: (B,num_cls,H,W,Z) f32 (softmax over channel)."""
    B, K, C, H, W, Z = x2.shape
    S = H * W * Z
    KC = K * C
    c4 = params["e1_w"].shape[0]
    num_cls = params["p2_w"].shape[0]

    x1f = x1.reshape(B, C, S)
    x2f = x2.reshape(B, KC, S)
    # y = zeros_like(x2); y[mask] = x2[mask]  -> per-(b, k*C+c) multiplicative mask
    mcol = jnp.repeat(mask.astype(jnp.float32), C, axis=1).reshape(B, KC, 1)
    # flattened-voxel (h, w, z) coordinates for in-kernel reflect handling
    idx = jnp.arange(S, dtype=jnp.int32)
    pos3 = jnp.stack([idx // (W * Z), (idx // Z) % W, idx % Z], axis=0)  # (3,S)

    kernel = functools.partial(_fused_prm_kernel, H=H, W=W, Z=Z)

    out = pl.pallas_call(
        kernel,
        out_shape=jax.ShapeDtypeStruct((B, num_cls, S), jnp.float32),
        grid=(B,),
        in_specs=[
            pl.BlockSpec((3, S), lambda b: (0, 0)),              # pos
            pl.BlockSpec((1, C, S), lambda b: (b, 0, 0)),        # x1
            pl.BlockSpec((1, KC, S), lambda b: (b, 0, 0)),       # x2
            pl.BlockSpec((1, KC, 1), lambda b: (b, 0, 0)),       # mask scale
            pl.BlockSpec((c4, KC), lambda b: (0, 0)),            # e1_w
            pl.BlockSpec((c4, 1), lambda b: (0, 0)),             # e1_b
            pl.BlockSpec((27, c4, c4), lambda b: (0, 0, 0)),     # e2_w
            pl.BlockSpec((c4, 1), lambda b: (0, 0)),             # e2_b
            pl.BlockSpec((C, c4), lambda b: (0, 0)),             # e3_w
            pl.BlockSpec((C, 1), lambda b: (0, 0)),              # e3_b
            pl.BlockSpec((16, 2 * C), lambda b: (0, 0)),         # p1_w
            pl.BlockSpec((16, 1), lambda b: (0, 0)),             # p1_b
            pl.BlockSpec((num_cls, 16), lambda b: (0, 0)),       # p2_w
            pl.BlockSpec((num_cls, 1), lambda b: (0, 0)),        # p2_b
        ],
        out_specs=pl.BlockSpec((1, num_cls, S), lambda b: (b, 0, 0)),
        compiler_params=pltpu.CompilerParams(
            dimension_semantics=("parallel",)),
    )(pos3, x1f, x2f, mcol,
      params["e1_w"], params["e1_b"], params["e2_w"], params["e2_b"],
      params["e3_w"], params["e3_b"], params["p1_w"], params["p1_b"],
      params["p2_w"], params["p2_b"])

    return out.reshape(B, num_cls, H, W, Z)


# ----------------------------------------------------------------------------
# Pure-JAX reference (mirrors the kernel's bf16 MXU operands / f32 accum).
# ----------------------------------------------------------------------------
def reference_forward(x1, x2, mask, params):
    B, K, C, H, W, Z = x2.shape
    S = H * W * Z
    KC = K * C
    bf16, f32 = jnp.bfloat16, jnp.float32

    def mm(w, x):
        return jnp.einsum("oi,bis->bos", w.astype(bf16), x.astype(bf16),
                          preferred_element_type=f32)

    def inorm_lrelu(z):
        mean = jnp.mean(z, axis=-1, keepdims=True)
        var = jnp.mean(jnp.square(z - mean), axis=-1, keepdims=True)
        zn = (z - mean) * jax.lax.rsqrt(var + EPS)
        return jnp.where(zn >= 0, zn, LRELU_SLOPE * zn)

    mcol = jnp.repeat(mask.astype(f32), C, axis=1).reshape(B, KC, 1)
    y = x2.reshape(B, KC, S) * mcol
    h1 = inorm_lrelu(mm(params["e1_w"], y) + params["e1_b"])

    h1v = h1.reshape(B, -1, H, W, Z)
    h1p = jnp.pad(h1v, ((0, 0), (0, 0), (1, 1), (1, 1), (1, 1)), mode="reflect")
    acc = jnp.zeros_like(h1)
    t = 0
    for kd in range(3):
        for kh in range(3):
            for kw in range(3):
                sl = h1p[:, :, kd:kd + H, kh:kh + W, kw:kw + Z].reshape(B, -1, S)
                acc = acc + mm(params["e2_w"][t], sl)
                t += 1
    h2 = inorm_lrelu(acc + params["e2_b"])
    h3 = inorm_lrelu(mm(params["e3_w"], h2) + params["e3_b"])

    cat = jnp.concatenate([x1.reshape(B, C, S), h3], axis=1)
    h4 = inorm_lrelu(mm(params["p1_w"], cat) + params["p1_b"])
    z5 = mm(params["p2_w"], h4) + params["p2_b"]
    seg = jax.nn.softmax(z5, axis=1)
    return seg.reshape(B, -1, H, W, Z)


# ----------------------------------------------------------------------------
# Deterministic parameter construction (channels-first matmul layout).
# ----------------------------------------------------------------------------
def make_params(key, in_channel=16, num_cls=4, n_modal=4):
    c4 = in_channel // 4
    kc = in_channel * n_modal
    shapes = {
        "e1_w": (c4, kc),             "e1_b": (c4, 1),
        "e2_w": (27, c4, c4),         "e2_b": (c4, 1),
        "e3_w": (in_channel, c4),     "e3_b": (in_channel, 1),
        "p1_w": (16, 2 * in_channel), "p1_b": (16, 1),
        "p2_w": (num_cls, 16),        "p2_b": (num_cls, 1),
    }
    params = {}
    for name, shp in shapes.items():
        key, sub = jax.random.split(key)
        scale = 0.1 if name.endswith("_w") else 0.05
        params[name] = (scale * jax.random.normal(sub, shp)).astype(jnp.float32)
    return params


if __name__ == "__main__":
    key = jax.random.PRNGKey(0)
    B, K, C, H, W, Z = 2, 4, 16, 8, 8, 8          # in_channel=16, num_cls=4
    k1, k2, kp = jax.random.split(key, 3)
    x1 = jax.random.normal(k1, (B, C, H, W, Z), dtype=jnp.float32)
    x2 = jax.random.normal(k2, (B, K, C, H, W, Z), dtype=jnp.float32)
    mask = jnp.array([[True, False, True, True],
                      [False, True, True, False]])
    params = make_params(kp, in_channel=C, num_cls=4, n_modal=K)

    fwd = jax.jit(prm_generator_forward)
    seg = jax.block_until_ready(fwd(x1, x2, mask, params))
    assert seg.shape == (B, 4, H, W, Z), seg.shape
    assert bool(jnp.all(jnp.isfinite(seg)))
    # softmax over channel axis sums to ~1 (approx reciprocal in the kernel)
    assert jnp.allclose(jnp.sum(seg, axis=1), 1.0, atol=1e-2)

    ref = jax.block_until_ready(jax.jit(reference_forward)(x1, x2, mask, params))
    max_err = float(jnp.max(jnp.abs(seg - ref)))
    assert jnp.allclose(seg, ref, rtol=1e-2, atol=1e-2), max_err

    print("KERNEL_OK")
</pallas_src>

<mosaic_0001>
module attributes {stable_mosaic.version = 11 : i64} {
  func.func @_fused_prm_kernel(%arg0: i32, %arg1: memref<3x512xi32, #tpu.memory_space<vmem>>, %arg2: memref<1x16x512xf32, #tpu.memory_space<vmem>>, %arg3: memref<1x64x512xf32, #tpu.memory_space<vmem>>, %arg4: memref<1x64x1xf32, #tpu.memory_space<vmem>>, %arg5: memref<4x64xf32, #tpu.memory_space<vmem>>, %arg6: memref<4x1xf32, #tpu.memory_space<vmem>>, %arg7: memref<27x4x4xf32, #tpu.memory_space<vmem>>, %arg8: memref<4x1xf32, #tpu.memory_space<vmem>>, %arg9: memref<16x4xf32, #tpu.memory_space<vmem>>, %arg10: memref<16x1xf32, #tpu.memory_space<vmem>>, %arg11: memref<16x32xf32, #tpu.memory_space<vmem>>, %arg12: memref<16x1xf32, #tpu.memory_space<vmem>>, %arg13: memref<4x16xf32, #tpu.memory_space<vmem>>, %arg14: memref<4x1xf32, #tpu.memory_space<vmem>>, %arg15: memref<1x4x512xf32, #tpu.memory_space<vmem>>) attributes {dimension_semantics = [#tpu.dimension_semantics<parallel>], iteration_bounds = array<i64: 2>, scalar_prefetch = 0 : i64, scratch_operands = 0 : i64, tpu.core_type = #tpu.core_type<tc>, window_params = [{pipeline_mode = #tpu.pipeline_mode<synchronous>, transform_indices = @transform_0, window_bounds = array<i64: 3, 512>}, {transform_indices = @transform_1, window_bounds = array<i64: 1, 16, 512>}, {transform_indices = @transform_2, window_bounds = array<i64: 1, 64, 512>}, {transform_indices = @transform_3, window_bounds = array<i64: 1, 64, 1>}, {pipeline_mode = #tpu.pipeline_mode<synchronous>, transform_indices = @transform_4, window_bounds = array<i64: 4, 64>}, {pipeline_mode = #tpu.pipeline_mode<synchronous>, transform_indices = @transform_5, window_bounds = array<i64: 4, 1>}, {pipeline_mode = #tpu.pipeline_mode<synchronous>, transform_indices = @transform_6, window_bounds = array<i64: 27, 4, 4>}, {pipeline_mode = #tpu.pipeline_mode<synchronous>, transform_indices = @transform_7, window_bounds = array<i64: 4, 1>}, {pipeline_mode = #tpu.pipeline_mode<synchronous>, transform_indices = @transform_8, window_bounds = array<i64: 16, 4>}, {pipeline_mode = #tpu.pipeline_mode<synchronous>, transform_indices = @transform_9, window_bounds = array<i64: 16, 1>}, {pipeline_mode = #tpu.pipeline_mode<synchronous>, transform_indices = @transform_10, window_bounds = array<i64: 16, 32>}, {pipeline_mode = #tpu.pipeline_mode<synchronous>, transform_indices = @transform_11, window_bounds = array<i64: 16, 1>}, {pipeline_mode = #tpu.pipeline_mode<synchronous>, transform_indices = @transform_12, window_bounds = array<i64: 4, 16>}, {pipeline_mode = #tpu.pipeline_mode<synchronous>, transform_indices = @transform_13, window_bounds = array<i64: 4, 1>}, {transform_indices = @transform_14, window_bounds = array<i64: 1, 4, 512>}]} {
    %c0 = arith.constant 0 : index
    %c0_0 = arith.constant 0 : index
    %0 = vector.load %arg1[%c0, %c0_0] : memref<3x512xi32, #tpu.memory_space<vmem>>, vector<3x512xi32>
    %1 = vector.extract_strided_slice %0 {offsets = [0, 0], sizes = [1, 512], strides = [1, 1]} : vector<3x512xi32> to vector<1x512xi32>
    %2 = vector.extract_strided_slice %0 {offsets = [1, 0], sizes = [1, 512], strides = [1, 1]} : vector<3x512xi32> to vector<1x512xi32>
    %3 = vector.extract_strided_slice %0 {offsets = [2, 0], sizes = [1, 512], strides = [1, 1]} : vector<3x512xi32> to vector<1x512xi32>
    %c0_1 = arith.constant 0 : index
    %c0_2 = arith.constant 0 : index
    %c0_3 = arith.constant 0 : index
    %4 = vector.load %arg3[%c0_1, %c0_2, %c0_3] : memref<1x64x512xf32, #tpu.memory_space<vmem>>, vector<1x64x512xf32>
    %5 = vector.shape_cast %4 : vector<1x64x512xf32> to vector<64x512xf32>
    %c0_4 = arith.constant 0 : index
    %c0_5 = arith.constant 0 : index
    %c0_6 = arith.constant 0 : index
    %6 = vector.load %arg4[%c0_4, %c0_5, %c0_6] : memref<1x64x1xf32, #tpu.memory_space<vmem>>, vector<1x64x1xf32>
    %7 = vector.shape_cast %6 : vector<1x64x1xf32> to vector<64x1xf32>
    %8 = vector.broadcast %7 : vector<64x1xf32> to vector<64x512xf32>
    %9 = arith.mulf %5, %8 : vector<64x512xf32>
    %c0_7 = arith.constant 0 : index
    %c0_8 = arith.constant 0 : index
    %10 = vector.load %arg5[%c0_7, %c0_8] : memref<4x64xf32, #tpu.memory_space<vmem>>, vector<4x64xf32>
    %11 = arith.truncf %10 : vector<4x64xf32> to vector<4x64xbf16>
    %12 = arith.truncf %9 : vector<64x512xf32> to vector<64x512xbf16>
    %cst = arith.constant dense<0.000000e+00> : vector<4x512xf32>
    %13 = tpu.matmul %11, %12, %cst {dimension_numbers = #tpu.dot_dimension_numbers<[1], [0], [0], [1], [0, 0, 1, 1], [], []>} : vector<4x64xbf16>, vector<64x512xbf16>, vector<4x512xf32> -> vector<4x512xf32>
    %c0_9 = arith.constant 0 : index
    %c0_10 = arith.constant 0 : index
    %14 = vector.load %arg6[%c0_9, %c0_10] : memref<4x1xf32, #tpu.memory_space<vmem>>, vector<4x1xf32>
    %15 = vector.broadcast %14 : vector<4x1xf32> to vector<4x512xf32>
    %16 = arith.addf %13, %15 : vector<4x512xf32>
    %cst_11 = arith.constant dense<0.000000e+00> : vector<4xf32>
    %17 = vector.multi_reduction <add>, %16, %cst_11 [1] : vector<4x512xf32> to vector<4xf32>
    %18 = vector.shape_cast %17 : vector<4xf32> to vector<4x1xf32>
    %cst_12 = arith.constant 0.001953125 : f32
    %19 = vector.broadcast %cst_12 : f32 to vector<4x1xf32>
    %20 = arith.mulf %18, %19 : vector<4x1xf32>
    %21 = arith.mulf %16, %16 : vector<4x512xf32>
    %cst_13 = arith.constant dense<0.000000e+00> : vector<4xf32>
    %22 = vector.multi_reduction <add>, %21, %cst_13 [1] : vector<4x512xf32> to vector<4xf32>
    %23 = vector.shape_cast %22 : vector<4xf32> to vector<4x1xf32>
    %cst_14 = arith.constant 0.001953125 : f32
    %24 = vector.broadcast %cst_14 : f32 to vector<4x1xf32>
    %25 = arith.mulf %23, %24 : vector<4x1xf32>
    %26 = arith.mulf %20, %20 : vector<4x1xf32>
    %27 = arith.subf %25, %26 : vector<4x1xf32>
    %28 = vector.broadcast %20 : vector<4x1xf32> to vector<4x512xf32>
    %29 = arith.subf %16, %28 : vector<4x512xf32>
    %cst_15 = arith.constant 9.99999974E-6 : f32
    %30 = vector.broadcast %cst_15 : f32 to vector<4x1xf32>
    %31 = arith.addf %27, %30 : vector<4x1xf32>
    %32 = math.rsqrt %31 : vector<4x1xf32>
    %33 = vector.broadcast %32 : vector<4x1xf32> to vector<4x512xf32>
    %34 = arith.mulf %29, %33 : vector<4x512xf32>
    %cst_16 = arith.constant 0.000000e+00 : f32
    %35 = vector.broadcast %cst_16 : f32 to vector<4x512xf32>
    %36 = arith.cmpf oge, %34, %35 : vector<4x512xf32>
    %cst_17 = arith.constant 2.000000e-01 : f32
    %37 = vector.broadcast %cst_17 : f32 to vector<4x512xf32>
    %38 = arith.mulf %37, %34 : vector<4x512xf32>
    %39 = arith.select %36, %34, %38 : vector<4x512xi1>, vector<4x512xf32>
    %cst_18 = arith.constant 0.000000e+00 : f32
    %40 = vector.broadcast %cst_18 : f32 to vector<4x512xf32>
    %41 = vector.extract_strided_slice %39 {offsets = [0, 511], sizes = [4, 1], strides = [1, 1]} : vector<4x512xf32> to vector<4x1xf32>
    %42 = vector.extract_strided_slice %39 {offsets = [0, 0], sizes = [4, 511], strides = [1, 1]} : vector<4x512xf32> to vector<4x511xf32>
    %43 = tpu.concatenate %41, %42 in 1 : vector<4x1xf32>, vector<4x511xf32> -> vector<4x512xf32>
    %44 = vector.extract_strided_slice %39 {offsets = [0, 1], sizes = [4, 511], strides = [1, 1]} : vector<4x512xf32> to vector<4x511xf32>
    %45 = vector.extract_strided_slice %39 {offsets = [0, 0], sizes = [4, 1], strides = [1, 1]} : vector<4x512xf32> to vector<4x1xf32>
    %46 = tpu.concatenate %44, %45 in 1 : vector<4x511xf32>, vector<4x1xf32> -> vector<4x512xf32>
    %c0_i32 = arith.constant 0 : i32
    %47 = vector.broadcast %c0_i32 : i32 to vector<1x512xi32>
    %48 = arith.cmpi eq, %3, %47 : vector<1x512xi32>
    %49 = vector.shape_cast %48 : vector<1x512xi1> to vector<1x512xi1>
    %50 = vector.broadcast %49 : vector<1x512xi1> to vector<4x512xi1>
    %51 = arith.select %50, %46, %43 : vector<4x512xi1>, vector<4x512xf32>
    %c7_i32 = arith.constant 7 : i32
    %52 = vector.broadcast %c7_i32 : i32 to vector<1x512xi32>
    %53 = arith.cmpi eq, %3, %52 : vector<1x512xi32>
    %54 = vector.shape_cast %53 : vector<1x512xi1> to vector<1x512xi1>
    %55 = vector.broadcast %54 : vector<1x512xi1> to vector<4x512xi1>
    %56 = arith.select %55, %43, %46 : vector<4x512xi1>, vector<4x512xf32>
    %57 = vector.extract_strided_slice %51 {offsets = [0, 504], sizes = [4, 8], strides = [1, 1]} : vector<4x512xf32> to vector<4x8xf32>
    %58 = vector.extract_strided_slice %51 {offsets = [0, 0], sizes = [4, 504], strides = [1, 1]} : vector<4x512xf32> to vector<4x504xf32>
    %59 = tpu.concatenate %57, %58 in 1 : vector<4x8xf32>, vector<4x504xf32> -> vector<4x512xf32>
    %60 = vector.extract_strided_slice %51 {offsets = [0, 8], sizes = [4, 504], strides = [1, 1]} : vector<4x512xf32> to vector<4x504xf32>
    %61 = vector.extract_strided_slice %51 {offsets = [0, 0], sizes = [4, 8], strides = [1, 1]} : vector<4x512xf32> to vector<4x8xf32>
    %62 = tpu.concatenate %60, %61 in 1 : vector<4x504xf32>, vector<4x8xf32> -> vector<4x512xf32>
    %c0_i32_19 = arith.constant 0 : i32
    %63 = vector.broadcast %c0_i32_19 : i32 to vector<1x512xi32>
    %64 = arith.cmpi eq, %2, %63 : vector<1x512xi32>
    %65 = vector.shape_cast %64 : vector<1x512xi1> to vector<1x512xi1>
    %66 = vector.broadcast %65 : vector<1x512xi1> to vector<4x512xi1>
    %67 = arith.select %66, %62, %59 : vector<4x512xi1>, vector<4x512xf32>
    %c7_i32_20 = arith.constant 7 : i32
    %68 = vector.broadcast %c7_i32_20 : i32 to vector<1x512xi32>
    %69 = arith.cmpi eq, %2, %68 : vector<1x512xi32>
    %70 = vector.shape_cast %69 : vector<1x512xi1> to vector<1x512xi1>
    %71 = vector.broadcast %70 : vector<1x512xi1> to vector<4x512xi1>
    %72 = arith.select %71, %59, %62 : vector<4x512xi1>, vector<4x512xf32>
    %73 = vector.extract_strided_slice %67 {offsets = [0, 448], sizes = [4, 64], strides = [1, 1]} : vector<4x512xf32> to vector<4x64xf32>
    %74 = vector.extract_strided_slice %67 {offsets = [0, 0], sizes = [4, 448], strides = [1, 1]} : vector<4x512xf32> to vector<4x448xf32>
    %75 = tpu.concatenate %73, %74 in 1 : vector<4x64xf32>, vector<4x448xf32> -> vector<4x512xf32>
    %76 = vector.extract_strided_slice %67 {offsets = [0, 64], sizes = [4, 448], strides = [1, 1]} : vector<4x512xf32> to vector<4x448xf32>
    %77 = vector.extract_strided_slice %67 {offsets = [0, 0], sizes = [4, 64], strides = [1, 1]} : vector<4x512xf32> to vector<4x64xf32>
    %78 = tpu.concatenate %76, %77 in 1 : vector<4x448xf32>, vector<4x64xf32> -> vector<4x512xf32>
    %c0_i32_21 = arith.constant 0 : i32
    %79 = vector.broadcast %c0_i32_21 : i32 to vector<1x512xi32>
    %80 = arith.cmpi eq, %1, %79 : vector<1x512xi32>
    %81 = vector.shape_cast %80 : vector<1x512xi1> to vector<1x512xi1>
    %82 = vector.broadcast %81 : vector<1x512xi1> to vector<4x512xi1>
    %83 = arith.select %82, %78, %75 : vector<4x512xi1>, vector<4x512xf32>
    %c7_i32_22 = arith.constant 7 : i32
    %84 = vector.broadcast %c7_i32_22 : i32 to vector<1x512xi32>
    %85 = arith.cmpi eq, %1, %84 : vector<1x512xi32>
    %86 = vector.shape_cast %85 : vector<1x512xi1> to vector<1x512xi1>
    %87 = vector.broadcast %86 : vector<1x512xi1> to vector<4x512xi1>
    %88 = arith.select %87, %75, %78 : vector<4x512xi1>, vector<4x512xf32>
    %c0_23 = arith.constant 0 : index
    %c0_24 = arith.constant 0 : index
    %c0_25 = arith.constant 0 : index
    %89 = vector.load %arg7[%c0_23, %c0_24, %c0_25] : memref<27x4x4xf32, #tpu.memory_space<vmem>>, vector<1x4x4xf32>
    %90 = vector.shape_cast %89 : vector<1x4x4xf32> to vector<4x4xf32>
    %91 = arith.truncf %90 : vector<4x4xf32> to vector<4x4xbf16>
    %92 = arith.truncf %83 : vector<4x512xf32> to vector<4x512xbf16>
    %cst_26 = arith.constant dense<0.000000e+00> : vector<4x512xf32>
    %93 = tpu.matmul %91, %92, %cst_26 {dimension_numbers = #tpu.dot_dimension_numbers<[1], [0], [0], [1], [0, 0, 1, 1], [], []>} : vector<4x4xbf16>, vector<4x512xbf16>, vector<4x512xf32> -> vector<4x512xf32>
    %94 = arith.addf %40, %93 : vector<4x512xf32>
    %c9 = arith.constant 9 : index
    %c0_27 = arith.constant 0 : index
    %c0_28 = arith.constant 0 : index
    %95 = vector.load %arg7[%c9, %c0_27, %c0_28] : memref<27x4x4xf32, #tpu.memory_space<vmem>>, vector<1x4x4xf32>
    %96 = vector.shape_cast %95 : vector<1x4x4xf32> to vector<4x4xf32>
    %97 = arith.truncf %96 : vector<4x4xf32> to vector<4x4xbf16>
    %98 = arith.truncf %67 : vector<4x512xf32> to vector<4x512xbf16>
    %cst_29 = arith.constant dense<0.000000e+00> : vector<4x512xf32>
    %99 = tpu.matmul %97, %98, %cst_29 {dimension_numbers = #tpu.dot_dimension_numbers<[1], [0], [0], [1], [0, 0, 1, 1], [], []>} : vector<4x4xbf16>, vector<4x512xbf16>, vector<4x512xf32> -> vector<4x512xf32>
    %100 = arith.addf %94, %99 : vector<4x512xf32>
    %c18 = arith.constant 18 : index
    %c0_30 = arith.constant 0 : index
    %c0_31 = arith.constant 0 : index
    %101 = vector.load %arg7[%c18, %c0_30, %c0_31] : memref<27x4x4xf32, #tpu.memory_space<vmem>>, vector<1x4x4xf32>
    %102 = vector.shape_cast %101 : vector<1x4x4xf32> to vector<4x4xf32>
    %103 = arith.truncf %102 : vector<4x4xf32> to vector<4x4xbf16>
    %104 = arith.truncf %88 : vector<4x512xf32> to vector<4x512xbf16>
    %cst_32 = arith.constant dense<0.000000e+00> : vector<4x512xf32>
    %105 = tpu.matmul %103, %104, %cst_32 {dimension_numbers = #tpu.dot_dimension_numbers<[1], [0], [0], [1], [0, 0, 1, 1], [], []>} : vector<4x4xbf16>, vector<4x512xbf16>, vector<4x512xf32> -> vector<4x512xf32>
    %106 = arith.addf %100, %105 : vector<4x512xf32>
    %107 = vector.extract_strided_slice %51 {offsets = [0, 448], sizes = [4, 64], strides = [1, 1]} : vector<4x512xf32> to vector<4x64xf32>
    %108 = vector.extract_strided_slice %51 {offsets = [0, 0], sizes = [4, 448], strides = [1, 1]} : vector<4x512xf32> to vector<4x448xf32>
    %109 = tpu.concatenate %107, %108 in 1 : vector<4x64xf32>, vector<4x448xf32> -> vector<4x512xf32>
    %110 = vector.extract_strided_slice %51 {offsets = [0, 64], sizes = [4, 448], strides = [1, 1]} : vector<4x512xf32> to vector<4x448xf32>
    %111 = vector.extract_strided_slice %51 {offsets = [0, 0], sizes = [4, 64], strides = [1, 1]} : vector<4x512xf32> to vector<4x64xf32>
    %112 = tpu.concatenate %110, %111 in 1 : vector<4x448xf32>, vector<4x64xf32> -> vector<4x512xf32>
    %c0_i32_33 = arith.constant 0 : i32
    %113 = vector.broadcast %c0_i32_33 : i32 to vector<1x512xi32>
    %114 = arith.cmpi eq, %1, %113 : vector<1x512xi32>
    %115 = vector.shape_cast %114 : vector<1x512xi1> to vector<1x512xi1>
    %116 = vector.broadcast %115 : vector<1x512xi1> to vector<4x512xi1>
    %117 = arith.select %116, %112, %109 : vector<4x512xi1>, vector<4x512xf32>
    %c7_i32_34 = arith.constant 7 : i32
    %118 = vector.broadcast %c7_i32_34 : i32 to vector<1x512xi32>
    %119 = arith.cmpi eq, %1, %118 : vector<1x512xi32>
    %120 = vector.shape_cast %119 : vector<1x512xi1> to vector<1x512xi1>
    %121 = vector.broadcast %120 : vector<1x512xi1> to vector<4x512xi1>
    %122 = arith.select %121, %109, %112 : vector<4x512xi1>, vector<4x512xf32>
    %c3 = arith.constant 3 : index
    %c0_35 = arith.constant 0 : index
    %c0_36 = arith.constant 0 : index
    %123 = vector.load %arg7[%c3, %c0_35, %c0_36] : memref<27x4x4xf32, #tpu.memory_space<vmem>>, vector<1x4x4xf32>
    %124 = vector.shape_cast %123 : vector<1x4x4xf32> to vector<4x4xf32>
    %125 = arith.truncf %124 : vector<4x4xf32> to vector<4x4xbf16>
    %126 = arith.truncf %117 : vector<4x512xf32> to vector<4x512xbf16>
    %cst_37 = arith.constant dense<0.000000e+00> : vector<4x512xf32>
    %127 = tpu.matmul %125, %126, %cst_37 {dimension_numbers = #tpu.dot_dimension_numbers<[1], [0], [0], [1], [0, 0, 1, 1], [], []>} : vector<4x4xbf16>, vector<4x512xbf16>, vector<4x512xf32> -> vector<4x512xf32>
    %128 = arith.addf %106, %127 : vector<4x512xf32>
    %c12 = arith.constant 12 : index
    %c0_38 = arith.constant 0 : index
    %c0_39 = arith.constant 0 : index
    %129 = vector.load %arg7[%c12, %c0_38, %c0_39] : memref<27x4x4xf32, #tpu.memory_space<vmem>>, vector<1x4x4xf32>
    %130 = vector.shape_cast %129 : vector<1x4x4xf32> to vector<4x4xf32>
    %131 = arith.truncf %130 : vector<4x4xf32> to vector<4x4xbf16>
    %132 = arith.truncf %51 : vector<4x512xf32> to vector<4x512xbf16>
    %cst_40 = arith.constant dense<0.000000e+00> : vector<4x512xf32>
    %133 = tpu.matmul %131, %132, %cst_40 {dimension_numbers = #tpu.dot_dimension_numbers<[1], [0], [0], [1], [0, 0, 1, 1], [], []>} : vector<4x4xbf16>, vector<4x512xbf16>, vector<4x512xf32> -> vector<4x512xf32>
    %134 = arith.addf %128, %133 : vector<4x512xf32>
    %c21 = arith.constant 21 : index
    %c0_41 = arith.constant 0 : index
    %c0_42 = arith.constant 0 : index
    %135 = vector.load %arg7[%c21, %c0_41, %c0_42] : memref<27x4x4xf32, #tpu.memory_space<vmem>>, vector<1x4x4xf32>
    %136 = vector.shape_cast %135 : vector<1x4x4xf32> to vector<4x4xf32>
    %137 = arith.truncf %136 : vector<4x4xf32> to vector<4x4xbf16>
    %138 = arith.truncf %122 : vector<4x512xf32> to vector<4x512xbf16>
    %cst_43 = arith.constant dense<0.000000e+00> : vector<4x512xf32>
    %139 = tpu.matmul %137, %138, %cst_43 {dimension_numbers = #tpu.dot_dimension_numbers<[1], [0], [0], [1], [0, 0, 1, 1], [], []>} : vector<4x4xbf16>, vector<4x512xbf16>, vector<4x512xf32> -> vector<4x512xf32>
    %140 = arith.addf %134, %139 : vector<4x512xf32>
    %141 = vector.extract_strided_slice %72 {offsets = [0, 448], sizes = [4, 64], strides = [1, 1]} : vector<4x512xf32> to vector<4x64xf32>
    %142 = vector.extract_strided_slice %72 {offsets = [0, 0], sizes = [4, 448], strides = [1, 1]} : vector<4x512xf32> to vector<4x448xf32>
    %143 = tpu.concatenate %141, %142 in 1 : vector<4x64xf32>, vector<4x448xf32> -> vector<4x512xf32>
    %144 = vector.extract_strided_slice %72 {offsets = [0, 64], sizes = [4, 448], strides = [1, 1]} : vector<4x512xf32> to vector<4x448xf32>
    %145 = vector.extract_strided_slice %72 {offsets = [0, 0], sizes = [4, 64], strides = [1, 1]} : vector<4x512xf32> to vector<4x64xf32>
    %146 = tpu.concatenate %144, %145 in 1 : vector<4x448xf32>, vector<4x64xf32> -> vector<4x512xf32>
    %c0_i32_44 = arith.constant 0 : i32
    %147 = vector.broadcast %c0_i32_44 : i32 to vector<1x512xi32>
    %148 = arith.cmpi eq, %1, %147 : vector<1x512xi32>
    %149 = vector.shape_cast %148 : vector<1x512xi1> to vector<1x512xi1>
    %150 = vector.broadcast %149 : vector<1x512xi1> to vector<4x512xi1>
    %151 = arith.select %150, %146, %143 : vector<4x512xi1>, vector<4x512xf32>
    %c7_i32_45 = arith.constant 7 : i32
    %152 = vector.broadcast %c7_i32_45 : i32 to vector<1x512xi32>
    %153 = arith.cmpi eq, %1, %152 : vector<1x512xi32>
    %154 = vector.shape_cast %153 : vector<1x512xi1> to vector<1x512xi1>
    %155 = vector.broadcast %154 : vector<1x512xi1> to vector<4x512xi1>
    %156 = arith.select %155, %143, %146 : vector<4x512xi1>, vector<4x512xf32>
    %c6 = arith.constant 6 : index
    %c0_46 = arith.constant 0 : index
    %c0_47 = arith.constant 0 : index
    %157 = vector.load %arg7[%c6, %c0_46, %c0_47] : memref<27x4x4xf32, #tpu.memory_space<vmem>>, vector<1x4x4xf32>
    %158 = vector.shape_cast %157 : vector<1x4x4xf32> to vector<4x4xf32>
    %159 = arith.truncf %158 : vector<4x4xf32> to vector<4x4xbf16>
    %160 = arith.truncf %151 : vector<4x512xf32> to vector<4x512xbf16>
    %cst_48 = arith.constant dense<0.000000e+00> : vector<4x512xf32>
    %161 = tpu.matmul %159, %160, %cst_48 {dimension_numbers = #tpu.dot_dimension_numbers<[1], [0], [0], [1], [0, 0, 1, 1], [], []>} : vector<4x4xbf16>, vector<4x512xbf16>, vector<4x512xf32> -> vector<4x512xf32>
    %162 = arith.addf %140, %161 : vector<4x512xf32>
    %c15 = arith.constant 15 : index
    %c0_49 = arith.constant 0 : index
    %c0_50 = arith.constant 0 : index
    %163 = vector.load %arg7[%c15, %c0_49, %c0_50] : memref<27x4x4xf32, #tpu.memory_space<vmem>>, vector<1x4x4xf32>
    %164 = vector.shape_cast %163 : vector<1x4x4xf32> to vector<4x4xf32>
    %165 = arith.truncf %164 : vector<4x4xf32> to vector<4x4xbf16>
    %166 = arith.truncf %72 : vector<4x512xf32> to vector<4x512xbf16>
    %cst_51 = arith.constant dense<0.000000e+00> : vector<4x512xf32>
    %167 = tpu.matmul %165, %166, %cst_51 {dimension_numbers = #tpu.dot_dimension_numbers<[1], [0], [0], [1], [0, 0, 1, 1], [], []>} : vector<4x4xbf16>, vector<4x512xbf16>, vector<4x512xf32> -> vector<4x512xf32>
    %168 = arith.addf %162, %167 : vector<4x512xf32>
    %c24 = arith.constant 24 : index
    %c0_52 = arith.constant 0 : index
    %c0_53 = arith.constant 0 : index
    %169 = vector.load %arg7[%c24, %c0_52, %c0_53] : memref<27x4x4xf32, #tpu.memory_space<vmem>>, vector<1x4x4xf32>
    %170 = vector.shape_cast %169 : vector<1x4x4xf32> to vector<4x4xf32>
    %171 = arith.truncf %170 : vector<4x4xf32> to vector<4x4xbf16>
    %172 = arith.truncf %156 : vector<4x512xf32> to vector<4x512xbf16>
    %cst_54 = arith.constant dense<0.000000e+00> : vector<4x512xf32>
    %173 = tpu.matmul %171, %172, %cst_54 {dimension_numbers = #tpu.dot_dimension_numbers<[1], [0], [0], [1], [0, 0, 1, 1], [], []>} : vector<4x4xbf16>, vector<4x512xbf16>, vector<4x512xf32> -> vector<4x512xf32>
    %174 = arith.addf %168, %173 : vector<4x512xf32>
    %175 = vector.extract_strided_slice %39 {offsets = [0, 504], sizes = [4, 8], strides = [1, 1]} : vector<4x512xf32> to vector<4x8xf32>
    %176 = vector.extract_strided_slice %39 {offsets = [0, 0], sizes = [4, 504], strides = [1, 1]} : vector<4x512xf32> to vector<4x504xf32>
    %177 = tpu.concatenate %175, %176 in 1 : vector<4x8xf32>, vector<4x504xf32> -> vector<4x512xf32>
    %178 = vector.extract_strided_slice %39 {offsets = [0, 8], sizes = [4, 504], strides = [1, 1]} : vector<4x512xf32> to vector<4x504xf32>
    %179 = vector.extract_strided_slice %39 {offsets = [0, 0], sizes = [4, 8], strides = [1, 1]} : vector<4x512xf32> to vector<4x8xf32>
    %180 = tpu.concatenate %178, %179 in 1 : vector<4x504xf32>, vector<4x8xf32> -> vector<4x512xf32>
    %c0_i32_55 = arith.constant 0 : i32
    %181 = vector.broadcast %c0_i32_55 : i32 to vector<1x512xi32>
    %182 = arith.cmpi eq, %2, %181 : vector<1x512xi32>
    %183 = vector.shape_cast %182 : vector<1x512xi1> to vector<1x512xi1>
    %184 = vector.broadcast %183 : vector<1x512xi1> to vector<4x512xi1>
    %185 = arith.select %184, %180, %177 : vector<4x512xi1>, vector<4x512xf32>
    %c7_i32_56 = arith.constant 7 : i32
    %186 = vector.broadcast %c7_i32_56 : i32 to vector<1x512xi32>
    %187 = arith.cmpi eq, %2, %186 : vector<1x512xi32>
    %188 = vector.shape_cast %187 : vector<1x512xi1> to vector<1x512xi1>
    %189 = vector.broadcast %188 : vector<1x512xi1> to vector<4x512xi1>
    %190 = arith.select %189, %177, %180 : vector<4x512xi1>, vector<4x512xf32>
    %191 = vector.extract_strided_slice %185 {offsets = [0, 448], sizes = [4, 64], strides = [1, 1]} : vector<4x512xf32> to vector<4x64xf32>
    %192 = vector.extract_strided_slice %185 {offsets = [0, 0], sizes = [4, 448], strides = [1, 1]} : vector<4x512xf32> to vector<4x448xf32>
    %193 = tpu.concatenate %191, %192 in 1 : vector<4x64xf32>, vector<4x448xf32> -> vector<4x512xf32>
    %194 = vector.extract_strided_slice %185 {offsets = [0, 64], sizes = [4, 448], strides = [1, 1]} : vector<4x512xf32> to vector<4x448xf32>
    %195 = vector.extract_strided_slice %185 {offsets = [0, 0], sizes = [4, 64], strides = [1, 1]} : vector<4x512xf32> to vector<4x64xf32>
    %196 = tpu.concatenate %194, %195 in 1 : vector<4x448xf32>, vector<4x64xf32> -> vector<4x512xf32>
    %c0_i32_57 = arith.constant 0 : i32
    %197 = vector.broadcast %c0_i32_57 : i32 to vector<1x512xi32>
    %198 = arith.cmpi eq, %1, %197 : vector<1x512xi32>
    %199 = vector.shape_cast %198 : vector<1x512xi1> to vector<1x512xi1>
    %200 = vector.broadcast %199 : vector<1x512xi1> to vector<4x512xi1>
    %201 = arith.select %200, %196, %193 : vector<4x512xi1>, vector<4x512xf32>
    %c7_i32_58 = arith.constant 7 : i32
    %202 = vector.broadcast %c7_i32_58 : i32 to vector<1x512xi32>
    %203 = arith.cmpi eq, %1, %202 : vector<1x512xi32>
    %204 = vector.shape_cast %203 : vector<1x512xi1> to vector<1x512xi1>
    %205 = vector.broadcast %204 : vector<1x512xi1> to vector<4x512xi1>
    %206 = arith.select %205, %193, %196 : vector<4x512xi1>, vector<4x512xf32>
    %c1 = arith.constant 1 : index
    %c0_59 = arith.constant 0 : index
    %c0_60 = arith.constant 0 : index
    %207 = vector.load %arg7[%c1, %c0_59, %c0_60] : memref<27x4x4xf32, #tpu.memory_space<vmem>>, vector<1x4x4xf32>
    %208 = vector.shape_cast %207 : vector<1x4x4xf32> to vector<4x4xf32>
    %209 = arith.truncf %208 : vector<4x4xf32> to vector<4x4xbf16>
    %210 = arith.truncf %201 : vector<4x512xf32> to vector<4x512xbf16>
    %cst_61 = arith.constant dense<0.000000e+00> : vector<4x512xf32>
    %211 = tpu.matmul %209, %210, %cst_61 {dimension_numbers = #tpu.dot_dimension_numbers<[1], [0], [0], [1], [0, 0, 1, 1], [], []>} : vector<4x4xbf16>, vector<4x512xbf16>, vector<4x512xf32> -> vector<4x512xf32>
    %212 = arith.addf %174, %211 : vector<4x512xf32>
    %c10 = arith.constant 10 : index
    %c0_62 = arith.constant 0 : index
    %c0_63 = arith.constant 0 : index
    %213 = vector.load %arg7[%c10, %c0_62, %c0_63] : memref<27x4x4xf32, #tpu.memory_space<vmem>>, vector<1x4x4xf32>
    %214 = vector.shape_cast %213 : vector<1x4x4xf32> to vector<4x4xf32>
    %215 = arith.truncf %214 : vector<4x4xf32> to vector<4x4xbf16>
    %216 = arith.truncf %185 : vector<4x512xf32> to vector<4x512xbf16>
    %cst_64 = arith.constant dense<0.000000e+00> : vector<4x512xf32>
    %217 = tpu.matmul %215, %216, %cst_64 {dimension_numbers = #tpu.dot_dimension_numbers<[1], [0], [0], [1], [0, 0, 1, 1], [], []>} : vector<4x4xbf16>, vector<4x512xbf16>, vector<4x512xf32> -> vector<4x512xf32>
    %218 = arith.addf %212, %217 : vector<4x512xf32>
    %c19 = arith.constant 19 : index
    %c0_65 = arith.constant 0 : index
    %c0_66 = arith.constant 0 : index
    %219 = vector.load %arg7[%c19, %c0_65, %c0_66] : memref<27x4x4xf32, #tpu.memory_space<vmem>>, vector<1x4x4xf32>
    %220 = vector.shape_cast %219 : vector<1x4x4xf32> to vector<4x4xf32>
    %221 = arith.truncf %220 : vector<4x4xf32> to vector<4x4xbf16>
    %222 = arith.truncf %206 : vector<4x512xf32> to vector<4x512xbf16>
    %cst_67 = arith.constant dense<0.000000e+00> : vector<4x512xf32>
    %223 = tpu.matmul %221, %222, %cst_67 {dimension_numbers = #tpu.dot_dimension_numbers<[1], [0], [0], [1], [0, 0, 1, 1], [], []>} : vector<4x4xbf16>, vector<4x512xbf16>, vector<4x512xf32> -> vector<4x512xf32>
    %224 = arith.addf %218, %223 : vector<4x512xf32>
    %225 = vector.extract_strided_slice %39 {offsets = [0, 448], sizes = [4, 64], strides = [1, 1]} : vector<4x512xf32> to vector<4x64xf32>
    %226 = vector.extract_strided_slice %39 {offsets = [0, 0], sizes = [4, 448], strides = [1, 1]} : vector<4x512xf32> to vector<4x448xf32>
    %227 = tpu.concatenate %225, %226 in 1 : vector<4x64xf32>, vector<4x448xf32> -> vector<4x512xf32>
    %228 = vector.extract_strided_slice %39 {offsets = [0, 64], sizes = [4, 448], strides = [1, 1]} : vector<4x512xf32> to vector<4x448xf32>
    %229 = vector.extract_strided_slice %39 {offsets = [0, 0], sizes = [4, 64], strides = [1, 1]} : vector<4x512xf32> to vector<4x64xf32>
    %230 = tpu.concatenate %228, %229 in 1 : vector<4x448xf32>, vector<4x64xf32> -> vector<4x512xf32>
    %c0_i32_68 = arith.constant 0 : i32
    %231 = vector.broadcast %c0_i32_68 : i32 to vector<1x512xi32>
    %232 = arith.cmpi eq, %1, %231 : vector<1x512xi32>
    %233 = vector.shape_cast %232 : vector<1x512xi1> to vector<1x512xi1>
    %234 = vector.broadcast %233 : vector<1x512xi1> to vector<4x512xi1>
    %235 = arith.select %234, %230, %227 : vector<4x512xi1>, vector<4x512xf32>
    %c7_i32_69 = arith.constant 7 : i32
    %236 = vector.broadcast %c7_i32_69 : i32 to vector<1x512xi32>
    %237 = arith.cmpi eq, %1, %236 : vector<1x512xi32>
    %238 = vector.shape_cast %237 : vector<1x512xi1> to vector<1x512xi1>
    %239 = vector.broadcast %238 : vector<1x512xi1> to vector<4x512xi1>
    %240 = arith.select %239, %227, %230 : vector<4x512xi1>, vector<4x512xf32>
    %c4 = arith.constant 4 : index
    %c0_70 = arith.constant 0 : index
    %c0_71 = arith.constant 0 : index
    %241 = vector.load %arg7[%c4, %c0_70, %c0_71] : memref<27x4x4xf32, #tpu.memory_space<vmem>>, vector<1x4x4xf32>
    %242 = vector.shape_cast %241 : vector<1x4x4xf32> to vector<4x4xf32>
    %243 = arith.truncf %242 : vector<4x4xf32> to vector<4x4xbf16>
    %244 = arith.truncf %235 : vector<4x512xf32> to vector<4x512xbf16>
    %cst_72 = arith.constant dense<0.000000e+00> : vector<4x512xf32>
    %245 = tpu.matmul %243, %244, %cst_72 {dimension_numbers = #tpu.dot_dimension_numbers<[1], [0], [0], [1], [0, 0, 1, 1], [], []>} : vector<4x4xbf16>, vector<4x512xbf16>, vector<4x512xf32> -> vector<4x512xf32>
    %246 = arith.addf %224, %245 : vector<4x512xf32>
    %c13 = arith.constant 13 : index
    %c0_73 = arith.constant 0 : index
    %c0_74 = arith.constant 0 : index
    %247 = vector.load %arg7[%c13, %c0_73, %c0_74] : memref<27x4x4xf32, #tpu.memory_space<vmem>>, vector<1x4x4xf32>
    %248 = vector.shape_cast %247 : vector<1x4x4xf32> to vector<4x4xf32>
    %249 = arith.truncf %248 : vector<4x4xf32> to vector<4x4xbf16>
    %250 = arith.truncf %39 : vector<4x512xf32> to vector<4x512xbf16>
    %cst_75 = arith.constant dense<0.000000e+00> : vector<4x512xf32>
    %251 = tpu.matmul %249, %250, %cst_75 {dimension_numbers = #tpu.dot_dimension_numbers<[1], [0], [0], [1], [0, 0, 1, 1], [], []>} : vector<4x4xbf16>, vector<4x512xbf16>, vector<4x512xf32> -> vector<4x512xf32>
    %252 = arith.addf %246, %251 : vector<4x512xf32>
    %c22 = arith.constant 22 : index
    %c0_76 = arith.constant 0 : index
    %c0_77 = arith.constant 0 : index
    %253 = vector.load %arg7[%c22, %c0_76, %c0_77] : memref<27x4x4xf32, #tpu.memory_space<vmem>>, vector<1x4x4xf32>
    %254 = vector.shape_cast %253 : vector<1x4x4xf32> to vector<4x4xf32>
    %255 = arith.truncf %254 : vector<4x4xf32> to vector<4x4xbf16>
    %256 = arith.truncf %240 : vector<4x512xf32> to vector<4x512xbf16>
    %cst_78 = arith.constant dense<0.000000e+00> : vector<4x512xf32>
    %257 = tpu.matmul %255, %256, %cst_78 {dimension_numbers = #tpu.dot_dimension_numbers<[1], [0], [0], [1], [0, 0, 1, 1], [], []>} : vector<4x4xbf16>, vector<4x512xbf16>, vector<4x512xf32> -> vector<4x512xf32>
    %258 = arith.addf %252, %257 : vector<4x512xf32>
    %259 = vector.extract_strided_slice %190 {offsets = [0, 448], sizes = [4, 64], strides = [1, 1]} : vector<4x512xf32> to vector<4x64xf32>
    %260 = vector.extract_strided_slice %190 {offsets = [0, 0], sizes = [4, 448], strides = [1, 1]} : vector<4x512xf32> to vector<4x448xf32>
    %261 = tpu.concatenate %259, %260 in 1 : vector<4x64xf32>, vector<4x448xf32> -> vector<4x512xf32>
    %262 = vector.extract_strided_slice %190 {offsets = [0, 64], sizes = [4, 448], strides = [1, 1]} : vector<4x512xf32> to vector<4x448xf32>
    %263 = vector.extract_strided_slice %190 {offsets = [0, 0], sizes = [4, 64], strides = [1, 1]} : vector<4x512xf32> to vector<4x64xf32>
    %264 = tpu.concatenate %262, %263 in 1 : vector<4x448xf32>, vector<4x64xf32> -> vector<4x512xf32>
    %c0_i32_79 = arith.constant 0 : i32
    %265 = vector.broadcast %c0_i32_79 : i32 to vector<1x512xi32>
    %266 = arith.cmpi eq, %1, %265 : vector<1x512xi32>
    %267 = vector.shape_cast %266 : vector<1x512xi1> to vector<1x512xi1>
    %268 = vector.broadcast %267 : vector<1x512xi1> to vector<4x512xi1>
    %269 = arith.select %268, %264, %261 : vector<4x512xi1>, vector<4x512xf32>
    %c7_i32_80 = arith.constant 7 : i32
    %270 = vector.broadcast %c7_i32_80 : i32 to vector<1x512xi32>
    %271 = arith.cmpi eq, %1, %270 : vector<1x512xi32>
    %272 = vector.shape_cast %271 : vector<1x512xi1> to vector<1x512xi1>
    %273 = vector.broadcast %272 : vector<1x512xi1> to vector<4x512xi1>
    %274 = arith.select %273, %261, %264 : vector<4x512xi1>, vector<4x512xf32>
    %c7 = arith.constant 7 : index
    %c0_81 = arith.constant 0 : index
    %c0_82 = arith.constant 0 : index
    %275 = vector.load %arg7[%c7, %c0_81, %c0_82] : memref<27x4x4xf32, #tpu.memory_space<vmem>>, vector<1x4x4xf32>
    %276 = vector.shape_cast %275 : vector<1x4x4xf32> to vector<4x4xf32>
    %277 = arith.truncf %276 : vector<4x4xf32> to vector<4x4xbf16>
    %278 = arith.truncf %269 : vector<4x512xf32> to vector<4x512xbf16>
    %cst_83 = arith.constant dense<0.000000e+00> : vector<4x512xf32>
    %279 = tpu.matmul %277, %278, %cst_83 {dimension_numbers = #tpu.dot_dimension_numbers<[1], [0], [0], [1], [0, 0, 1, 1], [], []>} : vector<4x4xbf16>, vector<4x512xbf16>, vector<4x512xf32> -> vector<4x512xf32>
    %280 = arith.addf %258, %279 : vector<4x512xf32>
    %c16 = arith.constant 16 : index
    %c0_84 = arith.constant 0 : index
    %c0_85 = arith.constant 0 : index
    %281 = vector.load %arg7[%c16, %c0_84, %c0_85] : memref<27x4x4xf32, #tpu.memory_space<vmem>>, vector<1x4x4xf32>
    %282 = vector.shape_cast %281 : vector<1x4x4xf32> to vector<4x4xf32>
    %283 = arith.truncf %282 : vector<4x4xf32> to vector<4x4xbf16>
    %284 = arith.truncf %190 : vector<4x512xf32> to vector<4x512xbf16>
    %cst_86 = arith.constant dense<0.000000e+00> : vector<4x512xf32>
    %285 = tpu.matmul %283, %284, %cst_86 {dimension_numbers = #tpu.dot_dimension_numbers<[1], [0], [0], [1], [0, 0, 1, 1], [], []>} : vector<4x4xbf16>, vector<4x512xbf16>, vector<4x512xf32> -> vector<4x512xf32>
    %286 = arith.addf %280, %285 : vector<4x512xf32>
    %c25 = arith.constant 25 : index
    %c0_87 = arith.constant 0 : index
    %c0_88 = arith.constant 0 : index
    %287 = vector.load %arg7[%c25, %c0_87, %c0_88] : memref<27x4x4xf32, #tpu.memory_space<vmem>>, vector<1x4x4xf32>
    %288 = vector.shape_cast %287 : vector<1x4x4xf32> to vector<4x4xf32>
    %289 = arith.truncf %288 : vector<4x4xf32> to vector<4x4xbf16>
    %290 = arith.truncf %274 : vector<4x512xf32> to vector<4x512xbf16>
    %cst_89 = arith.constant dense<0.000000e+00> : vector<4x512xf32>
    %291 = tpu.matmul %289, %290, %cst_89 {dimension_numbers = #tpu.dot_dimension_numbers<[1], [0], [0], [1], [0, 0, 1, 1], [], []>} : vector<4x4xbf16>, vector<4x512xbf16>, vector<4x512xf32> -> vector<4x512xf32>
    %292 = arith.addf %286, %291 : vector<4x512xf32>
    %293 = vector.extract_strided_slice %56 {offsets = [0, 504], sizes = [4, 8], strides = [1, 1]} : vector<4x512xf32> to vector<4x8xf32>
    %294 = vector.extract_strided_slice %56 {offsets = [0, 0], sizes = [4, 504], strides = [1, 1]} : vector<4x512xf32> to vector<4x504xf32>
    %295 = tpu.concatenate %293, %294 in 1 : vector<4x8xf32>, vector<4x504xf32> -> vector<4x512xf32>
    %296 = vector.extract_strided_slice %56 {offsets = [0, 8], sizes = [4, 504], strides = [1, 1]} : vector<4x512xf32> to vector<4x504xf32>
    %297 = vector.extract_strided_slice %56 {offsets = [0, 0], sizes = [4, 8], strides = [1, 1]} : vector<4x512xf32> to vector<4x8xf32>
    %298 = tpu.concatenate %296, %297 in 1 : vector<4x504xf32>, vector<4x8xf32> -> vector<4x512xf32>
    %c0_i32_90 = arith.constant 0 : i32
    %299 = vector.broadcast %c0_i32_90 : i32 to vector<1x512xi32>
    %300 = arith.cmpi eq, %2, %299 : vector<1x512xi32>
    %301 = vector.shape_cast %300 : vector<1x512xi1> to vector<1x512xi1>
    %302 = vector.broadcast %301 : vector<1x512xi1> to vector<4x512xi1>
    %303 = arith.select %302, %298, %295 : vector<4x512xi1>, vector<4x512xf32>
    %c7_i32_91 = arith.constant 7 : i32
    %304 = vector.broadcast %c7_i32_91 : i32 to vector<1x512xi32>
    %305 = arith.cmpi eq, %2, %304 : vector<1x512xi32>
    %306 = vector.shape_cast %305 : vector<1x512xi1> to vector<1x512xi1>
    %307 = vector.broadcast %306 : vector<1x512xi1> to vector<4x512xi1>
    %308 = arith.select %307, %295, %298 : vector<4x512xi1>, vector<4x512xf32>
    %309 = vector.extract_strided_slice %303 {offsets = [0, 448], sizes = [4, 64], strides = [1, 1]} : vector<4x512xf32> to vector<4x64xf32>
    %310 = vector.extract_strided_slice %303 {offsets = [0, 0], sizes = [4, 448], strides = [1, 1]} : vector<4x512xf32> to vector<4x448xf32>
    %311 = tpu.concatenate %309, %310 in 1 : vector<4x64xf32>, vector<4x448xf32> -> vector<4x512xf32>
    %312 = vector.extract_strided_slice %303 {offsets = [0, 64], sizes = [4, 448], strides = [1, 1]} : vector<4x512xf32> to vector<4x448xf32>
    %313 = vector.extract_strided_slice %303 {offsets = [0, 0], sizes = [4, 64], strides = [1, 1]} : vector<4x512xf32> to vector<4x64xf32>
    %314 = tpu.concatenate %312, %313 in 1 : vector<4x448xf32>, vector<4x64xf32> -> vector<4x512xf32>
    %c0_i32_92 = arith.constant 0 : i32
    %315 = vector.broadcast %c0_i32_92 : i32 to vector<1x512xi32>
    %316 = arith.cmpi eq, %1, %315 : vector<1x512xi32>
    %317 = vector.shape_cast %316 : vector<1x512xi1> to vector<1x512xi1>
    %318 = vector.broadcast %317 : vector<1x512xi1> to vector<4x512xi1>
    %319 = arith.select %318, %314, %311 : vector<4x512xi1>, vector<4x512xf32>
    %c7_i32_93 = arith.constant 7 : i32
    %320 = vector.broadcast %c7_i32_93 : i32 to vector<1x512xi32>
    %321 = arith.cmpi eq, %1, %320 : vector<1x512xi32>
    %322 = vector.shape_cast %321 : vector<1x512xi1> to vector<1x512xi1>
    %323 = vector.broadcast %322 : vector<1x512xi1> to vector<4x512xi1>
    %324 = arith.select %323, %311, %314 : vector<4x512xi1>, vector<4x512xf32>
    %c2 = arith.constant 2 : index
    %c0_94 = arith.constant 0 : index
    %c0_95 = arith.constant 0 : index
    %325 = vector.load %arg7[%c2, %c0_94, %c0_95] : memref<27x4x4xf32, #tpu.memory_space<vmem>>, vector<1x4x4xf32>
    %326 = vector.shape_cast %325 : vector<1x4x4xf32> to vector<4x4xf32>
    %327 = arith.truncf %326 : vector<4x4xf32> to vector<4x4xbf16>
    %328 = arith.truncf %319 : vector<4x512xf32> to vector<4x512xbf16>
    %cst_96 = arith.constant dense<0.000000e+00> : vector<4x512xf32>
    %329 = tpu.matmul %327, %328, %cst_96 {dimension_numbers = #tpu.dot_dimension_numbers<[1], [0], [0], [1], [0, 0, 1, 1], [], []>} : vector<4x4xbf16>, vector<4x512xbf16>, vector<4x512xf32> -> vector<4x512xf32>
    %330 = arith.addf %292, %329 : vector<4x512xf32>
    %c11 = arith.constant 11 : index
    %c0_97 = arith.constant 0 : index
    %c0_98 = arith.constant 0 : index
    %331 = vector.load %arg7[%c11, %c0_97, %c0_98] : memref<27x4x4xf32, #tpu.memory_space<vmem>>, vector<1x4x4xf32>
    %332 = vector.shape_cast %331 : vector<1x4x4xf32> to vector<4x4xf32>
    %333 = arith.truncf %332 : vector<4x4xf32> to vector<4x4xbf16>
    %334 = arith.truncf %303 : vector<4x512xf32> to vector<4x512xbf16>
    %cst_99 = arith.constant dense<0.000000e+00> : vector<4x512xf32>
    %335 = tpu.matmul %333, %334, %cst_99 {dimension_numbers = #tpu.dot_dimension_numbers<[1], [0], [0], [1], [0, 0, 1, 1], [], []>} : vector<4x4xbf16>, vector<4x512xbf16>, vector<4x512xf32> -> vector<4x512xf32>
    %336 = arith.addf %330, %335 : vector<4x512xf32>
    %c20 = arith.constant 20 : index
    %c0_100 = arith.constant 0 : index
    %c0_101 = arith.constant 0 : index
    %337 = vector.load %arg7[%c20, %c0_100, %c0_101] : memref<27x4x4xf32, #tpu.memory_space<vmem>>, vector<1x4x4xf32>
    %338 = vector.shape_cast %337 : vector<1x4x4xf32> to vector<4x4xf32>
    %339 = arith.truncf %338 : vector<4x4xf32> to vector<4x4xbf16>
    %340 = arith.truncf %324 : vector<4x512xf32> to vector<4x512xbf16>
    %cst_102 = arith.constant dense<0.000000e+00> : vector<4x512xf32>
    %341 = tpu.matmul %339, %340, %cst_102 {dimension_numbers = #tpu.dot_dimension_numbers<[1], [0], [0], [1], [0, 0, 1, 1], [], []>} : vector<4x4xbf16>, vector<4x512xbf16>, vector<4x512xf32> -> vector<4x512xf32>
    %342 = arith.addf %336, %341 : vector<4x512xf32>
    %343 = vector.extract_strided_slice %56 {offsets = [0, 448], sizes = [4, 64], strides = [1, 1]} : vector<4x512xf32> to vector<4x64xf32>
    %344 = vector.extract_strided_slice %56 {offsets = [0, 0], sizes = [4, 448], strides = [1, 1]} : vector<4x512xf32> to vector<4x448xf32>
    %345 = tpu.concatenate %343, %344 in 1 : vector<4x64xf32>, vector<4x448xf32> -> vector<4x512xf32>
    %346 = vector.extract_strided_slice %56 {offsets = [0, 64], sizes = [4, 448], strides = [1, 1]} : vector<4x512xf32> to vector<4x448xf32>
    %347 = vector.extract_strided_slice %56 {offsets = [0, 0], sizes = [4, 64], strides = [1, 1]} : vector<4x512xf32> to vector<4x64xf32>
    %348 = tpu.concatenate %346, %347 in 1 : vector<4x448xf32>, vector<4x64xf32> -> vector<4x512xf32>
    %c0_i32_103 = arith.constant 0 : i32
    %349 = vector.broadcast %c0_i32_103 : i32 to vector<1x512xi32>
    %350 = arith.cmpi eq, %1, %349 : vector<1x512xi32>
    %351 = vector.shape_cast %350 : vector<1x512xi1> to vector<1x512xi1>
    %352 = vector.broadcast %351 : vector<1x512xi1> to vector<4x512xi1>
    %353 = arith.select %352, %348, %345 : vector<4x512xi1>, vector<4x512xf32>
    %c7_i32_104 = arith.constant 7 : i32
    %354 = vector.broadcast %c7_i32_104 : i32 to vector<1x512xi32>
    %355 = arith.cmpi eq, %1, %354 : vector<1x512xi32>
    %356 = vector.shape_cast %355 : vector<1x512xi1> to vector<1x512xi1>
    %357 = vector.broadcast %356 : vector<1x512xi1> to vector<4x512xi1>
    %358 = arith.select %357, %345, %348 : vector<4x512xi1>, vector<4x512xf32>
    %c5 = arith.constant 5 : index
    %c0_105 = arith.constant 0 : index
    %c0_106 = arith.constant 0 : index
    %359 = vector.load %arg7[%c5, %c0_105, %c0_106] : memref<27x4x4xf32, #tpu.memory_space<vmem>>, vector<1x4x4xf32>
    %360 = vector.shape_cast %359 : vector<1x4x4xf32> to vector<4x4xf32>
    %361 = arith.truncf %360 : vector<4x4xf32> to vector<4x4xbf16>
    %362 = arith.truncf %353 : vector<4x512xf32> to vector<4x512xbf16>
    %cst_107 = arith.constant dense<0.000000e+00> : vector<4x512xf32>
    %363 = tpu.matmul %361, %362, %cst_107 {dimension_numbers = #tpu.dot_dimension_numbers<[1], [0], [0], [1], [0, 0, 1, 1], [], []>} : vector<4x4xbf16>, vector<4x512xbf16>, vector<4x512xf32> -> vector<4x512xf32>
    %364 = arith.addf %342, %363 : vector<4x512xf32>
    %c14 = arith.constant 14 : index
    %c0_108 = arith.constant 0 : index
    %c0_109 = arith.constant 0 : index
    %365 = vector.load %arg7[%c14, %c0_108, %c0_109] : memref<27x4x4xf32, #tpu.memory_space<vmem>>, vector<1x4x4xf32>
    %366 = vector.shape_cast %365 : vector<1x4x4xf32> to vector<4x4xf32>
    %367 = arith.truncf %366 : vector<4x4xf32> to vector<4x4xbf16>
    %368 = arith.truncf %56 : vector<4x512xf32> to vector<4x512xbf16>
    %cst_110 = arith.constant dense<0.000000e+00> : vector<4x512xf32>
    %369 = tpu.matmul %367, %368, %cst_110 {dimension_numbers = #tpu.dot_dimension_numbers<[1], [0], [0], [1], [0, 0, 1, 1], [], []>} : vector<4x4xbf16>, vector<4x512xbf16>, vector<4x512xf32> -> vector<4x512xf32>
    %370 = arith.addf %364, %369 : vector<4x512xf32>
    %c23 = arith.constant 23 : index
    %c0_111 = arith.constant 0 : index
    %c0_112 = arith.constant 0 : index
    %371 = vector.load %arg7[%c23, %c0_111, %c0_112] : memref<27x4x4xf32, #tpu.memory_space<vmem>>, vector<1x4x4xf32>
    %372 = vector.shape_cast %371 : vector<1x4x4xf32> to vector<4x4xf32>
    %373 = arith.truncf %372 : vector<4x4xf32> to vector<4x4xbf16>
    %374 = arith.truncf %358 : vector<4x512xf32> to vector<4x512xbf16>
    %cst_113 = arith.constant dense<0.000000e+00> : vector<4x512xf32>
    %375 = tpu.matmul %373, %374, %cst_113 {dimension_numbers = #tpu.dot_dimension_numbers<[1], [0], [0], [1], [0, 0, 1, 1], [], []>} : vector<4x4xbf16>, vector<4x512xbf16>, vector<4x512xf32> -> vector<4x512xf32>
    %376 = arith.addf %370, %375 : vector<4x512xf32>
    %377 = vector.extract_strided_slice %308 {offsets = [0, 448], sizes = [4, 64], strides = [1, 1]} : vector<4x512xf32> to vector<4x64xf32>
    %378 = vector.extract_strided_slice %308 {offsets = [0, 0], sizes = [4, 448], strides = [1, 1]} : vector<4x512xf32> to vector<4x448xf32>
    %379 = tpu.concatenate %377, %378 in 1 : vector<4x64xf32>, vector<4x448xf32> -> vector<4x512xf32>
    %380 = vector.extract_strided_slice %308 {offsets = [0, 64], sizes = [4, 448], strides = [1, 1]} : vector<4x512xf32> to vector<4x448xf32>
    %381 = vector.extract_strided_slice %308 {offsets = [0, 0], sizes = [4, 64], strides = [1, 1]} : vector<4x512xf32> to vector<4x64xf32>
    %382 = tpu.concatenate %380, %381 in 1 : vector<4x448xf32>, vector<4x64xf32> -> vector<4x512xf32>
    %c0_i32_114 = arith.constant 0 : i32
    %383 = vector.broadcast %c0_i32_114 : i32 to vector<1x512xi32>
    %384 = arith.cmpi eq, %1, %383 : vector<1x512xi32>
    %385 = vector.shape_cast %384 : vector<1x512xi1> to vector<1x512xi1>
    %386 = vector.broadcast %385 : vector<1x512xi1> to vector<4x512xi1>
    %387 = arith.select %386, %382, %379 : vector<4x512xi1>, vector<4x512xf32>
    %c7_i32_115 = arith.constant 7 : i32
    %388 = vector.broadcast %c7_i32_115 : i32 to vector<1x512xi32>
    %389 = arith.cmpi eq, %1, %388 : vector<1x512xi32>
    %390 = vector.shape_cast %389 : vector<1x512xi1> to vector<1x512xi1>
    %391 = vector.broadcast %390 : vector<1x512xi1> to vector<4x512xi1>
    %392 = arith.select %391, %379, %382 : vector<4x512xi1>, vector<4x512xf32>
    %c8 = arith.constant 8 : index
    %c0_116 = arith.constant 0 : index
    %c0_117 = arith.constant 0 : index
    %393 = vector.load %arg7[%c8, %c0_116, %c0_117] : memref<27x4x4xf32, #tpu.memory_space<vmem>>, vector<1x4x4xf32>
    %394 = vector.shape_cast %393 : vector<1x4x4xf32> to vector<4x4xf32>
    %395 = arith.truncf %394 : vector<4x4xf32> to vector<4x4xbf16>
    %396 = arith.truncf %387 : vector<4x512xf32> to vector<4x512xbf16>
    %cst_118 = arith.constant dense<0.000000e+00> : vector<4x512xf32>
    %397 = tpu.matmul %395, %396, %cst_118 {dimension_numbers = #tpu.dot_dimension_numbers<[1], [0], [0], [1], [0, 0, 1, 1], [], []>} : vector<4x4xbf16>, vector<4x512xbf16>, vector<4x512xf32> -> vector<4x512xf32>
    %398 = arith.addf %376, %397 : vector<4x512xf32>
    %c17 = arith.constant 17 : index
    %c0_119 = arith.constant 0 : index
    %c0_120 = arith.constant 0 : index
    %399 = vector.load %arg7[%c17, %c0_119, %c0_120] : memref<27x4x4xf32, #tpu.memory_space<vmem>>, vector<1x4x4xf32>
    %400 = vector.shape_cast %399 : vector<1x4x4xf32> to vector<4x4xf32>
    %401 = arith.truncf %400 : vector<4x4xf32> to vector<4x4xbf16>
    %402 = arith.truncf %308 : vector<4x512xf32> to vector<4x512xbf16>
    %cst_121 = arith.constant dense<0.000000e+00> : vector<4x512xf32>
    %403 = tpu.matmul %401, %402, %cst_121 {dimension_numbers = #tpu.dot_dimension_numbers<[1], [0], [0], [1], [0, 0, 1, 1], [], []>} : vector<4x4xbf16>, vector<4x512xbf16>, vector<4x512xf32> -> vector<4x512xf32>
    %404 = arith.addf %398, %403 : vector<4x512xf32>
    %c26 = arith.constant 26 : index
    %c0_122 = arith.constant 0 : index
    %c0_123 = arith.constant 0 : index
    %405 = vector.load %arg7[%c26, %c0_122, %c0_123] : memref<27x4x4xf32, #tpu.memory_space<vmem>>, vector<1x4x4xf32>
    %406 = vector.shape_cast %405 : vector<1x4x4xf32> to vector<4x4xf32>
    %407 = arith.truncf %406 : vector<4x4xf32> to vector<4x4xbf16>
    %408 = arith.truncf %392 : vector<4x512xf32> to vector<4x512xbf16>
    %cst_124 = arith.constant dense<0.000000e+00> : vector<4x512xf32>
    %409 = tpu.matmul %407, %408, %cst_124 {dimension_numbers = #tpu.dot_dimension_numbers<[1], [0], [0], [1], [0, 0, 1, 1], [], []>} : vector<4x4xbf16>, vector<4x512xbf16>, vector<4x512xf32> -> vector<4x512xf32>
    %410 = arith.addf %404, %409 : vector<4x512xf32>
    %c0_125 = arith.constant 0 : index
    %c0_126 = arith.constant 0 : index
    %411 = vector.load %arg8[%c0_125, %c0_126] : memref<4x1xf32, #tpu.memory_space<vmem>>, vector<4x1xf32>
    %412 = vector.broadcast %411 : vector<4x1xf32> to vector<4x512xf32>
    %413 = arith.addf %410, %412 : vector<4x512xf32>
    %cst_127 = arith.constant dense<0.000000e+00> : vector<4xf32>
    %414 = vector.multi_reduction <add>, %413, %cst_127 [1] : vector<4x512xf32> to vector<4xf32>
    %415 = vector.shape_cast %414 : vector<4xf32> to vector<4x1xf32>
    %cst_128 = arith.constant 0.001953125 : f32
    %416 = vector.broadcast %cst_128 : f32 to vector<4x1xf32>
    %417 = arith.mulf %415, %416 : vector<4x1xf32>
    %418 = arith.mulf %413, %413 : vector<4x512xf32>
    %cst_129 = arith.constant dense<0.000000e+00> : vector<4xf32>
    %419 = vector.multi_reduction <add>, %418, %cst_129 [1] : vector<4x512xf32> to vector<4xf32>
    %420 = vector.shape_cast %419 : vector<4xf32> to vector<4x1xf32>
    %cst_130 = arith.constant 0.001953125 : f32
    %421 = vector.broadcast %cst_130 : f32 to vector<4x1xf32>
    %422 = arith.mulf %420, %421 : vector<4x1xf32>
    %423 = arith.mulf %417, %417 : vector<4x1xf32>
    %424 = arith.subf %422, %423 : vector<4x1xf32>
    %425 = vector.broadcast %417 : vector<4x1xf32> to vector<4x512xf32>
    %426 = arith.subf %413, %425 : vector<4x512xf32>
    %cst_131 = arith.constant 9.99999974E-6 : f32
    %427 = vector.broadcast %cst_131 : f32 to vector<4x1xf32>
    %428 = arith.addf %424, %427 : vector<4x1xf32>
    %429 = math.rsqrt %428 : vector<4x1xf32>
    %430 = vector.broadcast %429 : vector<4x1xf32> to vector<4x512xf32>
    %431 = arith.mulf %426, %430 : vector<4x512xf32>
    %cst_132 = arith.constant 0.000000e+00 : f32
    %432 = vector.broadcast %cst_132 : f32 to vector<4x512xf32>
    %433 = arith.cmpf oge, %431, %432 : vector<4x512xf32>
    %cst_133 = arith.constant 2.000000e-01 : f32
    %434 = vector.broadcast %cst_133 : f32 to vector<4x512xf32>
    %435 = arith.mulf %434, %431 : vector<4x512xf32>
    %436 = arith.select %433, %431, %435 : vector<4x512xi1>, vector<4x512xf32>
    %c0_134 = arith.constant 0 : index
    %c0_135 = arith.constant 0 : index
    %437 = vector.load %arg9[%c0_134, %c0_135] : memref<16x4xf32, #tpu.memory_space<vmem>>, vector<16x4xf32>
    %438 = arith.truncf %437 : vector<16x4xf32> to vector<16x4xbf16>
    %439 = arith.truncf %436 : vector<4x512xf32> to vector<4x512xbf16>
    %cst_136 = arith.constant dense<0.000000e+00> : vector<16x512xf32>
    %440 = tpu.matmul %438, %439, %cst_136 {dimension_numbers = #tpu.dot_dimension_numbers<[1], [0], [0], [1], [0, 0, 1, 1], [], []>} : vector<16x4xbf16>, vector<4x512xbf16>, vector<16x512xf32> -> vector<16x512xf32>
    %c0_137 = arith.constant 0 : index
    %c0_138 = arith.constant 0 : index
    %441 = vector.load %arg10[%c0_137, %c0_138] : memref<16x1xf32, #tpu.memory_space<vmem>>, vector<16x1xf32>
    %442 = vector.broadcast %441 : vector<16x1xf32> to vector<16x512xf32>
    %443 = arith.addf %440, %442 : vector<16x512xf32>
    %cst_139 = arith.constant dense<0.000000e+00> : vector<16xf32>
    %444 = vector.multi_reduction <add>, %443, %cst_139 [1] : vector<16x512xf32> to vector<16xf32>
    %445 = vector.shape_cast %444 : vector<16xf32> to vector<16x1xf32>
    %cst_140 = arith.constant 0.001953125 : f32
    %446 = vector.broadcast %cst_140 : f32 to vector<16x1xf32>
    %447 = arith.mulf %445, %446 : vector<16x1xf32>
    %448 = arith.mulf %443, %443 : vector<16x512xf32>
    %cst_141 = arith.constant dense<0.000000e+00> : vector<16xf32>
    %449 = vector.multi_reduction <add>, %448, %cst_141 [1] : vector<16x512xf32> to vector<16xf32>
    %450 = vector.shape_cast %449 : vector<16xf32> to vector<16x1xf32>
    %cst_142 = arith.constant 0.001953125 : f32
    %451 = vector.broadcast %cst_142 : f32 to vector<16x1xf32>
    %452 = arith.mulf %450, %451 : vector<16x1xf32>
    %453 = arith.mulf %447, %447 : vector<16x1xf32>
    %454 = arith.subf %452, %453 : vector<16x1xf32>
    %455 = vector.broadcast %447 : vector<16x1xf32> to vector<16x512xf32>
    %456 = arith.subf %443, %455 : vector<16x512xf32>
    %cst_143 = arith.constant 9.99999974E-6 : f32
    %457 = vector.broadcast %cst_143 : f32 to vector<16x1xf32>
    %458 = arith.addf %454, %457 : vector<16x1xf32>
    %459 = math.rsqrt %458 : vector<16x1xf32>
    %460 = vector.broadcast %459 : vector<16x1xf32> to vector<16x512xf32>
    %461 = arith.mulf %456, %460 : vector<16x512xf32>
    %cst_144 = arith.constant 0.000000e+00 : f32
    %462 = vector.broadcast %cst_144 : f32 to vector<16x512xf32>
    %463 = arith.cmpf oge, %461, %462 : vector<16x512xf32>
    %cst_145 = arith.constant 2.000000e-01 : f32
    %464 = vector.broadcast %cst_145 : f32 to vector<16x512xf32>
    %465 = arith.mulf %464, %461 : vector<16x512xf32>
    %466 = arith.select %463, %461, %465 : vector<16x512xi1>, vector<16x512xf32>
    %c0_146 = arith.constant 0 : index
    %c0_147 = arith.constant 0 : index
    %467 = vector.load %arg11[%c0_146, %c0_147] : memref<16x32xf32, #tpu.memory_space<vmem>>, vector<16x32xf32>
    %468 = vector.extract_strided_slice %467 {offsets = [0, 0], sizes = [16, 16], strides = [1, 1]} : vector<16x32xf32> to vector<16x16xf32>
    %c0_148 = arith.constant 0 : index
    %c0_149 = arith.constant 0 : index
    %c0_150 = arith.constant 0 : index
    %469 = vector.load %arg2[%c0_148, %c0_149, %c0_150] : memref<1x16x512xf32, #tpu.memory_space<vmem>>, vector<1x16x512xf32>
    %470 = vector.shape_cast %469 : vector<1x16x512xf32> to vector<16x512xf32>
    %471 = arith.truncf %468 : vector<16x16xf32> to vector<16x16xbf16>
    %472 = arith.truncf %470 : vector<16x512xf32> to vector<16x512xbf16>
    %cst_151 = arith.constant dense<0.000000e+00> : vector<16x512xf32>
    %473 = tpu.matmul %471, %472, %cst_151 {dimension_numbers = #tpu.dot_dimension_numbers<[1], [0], [0], [1], [0, 0, 1, 1], [], []>} : vector<16x16xbf16>, vector<16x512xbf16>, vector<16x512xf32> -> vector<16x512xf32>
    %474 = vector.extract_strided_slice %467 {offsets = [0, 16], sizes = [16, 16], strides = [1, 1]} : vector<16x32xf32> to vector<16x16xf32>
    %475 = arith.truncf %474 : vector<16x16xf32> to vector<16x16xbf16>
    %476 = arith.truncf %466 : vector<16x512xf32> to vector<16x512xbf16>
    %cst_152 = arith.constant dense<0.000000e+00> : vector<16x512xf32>
    %477 = tpu.matmul %475, %476, %cst_152 {dimension_numbers = #tpu.dot_dimension_numbers<[1], [0], [0], [1], [0, 0, 1, 1], [], []>} : vector<16x16xbf16>, vector<16x512xbf16>, vector<16x512xf32> -> vector<16x512xf32>
    %478 = arith.addf %473, %477 : vector<16x512xf32>
    %c0_153 = arith.constant 0 : index
    %c0_154 = arith.constant 0 : index
    %479 = vector.load %arg12[%c0_153, %c0_154] : memref<16x1xf32, #tpu.memory_space<vmem>>, vector<16x1xf32>
    %480 = vector.broadcast %479 : vector<16x1xf32> to vector<16x512xf32>
    %481 = arith.addf %478, %480 : vector<16x512xf32>
    %cst_155 = arith.constant dense<0.000000e+00> : vector<16xf32>
    %482 = vector.multi_reduction <add>, %481, %cst_155 [1] : vector<16x512xf32> to vector<16xf32>
    %483 = vector.shape_cast %482 : vector<16xf32> to vector<16x1xf32>
    %cst_156 = arith.constant 0.001953125 : f32
    %484 = vector.broadcast %cst_156 : f32 to vector<16x1xf32>
    %485 = arith.mulf %483, %484 : vector<16x1xf32>
    %486 = arith.mulf %481, %481 : vector<16x512xf32>
    %cst_157 = arith.constant dense<0.000000e+00> : vector<16xf32>
    %487 = vector.multi_reduction <add>, %486, %cst_157 [1] : vector<16x512xf32> to vector<16xf32>
    %488 = vector.shape_cast %487 : vector<16xf32> to vector<16x1xf32>
    %cst_158 = arith.constant 0.001953125 : f32
    %489 = vector.broadcast %cst_158 : f32 to vector<16x1xf32>
    %490 = arith.mulf %488, %489 : vector<16x1xf32>
    %491 = arith.mulf %485, %485 : vector<16x1xf32>
    %492 = arith.subf %490, %491 : vector<16x1xf32>
    %493 = vector.broadcast %485 : vector<16x1xf32> to vector<16x512xf32>
    %494 = arith.subf %481, %493 : vector<16x512xf32>
    %cst_159 = arith.constant 9.99999974E-6 : f32
    %495 = vector.broadcast %cst_159 : f32 to vector<16x1xf32>
    %496 = arith.addf %492, %495 : vector<16x1xf32>
    %497 = math.rsqrt %496 : vector<16x1xf32>
    %498 = vector.broadcast %497 : vector<16x1xf32> to vector<16x512xf32>
    %499 = arith.mulf %494, %498 : vector<16x512xf32>
    %cst_160 = arith.constant 0.000000e+00 : f32
    %500 = vector.broadcast %cst_160 : f32 to vector<16x512xf32>
    %501 = arith.cmpf oge, %499, %500 : vector<16x512xf32>
    %cst_161 = arith.constant 2.000000e-01 : f32
    %502 = vector.broadcast %cst_161 : f32 to vector<16x512xf32>
    %503 = arith.mulf %502, %499 : vector<16x512xf32>
    %504 = arith.select %501, %499, %503 : vector<16x512xi1>, vector<16x512xf32>
    %c0_162 = arith.constant 0 : index
    %c0_163 = arith.constant 0 : index
    %505 = vector.load %arg13[%c0_162, %c0_163] : memref<4x16xf32, #tpu.memory_space<vmem>>, vector<4x16xf32>
    %506 = arith.truncf %505 : vector<4x16xf32> to vector<4x16xbf16>
    %507 = arith.truncf %504 : vector<16x512xf32> to vector<16x512xbf16>
    %cst_164 = arith.constant dense<0.000000e+00> : vector<4x512xf32>
    %508 = tpu.matmul %506, %507, %cst_164 {dimension_numbers = #tpu.dot_dimension_numbers<[1], [0], [0], [1], [0, 0, 1, 1], [], []>} : vector<4x16xbf16>, vector<16x512xbf16>, vector<4x512xf32> -> vector<4x512xf32>
    %c0_165 = arith.constant 0 : index
    %c0_166 = arith.constant 0 : index
    %509 = vector.load %arg14[%c0_165, %c0_166] : memref<4x1xf32, #tpu.memory_space<vmem>>, vector<4x1xf32>
    %510 = vector.broadcast %509 : vector<4x1xf32> to vector<4x512xf32>
    %511 = arith.addf %508, %510 : vector<4x512xf32>
    %cst_167 = arith.constant dense<0xFF800000> : vector<512xf32>
    %512 = vector.multi_reduction <maximumf>, %511, %cst_167 [0] : vector<4x512xf32> to vector<512xf32>
    %513 = vector.shape_cast %512 : vector<512xf32> to vector<1x512xf32>
    %514 = vector.broadcast %513 : vector<1x512xf32> to vector<4x512xf32>
    %515 = arith.subf %511, %514 : vector<4x512xf32>
    %516 = math.exp %515 : vector<4x512xf32>
    %cst_168 = arith.constant dense<0.000000e+00> : vector<512xf32>
    %517 = vector.multi_reduction <add>, %516, %cst_168 [0] : vector<4x512xf32> to vector<512xf32>
    %518 = vector.shape_cast %517 : vector<512xf32> to vector<1x512xf32>
    %519 = tpu.reciprocal %518 {approx = true} : vector<1x512xf32> -> vector<1x512xf32>
    %520 = vector.broadcast %519 : vector<1x512xf32> to vector<4x512xf32>
    %521 = arith.mulf %516, %520 : vector<4x512xf32>
    %c0_169 = arith.constant 0 : index
    %c0_170 = arith.constant 0 : index
    %c0_171 = arith.constant 0 : index
    %522 = vector.load %arg15[%c0_169, %c0_170, %c0_171] : memref<1x4x512xf32, #tpu.memory_space<vmem>>, vector<1x4x512xf32>
    %523 = vector.shape_cast %522 : vector<1x4x512xf32> to vector<4x512xf32>
    %524 = vector.shape_cast %521 : vector<4x512xf32> to vector<1x4x512xf32>
    tpu.vector_store %arg15[%c0_169, %c0_170, %c0_171], %524 {strides = array<i32>} : memref<1x4x512xf32, #tpu.memory_space<vmem>>, vector<1x4x512xf32>,
    return
  }
  func.func @transform_0(%arg0: i32) -> (i32, i32) {
    %c0_i32 = arith.constant 0 : i32
    %c0_i32_0 = arith.constant 0 : i32
    %c0_i32_1 = arith.constant 0 : i32
    return %c0_i32, %c0_i32_0 : i32, i32
  }
  func.func @transform_1(%arg0: i32) -> (i32, i32, i32) {
    %c0_i32 = arith.constant 0 : i32
    %c0_i32_0 = arith.constant 0 : i32
    %c0_i32_1 = arith.constant 0 : i32
    return %arg0, %c0_i32, %c0_i32_0 : i32, i32, i32
  }
  func.func @transform_2(%arg0: i32) -> (i32, i32, i32) {
    %c0_i32 = arith.constant 0 : i32
    %c0_i32_0 = arith.constant 0 : i32
    %c0_i32_1 = arith.constant 0 : i32
    return %arg0, %c0_i32, %c0_i32_0 : i32, i32, i32
  }
  func.func @transform_3(%arg0: i32) -> (i32, i32, i32) {
    %c0_i32 = arith.constant 0 : i32
    %c0_i32_0 = arith.constant 0 : i32
    %c0_i32_1 = arith.constant 0 : i32
    return %arg0, %c0_i32, %c0_i32_0 : i32, i32, i32
  }
  func.func @transform_4(%arg0: i32) -> (i32, i32) {
    %c0_i32 = arith.constant 0 : i32
    %c0_i32_0 = arith.constant 0 : i32
    %c0_i32_1 = arith.constant 0 : i32
    return %c0_i32, %c0_i32_0 : i32, i32
  }
  func.func @transform_5(%arg0: i32) -> (i32, i32) {
    %c0_i32 = arith.constant 0 : i32
    %c0_i32_0 = arith.constant 0 : i32
    %c0_i32_1 = arith.constant 0 : i32
    return %c0_i32, %c0_i32_0 : i32, i32
  }
  func.func @transform_6(%arg0: i32) -> (i32, i32, i32) {
    %c0_i32 = arith.constant 0 : i32
    %c0_i32_0 = arith.constant 0 : i32
    %c0_i32_1 = arith.constant 0 : i32
    %c0_i32_2 = arith.constant 0 : i32
    return %c0_i32, %c0_i32_0, %c0_i32_1 : i32, i32, i32
  }
  func.func @transform_7(%arg0: i32) -> (i32, i32) {
    %c0_i32 = arith.constant 0 : i32
    %c0_i32_0 = arith.constant 0 : i32
    %c0_i32_1 = arith.constant 0 : i32
    return %c0_i32, %c0_i32_0 : i32, i32
  }
  func.func @transform_8(%arg0: i32) -> (i32, i32) {
    %c0_i32 = arith.constant 0 : i32
    %c0_i32_0 = arith.constant 0 : i32
    %c0_i32_1 = arith.constant 0 : i32
    return %c0_i32, %c0_i32_0 : i32, i32
  }
  func.func @transform_9(%arg0: i32) -> (i32, i32) {
    %c0_i32 = arith.constant 0 : i32
    %c0_i32_0 = arith.constant 0 : i32
    %c0_i32_1 = arith.constant 0 : i32
    return %c0_i32, %c0_i32_0 : i32, i32
  }
  func.func @transform_10(%arg0: i32) -> (i32, i32) {
    %c0_i32 = arith.constant 0 : i32
    %c0_i32_0 = arith.constant 0 : i32
    %c0_i32_1 = arith.constant 0 : i32
    return %c0_i32, %c0_i32_0 : i32, i32
  }
  func.func @transform_11(%arg0: i32) -> (i32, i32) {
    %c0_i32 = arith.constant 0 : i32
    %c0_i32_0 = arith.constant 0 : i32
    %c0_i32_1 = arith.constant 0 : i32
    return %c0_i32, %c0_i32_0 : i32, i32
  }
  func.func @transform_12(%arg0: i32) -> (i32, i32) {
    %c0_i32 = arith.constant 0 : i32
    %c0_i32_0 = arith.constant 0 : i32
    %c0_i32_1 = arith.constant 0 : i32
    return %c0_i32, %c0_i32_0 : i32, i32
  }
  func.func @transform_13(%arg0: i32) -> (i32, i32) {
    %c0_i32 = arith.constant 0 : i32
    %c0_i32_0 = arith.constant 0 : i32
    %c0_i32_1 = arith.constant 0 : i32
    return %c0_i32, %c0_i32_0 : i32, i32
  }
  func.func @transform_14(%arg0: i32) -> (i32, i32, i32) {
    %c0_i32 = arith.constant 0 : i32
    %c0_i32_0 = arith.constant 0 : i32
    %c0_i32_1 = arith.constant 0 : i32
    return %arg0, %c0_i32, %c0_i32_0 : i32, i32, i32
  }
}

</mosaic_0001>

<bundles_post_ra>
// kernel: prm_generator_forward.1
= control target key start
LH: loop header
LB: loop body
LE: loop exit
PB: predicated region body
PF: predicated region fallthrough
CT: control target
= control target key end

     0   :  { %s5647_s29 = smov 0   ;;  %s7008_s0 = inlined_call_operand.vmem [shape: s32[3,512], index: 0, kind: input, shape index: {}]   ;;  %s7009_s1 = inlined_call_operand.vmem [shape: f32[2,16,512], index: 1, kind: input, shape index: {}]   ;;  %s7010_s2 = inlined_call_operand.vmem [shape: f32[2,64,512], index: 2, kind: input, shape index: {}]   ;;  %s7011_s3 = inlined_call_operand.vmem [shape: f32[2,64,1], index: 3, kind: input, shape index: {}]   ;;  %s7012_s4 = inlined_call_operand.vmem [shape: f32[4,64], index: 4, kind: input, shape index: {}]   ;;  %s7013_s5 = inlined_call_operand.vmem [shape: f32[4,1], index: 5, kind: input, shape index: {}]   ;;  %s7014_s6 = inlined_call_operand.vmem [shape: f32[27,4,4], index: 6, kind: input, shape index: {}]   ;;  %s7015_s7 = inlined_call_operand.vmem [shape: f32[4,1], index: 7, kind: input, shape index: {}]   ;;  %s7016_s8 = inlined_call_operand.vmem [shape: f32[16,4], index: 8, kind: input, shape index: {}]   ;;  %s7017_s9 = inlined_call_operand.vmem [shape: f32[16,1], index: 9, kind: input, shape index: {}]   ;;  %s7018_s10 = inlined_call_operand.vmem [shape: f32[16,32], index: 10, kind: input, shape index: {}]   ;;  %s7019_s11 = inlined_call_operand.vmem [shape: f32[16,1], index: 11, kind: input, shape index: {}]   ;;  %s7020_s12 = inlined_call_operand.vmem [shape: f32[4,16], index: 12, kind: input, shape index: {}]   ;;  %s7021_s13 = inlined_call_operand.vmem [shape: f32[4,1], index: 13, kind: input, shape index: {}]   ;;  %s7022_s14 = inlined_call_operand.vmem [shape: f32[2,4,512], index: 14, kind: output, shape index: {}]  }
   0x1 LB: > { %s5169_s30 = sadd.s32 4294967295, %s5563_s29   ;;  %p5173_p0 = scmp.ge.s32.totalorder %s5563_s29, 1  ;;  %s5563_s29 = sphi %s5647_s29, %s24_s29  }
   0x2   : > { %p432_p1 = scmp.lt.s32.totalorder %s5563_s29, 3 }
   0x4   : > { %p433_p2 = pnand %p5173_p0, %p432_p1 }
   0x6   : > { %436 = sbr.rel (%p433_p2) target bundleno = 2744 (0xab8), region = 76 }
   0xd   : > { %p488_p3 = scmp.lt.s32.totalorder %s5169_s30, 1  ;;  %v7027_v0 = vmov 0   ;;  %v641_v9 = vld [vmem:[%s7013_s5] sm:$0xf]  ;;  %vm647_vm0 = vcmask 523264   ;;  %vm7023_vm1 = vcmask 1043456  }
   0xe   : > { %5358 = vset.pattern.permute.xlu1 %v7027_v0  ;;  %5357 = vset.pattern.permute.xlu0 %v7027_v0  ;;  %s5567_s19 = smov 127   ;;  %vm795_vm10 = vcmask 7168   ;;  %vm812_vm11 = vcmask 1039360   ;;  %s5568_s20 = smov 8  }
   0xf   : > { %s7098_s30 = smov (!%p488_p3, %s5169_s30), 1  ;;  %683 = vmatprep.mubr.bf16.mxu0 %v7027_v0  ;;  %724 = vmatprep.mubr.bf16.mxu1 %v7027_v0  ;;  %s5571_s27 = smov 112  }
  0x10   : > { %s5330_s15 = sshll.u32 %s7098_s30, 6  ;;  %s5331_s21 = sshll.u32 %s7098_s30, 8 }
  0x11   : > { %s502_s18 = scalar_lea.vmem %s7011_s3, %s5330_s15  ;;  %s5674_s24 = scalar_lea.vmem %s7010_s2, %s5331_s21 }
  0x12   : > { %v545_v1 = vld [vmem:[%s502_s18 + $0x10] sm:$0xff]  ;;  %v543_v2 = vld [vmem:[%s502_s18] sm:$0xff]  ;;  %v546_v3 = vld [vmem:[%s502_s18 + $0x18] sm:$0xff]  ;;  %s5569_s21 = smov 120   ;;  %s5333_s25 = sshll.u32 %s7098_s30, 4 }
  0x13   : > { %563 = vperm.xlu1 %5358, %v545_v1   ;;  %553 = vperm.xlu0 %5357, %v543_v2   ;;  %v544_v4 = vld [vmem:[%s502_s18 + $0x8] sm:$0xff]  ;;  %v547_v6 = vld [vmem:[%s502_s18 + $0x20] sm:$0xff]  ;;  %v550_v7 = vld [vmem:[%s502_s18 + $0x38] sm:$0xff]  ;;  %s507_s28 = scalar_lea.vmem %s7022_s14, %s5333_s25 }
  0x14   : > { %v548_v5 = vld [vmem:[%s502_s18 + $0x28] sm:$0xff]  ;;  %v549_v8 = vld [vmem:[%s502_s18 + $0x30] sm:$0xff]  ;;  %v519_v16 = vld [vmem:[%s5674_s24 + $0x40] sm:$0xff]  ;;  %s5566_s18 = smov 1  }
  0x15   : > { %v520_v10 = vld [vmem:[%s5674_s24 + $0x48] sm:$0xff]  ;;  %v514_v17 = vld [vmem:[%s5674_s24 + $0x18] sm:$0xff]  ;;  %v511_v18 = vld [vmem:[%s5674_s24] sm:$0xff] }
  0x16   : > { %v524_v13 = vld [vmem:[%s5674_s24 + $0x68] sm:$0xff]  ;;  %v513_v19 = vld [vmem:[%s5674_s24 + $0x10] sm:$0xff]  ;;  %v518_v20 = vld [vmem:[%s5674_s24 + $0x38] sm:$0xff] }
  0x17   : > { %568 = vperm.xlu1 %5358, %v546_v3   ;;  %558 = vperm.xlu0 %5357, %v544_v4   ;;  %v512_v14 = vld [vmem:[%s5674_s24 + $0x8] sm:$0xff]  ;;  %v515_v21 = vld [vmem:[%s5674_s24 + $0x20] sm:$0xff]  ;;  %v517_v22 = vld [vmem:[%s5674_s24 + $0x30] sm:$0xff] }
  0x18   : > { %v516_v15 = vld [vmem:[%s5674_s24 + $0x28] sm:$0xff]  ;;  %v522_v23 = vld [vmem:[%s5674_s24 + $0x58] sm:$0xff]  ;;  %v523_v25 = vld [vmem:[%s5674_s24 + $0x60] sm:$0xff] }
  0x19   : > { %v526_v26 = vld [vmem:[%s5674_s24 + $0x78] sm:$0xff]  ;;  %v521_v34 = vld [vmem:[%s5674_s24 + $0x50] sm:$0xff]  ;;  %v532_v44 = vld [vmem:[%s5674_s24 + $0xa8] sm:$0xff] }
  0x1a   : > { %v525_v35 = vld [vmem:[%s5674_s24 + $0x70] sm:$0xff]  ;;  %v528_v45 = vld [vmem:[%s5674_s24 + $0x88] sm:$0xff]  ;;  %v534_v46 = vld [vmem:[%s5674_s24 + $0xb8] sm:$0xff] }
  0x1b   : > { %578 = vperm.xlu1 %5358, %v548_v5   ;;  %573 = vperm.xlu0 %5357, %v547_v6   ;;  %v530_v48 = vld [vmem:[%s5674_s24 + $0x98] sm:$0xff]  ;;  %v531_v56 = vld [vmem:[%s5674_s24 + $0xa0] sm:$0xff]  ;;  %v533_v57 = vld [vmem:[%s5674_s24 + $0xb0] sm:$0xff] }
  0x1c   : > { %v527_v59 = vld [vmem:[%s5674_s24 + $0x80] sm:$0xff]  ;;  %v529_v63 = vld [vmem:[%s5674_s24 + $0x90] sm:$0xff]  ;;  %v540_v3 = vld [vmem:[%s5674_s24 + $0xe8] sm:$0xff] }
  0x1d   : > { %v536_v4 = vld [vmem:[%s5674_s24 + $0xc8] sm:$0xff]  ;;  %v542_v5 = vld [vmem:[%s5674_s24 + $0xf8] sm:$0xff] }
  0x1f   : > { %588 = vperm.xlu1 %5358, %v550_v7   ;;  %583 = vperm.xlu0 %5357, %v549_v8   ;;  %v538_v7 = vld [vmem:[%s5674_s24 + $0xd8] sm:$0xff] }
  0x23   : > { %644 = vperm.xlu0 %5357, %v641_v9  }
  0x92   : > { %v564_v11 = vpop.permute.xlu1 %563  ;;  %v554_v12 = vpop.permute.xlu0 %553 }
  0x93   : > { %v600_v24 = vmul.f32 %v564_v11, %v520_v10  ;;  %v592_v29 = vmul.f32 %v554_v12, %v512_v14  ;;  %v594_v31 = vmul.f32 %v554_v12, %v514_v17  ;;  %v591_v32 = vmul.f32 %v554_v12, %v511_v18  ;;  %v535_v17 = vld [vmem:[%s5674_s24 + $0xc0] sm:$0xff] }
  0x94   : > { %v593_v33 = vmul.f32 %v554_v12, %v513_v19  ;;  %v599_v40 = vmul.f32 %v564_v11, %v519_v16  ;;  %v602_v41 = vmul.f32 %v564_v11, %v522_v23  ;;  %v601_v54 = vmul.f32 %v564_v11, %v521_v34 }
  0x96   : > { %v569_v27 = vpop.permute.xlu1 %568  ;;  %v559_v28 = vpop.permute.xlu0 %558 }
  0x97   : > { %v604_v30 = vmul.f32 %v569_v27, %v524_v13  ;;  %v596_v36 = vmul.f32 %v559_v28, %v516_v15  ;;  %v598_v37 = vmul.f32 %v559_v28, %v518_v20  ;;  %v595_v38 = vmul.f32 %v559_v28, %v515_v21  ;;  %v539_v15 = vld [vmem:[%s5674_s24 + $0xe0] sm:$0xff]  ;;  %v541_v20 = vld [vmem:[%s5674_s24 + $0xf0] sm:$0xff] }
  0x98   : > { %v597_v39 = vmul.f32 %v559_v28, %v517_v22  ;;  %v603_v42 = vmul.f32 %v569_v27, %v523_v25  ;;  %v606_v43 = vmul.f32 %v569_v27, %v526_v26  ;;  %v605_v55 = vmul.f32 %v569_v27, %v525_v35  ;;  %v537_v22 = vld [vmem:[%s5674_s24 + $0xd0] sm:$0xff]  ;;  %s5570_s24 = smov 64  }
  0x99   : > { %v626_v50 = vpack.c.bf16 %v596_v36, %v592_v29  ;;  %v628_v51 = vpack.c.bf16 %v598_v37, %v594_v31  ;;  %v625_v52 = vpack.c.bf16 %v595_v38, %v591_v32  ;;  %v630_v61 = vpack.c.bf16 %v604_v30, %v600_v24 }
  0x9a   : > { %v579_v47 = vpop.permute.xlu1 %578  ;;  %v574_v49 = vpop.permute.xlu0 %573  ;;  %v627_v53 = vpack.c.bf16 %v597_v39, %v593_v33  ;;  %v632_v2 = vpack.c.bf16 %v606_v43, %v602_v41  ;;  %v629_v9 = vpack.c.bf16 %v603_v42, %v599_v40  ;;  %v631_v13 = vpack.c.bf16 %v605_v55, %v601_v54  ;;  %v623_v33 = vld [vmem:[%s7012_s4] sm:$0xf] }
  0x9b   : > { %v612_v58 = vmul.f32 %v579_v47, %v532_v44  ;;  %v608_v60 = vmul.f32 %v574_v49, %v528_v45  ;;  %651 = vmatprep.subr.bf16.mxu0 %v626_v50  ;;  %v614_v62 = vmul.f32 %v579_v47, %v534_v46  ;;  %v610_v1 = vmul.f32 %v574_v49, %v530_v48 }
  0x9c   : > { %692 = vmatprep.subr.bf16.mxu1 %v628_v51  ;;  %652 = vmatpush1.bf16.msra.mxu0 %v625_v52  ;;  %v611_v10 = vmul.f32 %v579_v47, %v531_v56  ;;  %v613_v11 = vmul.f32 %v579_v47, %v533_v57  ;;  %v607_v12 = vmul.f32 %v574_v49, %v527_v59 }
  0x9d   : > { %693 = vmatpush1.bf16.msra.mxu1 %v627_v53  ;;  %653 = vmatprep.subr.bf16.mxu0 %v630_v61  ;;  %v609_v14 = vmul.f32 %v574_v49, %v529_v63  ;;  %v634_v19 = vpack.c.bf16 %v612_v58, %v608_v60  ;;  %v636_v24 = vpack.c.bf16 %v614_v62, %v610_v1 }
  0x9e   : > { %v589_v6 = vpop.permute.xlu1 %588  ;;  %v584_v8 = vpop.permute.xlu0 %583  ;;  %694 = vmatprep.subr.bf16.mxu1 %v632_v2  ;;  %v633_v27 = vpack.c.bf16 %v611_v10, %v607_v12  ;;  %v624_v36 = vpack.c.bf16 %v623_v33, %v623_v33  ;;  %v826_v12 = vlaneseq }
  0x9f   : > { %v620_v16 = vmul.f32 %v589_v6, %v540_v3  ;;  %v616_v18 = vmul.f32 %v584_v8, %v536_v4  ;;  %v622_v21 = vmul.f32 %v589_v6, %v542_v5  ;;  %v618_v23 = vmul.f32 %v584_v8, %v538_v7 }
  0xa0   : > { %654 = vmatpush1.bf16.msra.mxu0 %v629_v9  ;;  %v619_v25 = vmul.f32 %v589_v6, %v539_v15  ;;  %v615_v26 = vmul.f32 %v584_v8, %v535_v17  ;;  %v621_v28 = vmul.f32 %v589_v6, %v541_v20  ;;  %v617_v29 = vmul.f32 %v584_v8, %v537_v22  ;;  %v509_v22 = vld [vmem:[%s7008_s0] sm:$0x77] }
  0xa1   : > { %695 = vmatpush1.bf16.msra.mxu1 %v631_v13  ;;  %655 = vmatprep.subr.bf16.mxu0 %v634_v19  ;;  %v635_v30 = vpack.c.bf16 %v613_v11, %v609_v14  ;;  %v638_v31 = vpack.c.bf16 %v620_v16, %v616_v18  ;;  %v640_v32 = vpack.c.bf16 %v622_v21, %v618_v23  ;;  %v510_v23 = vld [vmem:[%s7008_s0 + $0x8] sm:$0x77]  ;;  %vm866_vm6 = vcmp.eq.s32.totalorder %v509_v22, 7 }
  0xa2   : > { %696 = vmatprep.subr.bf16.mxu1 %v636_v24  ;;  %v637_v34 = vpack.c.bf16 %v619_v25, %v615_v26  ;;  %v639_v35 = vpack.c.bf16 %v621_v28, %v617_v29  ;;  %v645_v37 = vpop.permute.xlu0 %644  ;;  %v5729_v24 = vshrl.u32 %v826_v12, 7  ;;  %vm867_vm7 = vcmp.eq.s32.totalorder %v510_v23, 7 }
  0xa3   : > { %vm822_vm8 = vcmp.eq.s32.totalorder %v509_v22, 0  ;;  %vm823_vm9 = vcmp.eq.s32.totalorder %v510_v23, 0 }
  0xa4   : > { %656 = vmatpush1.bf16.msra.mxu0 %v633_v27 }
  0xa5   : > { %697 = vmatpush1.bf16.msra.mxu1 %v635_v30  ;;  %657 = vmatprep.subr.bf16.mxu0 %v638_v31 }
  0xa6   : > { %698 = vmatprep.subr.bf16.mxu1 %v640_v32 }
  0xa8   : > { %658 = vmatpush1.bf16.msra.mxu0 %v637_v34 }
  0xa9   : > { %699 = vmatpush1.bf16.msra.mxu1 %v639_v35  ;;  %v832_v35 = vsub.s32 6, %v5729_v24 }
  0xab   : > { %5182 = vmatmul.mubr.msk.bf16.vlgmr.msra.gmra.mrb[0].mxu0 %vm647_vm0, %v624_v36 }
  0xac   : > { %5183 = vmatmul.mubr.msk.bf16.vlgmr.msra.gmra.mrb[0].mxu1 %vm647_vm0, %v624_v36  ;;  %1193 = vmatprep.mubr.bf16.mxu0 %v7027_v0 }
  0xad   : > { %1234 = vmatprep.mubr.bf16.mxu1 %v7027_v0 }
 0x17e   : > { %v685_v38 = vpop.f32.mrb[0].mxu0 }
 0x17f   : > { %v686_v39 = vadd.f32 %v685_v38, %v645_v37  ;;  %v726_v40 = vpop.f32.mrb[0].mxu1  ;;  %v687_v41 = vpop.f32.mrb[1].mxu0  ;;  %v5759_v38 = vsel %vm866_vm6, 1, %v7027_v0  ;;  %vm7036_vm6 = vcmask 64512  }
 0x180   : > { %v727_v42 = vadd.f32 %v726_v40, %v645_v37  ;;  %v688_v43 = vadd.f32 %v687_v41, %v645_v37  ;;  %v728_v44 = vpop.f32.mrb[1].mxu1  ;;  %v689_v45 = vpop.f32.mrb[2].mxu0  ;;  %v828_v40 = vsub.s32 2, %v5729_v24  ;;  %v877_v41 = vrot.slane %v5759_v38, %v832_v35 }
 0x181   : > { %v734_v46 = vsel %vm7023_vm1, %v686_v39, 0.0  ;;  %v744_v47 = vmul.f32 %v686_v39, %v686_v39  ;;  %v729_v48 = vadd.f32 %v728_v44, %v645_v37  ;;  %v730_v49 = vpop.f32.mrb[2].mxu1  ;;  %v690_v50 = vpop.f32.mrb[3].mxu0  ;;  %v5772_v45 = vsel %vm822_vm8, 1, %v7027_v0 }
 0x182   : > { %v746_v51 = vmul.f32 %v727_v42, %v727_v42  ;;  %v735_v52 = vsel %vm7023_vm1, %v688_v43, 0.0  ;;  %v745_v53 = vmul.f32 %v688_v43, %v688_v43  ;;  %v731_v54 = vpop.f32.mrb[3].mxu1  ;;  %v737_v57 = vsel %vm7023_vm1, %v727_v42, 0.0 }
 0x183   : > { %v736_v55 = vadd.f32 %v735_v52, %v734_v46  ;;  %v748_v56 = vsel %vm7023_vm1, %v744_v47, 0.0  ;;  %v747_v58 = vmul.f32 %v729_v48, %v729_v48  ;;  %v739_v62 = vsel %vm7023_vm1, %v729_v48, 0.0 }
 0x184   : > { %v749_v59 = vsel %vm7023_vm1, %v745_v53, 0.0  ;;  %v751_v63 = vsel %vm7023_vm1, %v746_v51, 0.0  ;;  %v5775_v46 = vsel %vm823_vm9, 1, %v7027_v0  ;;  %v833_v47 = vrot.slane %v5772_v45, %v832_v35 }
 0x185   : > { %v738_v60 = vadd.f32 %v737_v57, %v736_v55  ;;  %v750_v61 = vadd.f32 %v749_v59, %v748_v56  ;;  %v753_v3 = vsel %vm7023_vm1, %v747_v58, 0.0  ;;  %v829_v49 = vrot.slane %v5772_v45, %v828_v40 }
 0x186   : > { %v841_v50 = vrot.slane %v5775_v46, %v832_v35  ;;  %v849_v52 = vrot.slane %v833_v47, %v828_v40 }
 0x187   : > { %v740_v1 = vadd.f32 %v739_v62, %v738_v60  ;;  %v752_v2 = vadd.f32 %v751_v63, %v750_v61  ;;  %v845_v54 = vrot.slane %v829_v49, %v828_v40  ;;  %v873_v60 = vrot.slane %v5759_v38, %v828_v40 }
 0x188   : > { %v857_v56 = vrot.slane %v841_v50, %v828_v40  ;;  %vm859_vm12 = vcmp.eq.s32.totalorder %v849_v52, 1 }
 0x189   : > { %741 = vadd.xlane.f32.xlu1 %v740_v1  ;;  %v754_v4 = vadd.f32 %v753_v3, %v752_v2  ;;  %vm858_vm14 = vcmp.eq.s32.totalorder %v845_v54, 1 }
 0x18a   : > { %vm861_vm15 = vcmp.eq.s32.totalorder %v857_v56, 1 }
 0x18b   : > { %755 = vadd.xlane.f32.xlu0 %v754_v4 }
 0x216   : > { %v742_v5 = vpop.xlane.xlu1 %741 }
 0x217   : > { %v743_v6 = vmul.f32 0.001953125, %v742_v5 }
 0x218   : > { %v756_v7 = vpop.xlane.xlu0 %755 }
 0x219   : > { %v757_v8 = vmul.f32 0.001953125, %v756_v7  ;;  %v758_v9 = vmul.f32 %v743_v6, %v743_v6  ;;  %v760_v13 = vsub.f32 %v686_v39, %v743_v6  ;;  %v761_v14 = vsub.f32 %v688_v43, %v743_v6 }
 0x21a   : > { %v762_v15 = vsub.f32 %v727_v42, %v743_v6  ;;  %v763_v16 = vsub.f32 %v729_v48, %v743_v6  ;;  %v5762_v39 = vsel %vm867_vm7, 1, %v7027_v0  ;;  %v893_v43 = vrot.slane %v877_v41, %v828_v40 }
 0x21b   : > { %v759_v10 = vsub.f32 %v757_v8, %v758_v9  ;;  %v885_v42 = vrot.slane %v5762_v39, %v832_v35  ;;  %v837_v48 = vrot.slane %v5775_v46, %v828_v40  ;;  %v881_v57 = vrot.slane %v5762_v39, %v828_v40 }
 0x21c   : > { %v889_v8 = vrot.slane %v873_v60, %v828_v40  ;;  %vm7035_vm7 = vcmask 982016  }
 0x21d   : > { %v764_v11 = vadd.f32 1e-05, %v759_v10  ;;  %v5769_v44 = vrot.slane %v885_v42, %v828_v40  ;;  %v853_v53 = vrot.slane %v837_v48, %v828_v40  ;;  %v897_v4 = vrot.slane %v881_v57, %v828_v40 }
 0x21f   : > { %5529 = vrsqrt.f32 %v764_v11  ;;  %vm860_vm13 = vcmp.eq.s32.totalorder %v853_v53, 1 }
 0x229   : > { %v5530_v17 = vpop.eup %5529 }
 0x22a   : > { %v767_v18 = vmul.f32 %v5530_v17, %v761_v14  ;;  %v768_v19 = vmul.f32 %v5530_v17, %v762_v15  ;;  %v766_v20 = vmul.f32 %v5530_v17, %v760_v13  ;;  %v769_v21 = vmul.f32 %v5530_v17, %v763_v16 }
 0x22c   : > { %vm771_vm2 = vcmp.ge.f32.partialorder %v767_v18, 0.0  ;;  %vm772_vm3 = vcmp.ge.f32.partialorder %v768_v19, 0.0  ;;  %v775_v25 = vmul.f32 0.2, %v767_v18  ;;  %v776_v26 = vmul.f32 0.2, %v768_v19 }
 0x22d   : > { %vm770_vm4 = vcmp.ge.f32.partialorder %v766_v20, 0.0  ;;  %vm773_vm5 = vcmp.ge.f32.partialorder %v769_v21, 0.0  ;;  %v774_v27 = vmul.f32 0.2, %v766_v20  ;;  %v777_v28 = vmul.f32 0.2, %v769_v21 }
 0x22e   : > { %v5731_v29 = vsel %vm771_vm2, %v767_v18, %v775_v25  ;;  %v5733_v30 = vsel %vm772_vm3, %v768_v19, %v776_v26  ;;  %vm903_vm2 = vcmp.eq.s32.totalorder %v893_v43, 1  ;;  %vm904_vm3 = vcmp.eq.s32.totalorder %v897_v4, 1 }
 0x22f   : > { %7042 = vst [vmem:[#allocation2_spill] sm:$0xff] %v5731_v29  ;;  %7043 = vst [vmem:[#allocation3_spill] sm:$0xff] %v5733_v30  ;;  %v5737_v31 = vpack.i.bf16 %v5733_v30, %v5731_v29  ;;  %v5739_v32 = vsel %vm770_vm4, %v766_v20, %v774_v27  ;;  %v5741_v33 = vsel %vm773_vm5, %v769_v21, %v777_v28  ;;  %vm902_vm4 = vcmp.eq.s32.totalorder %v889_v8, 1 }
 0x230   : > { %7044 = vst [vmem:[#allocation4_spill] sm:$0xff] %v5739_v32  ;;  %7045 = vst [vmem:[#allocation5_spill] sm:$0xff] %v5741_v33  ;;  %v5745_v34 = vpack.i.bf16 %v5739_v32, %v5741_v33  ;;  %v5752_v36 = vpack.i.bf16 %v5741_v33, %v5733_v30  ;;  %v5756_v37 = vpack.i.bf16 %v5731_v29, %v5739_v32  ;;  %vm905_vm5 = vcmp.eq.s32.totalorder %v5769_v44, 1 }
 0x231   : > { %5365 = vrot.lane.b32.xlu1 %v5737_v31, %s5566_s18  ;;  %v952_v43 = vsub.s32 1, %v5729_v24  ;;  %v956_v44 = vsub.s32 5, %v5729_v24 }
 0x232   : > { %5360 = vrot.lane.b32.xlu0 %v5745_v34, %s5566_s18 }
 0x233   : > { %v957_v47 = vrot.slane %v5772_v45, %v956_v44  ;;  %v961_v48 = vrot.slane %v5775_v46, %v952_v43  ;;  %v953_v49 = vrot.slane %v5772_v45, %v952_v43  ;;  %v965_v50 = vrot.slane %v5775_v46, %v956_v44 }
 0x235   : > { %5370 = vrot.lane.b32.xlu1 %v5756_v37, %s5567_s19  ;;  %v5854_v52 = vrot.slane %v961_v48, %v952_v43  ;;  %v5858_v56 = vrot.slane %v965_v50, %v952_v43  ;;  %v1005_v48 = vrot.slane %v5762_v39, %v956_v44 }
 0x236   : > { %5375 = vrot.lane.b32.xlu0 %v5752_v36, %s5567_s19 }
 0x237   : > { %vm984_vm9 = vcmp.eq.s32.totalorder %v5854_v52, 1 }
 0x2a3   : > { %v5366_v51 = vpop.permute.xlu1 %5365 }
 0x2a4   : > { %v5361_v55 = vpop.permute.xlu0 %5360  ;;  %v5368_v58 = vunpack.i.h.bf16 %v5366_v51  ;;  %v5367_v59 = vunpack.i.l.bf16 %v5366_v51  ;;  %v5852_v51 = vrot.slane %v957_v47, %v952_v43  ;;  %v993_v47 = vrot.slane %v5759_v38, %v952_v43 }
 0x2a5   : > { %v5363_v61 = vunpack.i.h.bf16 %v5361_v55  ;;  %v5362_v62 = vunpack.i.l.bf16 %v5361_v55  ;;  %v5856_v55 = vrot.slane %v953_v49, %v952_v43 }
 0x2a6   : > { %v797_v5 = vsel %vm795_vm10, %v5367_v59, %v5368_v58  ;;  %vm983_vm8 = vcmp.eq.s32.totalorder %v5852_v51, 1 }
 0x2a7   : > { %v5371_v63 = vpop.permute.xlu1 %5370  ;;  %v796_v9 = vsel %vm795_vm10, %v5363_v61, %v5367_v59  ;;  %v798_v10 = vsel %vm795_vm10, %v5368_v58, %v5362_v62  ;;  %v803_v11 = vsel %vm795_vm10, %v5362_v62, %v5363_v61  ;;  %vm7038_vm10 = vcmp.eq.s32.totalorder %v5856_v55, 1 }
 0x2a8   : > { %v5373_v1 = vunpack.i.h.bf16 %v5371_v63  ;;  %v5372_v2 = vunpack.i.l.bf16 %v5371_v63  ;;  %v5376_v3 = vpop.permute.xlu0 %5375  ;;  %v997_v63 = vrot.slane %v5759_v38, %v956_v44  ;;  %v5895_v44 = vrot.slane %v993_v47, %v952_v43 }
 0x2a9   : > { %v5378_v6 = vunpack.i.h.bf16 %v5376_v3  ;;  %v5377_v7 = vunpack.i.l.bf16 %v5376_v3 }
 0x2aa   : > { %v813_v12 = vsel %vm812_vm11, %v5372_v2, %v5373_v1 }
 0x2ab   : > { %v821_v13 = vsel %vm812_vm11, %v5378_v6, %v5372_v2  ;;  %v814_v14 = vsel %vm812_vm11, %v5373_v1, %v5377_v7  ;;  %v815_v15 = vsel %vm812_vm11, %v5377_v7, %v5378_v6  ;;  %v5792_v16 = vsel %vm858_vm14, %v813_v12, %v803_v11 }
 0x2ac   : > { %v5795_v17 = vsel %vm859_vm12, %v814_v14, %v796_v9  ;;  %v5798_v18 = vsel %vm860_vm13, %v815_v15, %v797_v5  ;;  %v5801_v19 = vsel %vm861_vm15, %v821_v13, %v798_v10  ;;  %v5816_v22 = vsel %vm903_vm2, %v796_v9, %v814_v14 }
 0x2ad   : > { %v5805_v20 = vpack.i.bf16 %v5798_v18, %v5795_v17  ;;  %v5809_v21 = vpack.i.bf16 %v5792_v16, %v5801_v19  ;;  %v5818_v23 = vsel %vm904_vm3, %v797_v5, %v815_v15  ;;  %v5820_v25 = vsel %vm902_vm4, %v803_v11, %v813_v12 }
 0x2ae   : > { %v5394_v26 = vpack.i.bf16 %v5801_v19, %v5798_v18  ;;  %v5389_v27 = vpack.i.bf16 %v5795_v17, %v5792_v16  ;;  %v5828_v28 = vpack.i.bf16 %v5818_v23, %v5816_v22  ;;  %v5830_v35 = vsel %vm905_vm5, %v798_v10, %v821_v13 }
 0x2af   : > { %5385 = vrot.lane.b32.xlu0 %v5805_v20, %s5568_s20  ;;  %5380 = vrot.lane.b32.xlu1 %v5809_v21, %s5568_s20  ;;  %v5834_v40 = vpack.i.bf16 %v5820_v25, %v5830_v35  ;;  %vm7037_vm11 = vcmp.eq.s32.totalorder %v5858_v56, 1  ;;  %v1001_v1 = vrot.slane %v5762_v39, %v952_v43  ;;  %vm1148_vm12 = vcmask 1041408  }
 0x2b0   : > { %vm1144_vm13 = vcmask 31744   ;;  %vm7025_vm2 = vcmp.eq.s32.totalorder %v5895_v44, 1 }
 0x2b3   : > { %5395 = vrot.lane.b32.xlu0 %v5394_v26, %s5569_s21  ;;  %5390 = vrot.lane.b32.xlu1 %v5389_v27, %s5569_s21 }
 0x2b7   : > { %5405 = vrot.lane.b32.xlu0 %v5737_v31, %s5568_s20  ;;  %5400 = vrot.lane.b32.xlu1 %v5745_v34, %s5568_s20 }
 0x321   : > { %v5386_v53 = vpop.permute.xlu0 %5385  ;;  %v5381_v54 = vpop.permute.xlu1 %5380 }
 0x322   : > { %v5388_v57 = vunpack.i.h.bf16 %v5386_v53  ;;  %v5387_v58 = vunpack.i.l.bf16 %v5386_v53  ;;  %v5383_v59 = vunpack.i.h.bf16 %v5381_v54  ;;  %v5382_v60 = vunpack.i.l.bf16 %v5381_v54 }
 0x324   : > { %v925_v6 = vsel %vm7036_vm6, %v5387_v58, %v5388_v57  ;;  %v924_v7 = vsel %vm7036_vm6, %v5383_v59, %v5387_v58  ;;  %v926_v8 = vsel %vm7036_vm6, %v5388_v57, %v5382_v60  ;;  %v931_v9 = vsel %vm7036_vm6, %v5382_v60, %v5383_v59  ;;  %v5184_v58 = vld [vmem:[%s7014_s6 + $0x24] sm:$0xf] }
 0x325   : > { %v5396_v61 = vpop.permute.xlu0 %5395  ;;  %v5391_v62 = vpop.permute.xlu1 %5390  ;;  %v5884_v57 = vrot.slane %v997_v63, %v952_v43 }
 0x326   : > { %v5398_v2 = vunpack.i.h.bf16 %v5396_v61  ;;  %v5397_v3 = vunpack.i.l.bf16 %v5396_v61  ;;  %v5393_v4 = vunpack.i.h.bf16 %v5391_v62  ;;  %v5392_v5 = vunpack.i.l.bf16 %v5391_v62 }
 0x327   : > { %v5891_v61 = vrot.slane %v1001_v1, %v952_v43  ;;  %v5897_v62 = vrot.slane %v1005_v48, %v952_v43  ;;  %vm7039_vm14 = vcmp.eq.s32.totalorder %v5884_v57, 1 }
 0x328   : > { %v943_v10 = vsel %vm7035_vm7, %v5397_v3, %v5398_v2  ;;  %v942_v11 = vsel %vm7035_vm7, %v5393_v4, %v5397_v3  ;;  %v941_v12 = vsel %vm7035_vm7, %v5392_v5, %v5393_v4  ;;  %v949_v13 = vsel %vm7035_vm7, %v5398_v2, %v5392_v5 }
 0x329   : > { %v987_v14 = vsel %vm983_vm8, %v942_v11, %v924_v7  ;;  %v988_v15 = vsel %vm984_vm9, %v943_v10, %v925_v6  ;;  %v986_v26 = vsel %vm7038_vm10, %v941_v12, %v931_v9  ;;  %v989_v27 = vsel %vm7037_vm11, %v949_v13, %v926_v8 }
 0x32a   : > { %v5419_v49 = vpack.i.bf16 %v988_v15, %v987_v14  ;;  %v1141_v50 = vpack.c.bf16 %v987_v14, %v987_v14  ;;  %v5409_v53 = vpack.i.bf16 %v986_v26, %v989_v27  ;;  %v1143_v54 = vpack.c.bf16 %v989_v27, %v989_v27 }
 0x32b   : > { %v1140_v59 = vpack.c.bf16 %v986_v26, %v986_v26  ;;  %v1142_v60 = vpack.c.bf16 %v988_v15, %v988_v15  ;;  %v1139_v3 = vpack.c.bf16 %v5184_v58, %v5184_v58  ;;  %vm7026_vm15 = vcmp.eq.s32.totalorder %v5891_v61, 1 }
 0x32c   : > { %5420 = vrot.lane.b32.xlu0 %v5419_v49, %s5570_s24  ;;  %5185 = vmatprep.subr.msk.bf16.mxu0 %vm1148_vm12, %v1141_v50  ;;  %vm7024_vm3 = vcmp.eq.s32.totalorder %v5897_v62, 1  ;;  %v5913_v43 = vsel %vm7039_vm14, %v924_v7, %v942_v11 }
 0x32d   : > { %5410 = vrot.lane.b32.xlu1 %v5409_v53, %s5570_s24  ;;  %5187 = vmatprep.subr.msk.bf16.mxu1 %vm1148_vm12, %v1143_v54  ;;  %v1150_v63 = vsel %vm1148_vm12, %v1140_v59, 0  ;;  %v1156_v2 = vsel %vm1148_vm12, %v1142_v60, 0  ;;  %v5929_v1 = vsel %vm7024_vm3, %v926_v8, %v949_v13 }
 0x32e   : > { %1162 = vmatpush1.bf16.msra.mxu0 %v1150_v63  ;;  %1203 = vmatpush1.bf16.msra.mxu1 %v1156_v2 }
 0x330   : > { %5425 = vrot.lane.b32.xlu0 %v5752_v36, %s5569_s21  ;;  %v5917_v36 = vsel %vm7026_vm15, %v925_v6, %v943_v10  ;;  %v1053_v6 = vsub.s32 0, %v5729_v24  ;;  %v5944_v10 = vpop.permute.xlu1 %5400 }
 0x331   : > { %5415 = vrot.lane.b32.xlu1 %v5756_v37, %s5569_s21  ;;  %5186 = vmatmul.mubr.msk.bf16.vlgmr.msra.gmra.mrb[4].mxu0 %vm1144_vm13, %v1139_v3  ;;  %v5925_v37 = vsel %vm7025_vm2, %v931_v9, %v941_v12  ;;  %v5444_v4 = vpack.i.bf16 %v5917_v36, %v5913_v43  ;;  %v5406_v9 = vpop.permute.xlu0 %5405  ;;  %v7030_v27 = vunpack.i.h.bf16 %v5944_v10  ;;  %v7029_v47 = vunpack.i.l.bf16 %v5944_v10 }
 0x332   : > { %5188 = vmatmul.mubr.msk.bf16.vlgmr.msra.gmra.mrb[4].mxu1 %vm1144_vm13, %v1139_v3  ;;  %1290 = vmatprep.mubr.bf16.mxu0 %v7027_v0  ;;  %v5439_v5 = vpack.i.bf16 %v5925_v37, %v5929_v1  ;;  %v1062_v13 = vrot.slane %v5775_v46, %v1053_v6  ;;  %v5408_v14 = vunpack.i.h.bf16 %v5406_v9  ;;  %v5407_v15 = vunpack.i.l.bf16 %v5406_v9 }
 0x333   : > { %1331 = vmatprep.mubr.bf16.mxu1 %v7027_v0  ;;  %v1094_v48 = vrot.slane %v5759_v38, %v1053_v6  ;;  %v1102_v49 = vrot.slane %v5762_v39, %v1053_v6  ;;  %v7046_v29 = vunpack.i.h.bf16 %v5944_v10 }
 0x334   : > { %5435 = vrot.lane.b32.xlu0 %v5805_v20, %s5570_s24  ;;  %v1057_v20 = vsub.s32 4, %v5729_v24  ;;  %v5960_v50 = vrot.slane %v1062_v13, %v1053_v6  ;;  %v5966_v53 = vsel %vm7036_vm6, %v5407_v15, %v5408_v14 }
 0x335   : > { %5430 = vrot.lane.b32.xlu1 %v5809_v21, %s5570_s24  ;;  %v1054_v21 = vrot.slane %v5772_v45, %v1053_v6 }
 0x336   : > { %v1058_v7 = vrot.slane %v5772_v45, %v1057_v20  ;;  %v1066_v8 = vrot.slane %v5775_v46, %v1057_v20  ;;  %v1098_v11 = vrot.slane %v5759_v38, %v1057_v20  ;;  %v1106_v45 = vrot.slane %v5762_v39, %v1057_v20  ;;  %v1131_v46 = vld [vmem:[%s7014_s6] sm:$0xf] }
 0x337   : > { %v5952_v24 = vrot.slane %v1054_v21, %v1053_v6  ;;  %v5975_v38 = vsel %vm7036_vm6, %v7030_v27, %v5407_v15  ;;  %v5980_v39 = vsel %vm7036_vm6, %v5408_v14, %v7029_v47  ;;  %vm7041_vm3 = vcmp.eq.s32.totalorder %v5960_v50, 1 }
 0x338   : > { %5445 = vrot.lane.b32.xlu0 %v5444_v4, %s5570_s24  ;;  %v5947_v12 = vrot.slane %v1058_v7, %v1053_v6  ;;  %v5950_v26 = vrot.slane %v1066_v8, %v1053_v6  ;;  %v5970_v58 = vrot.slane %v1098_v11, %v1053_v6  ;;  %v5982_v4 = vrot.slane %v1106_v45, %v1053_v6 }
 0x339   : > { %5440 = vrot.lane.b32.xlu1 %v5439_v5, %s5570_s24  ;;  %vm1083_vm1 = vcmp.eq.s32.totalorder %v5952_v24, 1  ;;  %v1132_v5 = vpack.c.bf16 %v1131_v46, %v1131_v46  ;;  %v5988_v7 = vrot.slane %v1094_v48, %v1053_v6  ;;  %v5990_v8 = vrot.slane %v1102_v49, %v1053_v6 }
 0x33a   : > { %vm1084_vm4 = vcmp.eq.s32.totalorder %v5947_v12, 1  ;;  %vm1086_vm5 = vcmp.eq.s32.totalorder %v5950_v26, 1  ;;  %vm7040_vm2 = vcmp.eq.s32.totalorder %v5970_v58, 1  ;;  %vm1126_vm15 = vcmp.eq.s32.totalorder %v5982_v4, 1  ;;  %v5298_v12 = vld [vmem:[%s7014_s6 + $0x5c] sm:$0xf] }
 0x39e   : > { %v5421_v54 = vpop.permute.xlu0 %5420 }
 0x39f   : > { %v5423_v59 = vunpack.i.h.bf16 %v5421_v54  ;;  %v5422_v60 = vunpack.i.l.bf16 %v5421_v54  ;;  %v5411_v63 = vpop.permute.xlu1 %5410 }
 0x3a0   : > { %v5413_v2 = vunpack.i.h.bf16 %v5411_v63  ;;  %v5412_v3 = vunpack.i.l.bf16 %v5411_v63 }
 0x3a1   : > { %v5985_v20 = vsel %vm647_vm0, %v5422_v60, %v5423_v59 }
 0x3a2   : > { %v1043_v21 = vsel %vm647_vm0, %v5413_v2, %v5422_v60  ;;  %v1045_v9 = vsel %vm647_vm0, %v5423_v59, %v5412_v3  ;;  %v1050_v11 = vsel %vm647_vm0, %v5412_v3, %v5413_v2  ;;  %v5426_v13 = vpop.permute.xlu0 %5425 }
 0x3a3   : > { %v5428_v14 = vunpack.i.h.bf16 %v5426_v13  ;;  %v5427_v15 = vunpack.i.l.bf16 %v5426_v13  ;;  %v5416_v45 = vpop.permute.xlu1 %5415  ;;  %v1088_v46 = vsel %vm1084_vm4, %v5985_v20, %v1043_v21  ;;  %v1090_v6 = vsel %vm1086_vm5, %v1050_v11, %v1045_v9 }
 0x3a4   : > { %v5418_v48 = vunpack.i.h.bf16 %v5416_v45  ;;  %v5417_v49 = vunpack.i.l.bf16 %v5416_v45  ;;  %v1134_v54 = vpack.c.bf16 %v1088_v46, %v1088_v46  ;;  %v1136_v60 = vpack.c.bf16 %v1090_v6, %v1090_v6 }
 0x3a5   : > { %v6002_v59 = vsel %vm7035_vm7, %v5427_v15, %v5428_v14  ;;  %v1087_v63 = vsel %vm1083_vm1, %v1043_v21, %v1050_v11  ;;  %v1089_v2 = vsel %vm7041_vm3, %v1045_v9, %v5985_v20  ;;  %v1128_v46 = vsel %vm7040_vm2, %v1043_v21, %v5985_v20 }
 0x3a6   : > { %v6011_v3 = vsel %vm7035_vm7, %v5418_v48, %v5427_v15  ;;  %v6014_v13 = vsel %vm7035_vm7, %v5417_v49, %v5418_v48  ;;  %5189 = vmatprep.subr.msk.bf16.mxu0 %vm1148_vm12, %v1134_v54  ;;  %5191 = vmatprep.subr.msk.bf16.mxu1 %vm1148_vm12, %v1136_v60  ;;  %v5436_v45 = vpop.permute.xlu0 %5435  ;;  %v1133_v0 = vpack.c.bf16 %v1087_v63, %v1087_v63 }
 0x3a7   : > { %v5438_v6 = vunpack.i.h.bf16 %v5436_v45  ;;  %v5437_v42 = vunpack.i.l.bf16 %v5436_v45  ;;  %v5431_v41 = vpop.permute.xlu1 %5430  ;;  %v1135_v47 = vpack.c.bf16 %v1089_v2, %v1089_v2  ;;  %v6022_v15 = vsel %vm7035_vm7, %v5428_v14, %v5417_v49 }
 0x3a8   : > { %v5433_v27 = vunpack.i.h.bf16 %v5431_v41  ;;  %v5432_v48 = vunpack.i.l.bf16 %v5431_v41  ;;  %v1130_v54 = vsel %vm1126_vm15, %v1045_v9, %v1050_v11  ;;  %v1247_v60 = vsel %vm1148_vm12, %v1133_v0, 0 }
 0x3a9   : > { %v1253_v30 = vsel %vm1148_vm12, %v1135_v47, 0  ;;  %v1344_v32 = vpack.c.bf16 %v1128_v46, %v1128_v46  ;;  %v1346_v33 = vpack.c.bf16 %v1130_v54, %v1130_v54  ;;  %v7047_v45 = vunpack.i.l.bf16 %v5944_v10  ;;  %1259 = vmatpush1.bf16.msra.mxu0 %v1247_v60 }
 0x3aa   : > { %v6036_v14 = vsel %vm647_vm0, %v5437_v42, %v5438_v6  ;;  %v6039_v41 = vsel %vm647_vm0, %v5433_v27, %v5437_v42  ;;  %1300 = vmatpush1.bf16.msra.mxu1 %v1253_v30  ;;  %vm1123_vm7 = vcmp.eq.s32.totalorder %v5988_v7, 1  ;;  %v6048_v0 = vsel %vm983_vm8, %v6011_v3, %v5975_v38  ;;  %v5193_v42 = vld [vmem:[%s7014_s6 + $0x48] sm:$0xf] }
 0x3ab   : > { %v6033_v63 = vsel %vm7036_vm6, %v7047_v45, %v7046_v29  ;;  %5194 = vmatprep.subr.msk.bf16.mxu0 %vm1148_vm12, %v1344_v32  ;;  %5196 = vmatprep.subr.msk.bf16.mxu1 %vm1148_vm12, %v1346_v33  ;;  %v6054_v29 = vsel %vm984_vm9, %v6002_v59, %v5966_v53  ;;  %vm1125_vm6 = vcmp.eq.s32.totalorder %v5990_v8, 1  ;;  %v6069_v33 = vsel %vm7037_vm11, %v6022_v15, %v5980_v39 }
 0x3ac   : > { %v6060_v30 = vsel %vm7038_vm10, %v6014_v13, %v6033_v63  ;;  %v5454_v32 = vpack.i.bf16 %v6054_v29, %v6048_v0  ;;  %v6075_v10 = vsel %vm647_vm0, %v5438_v6, %v5432_v48  ;;  %v6078_v47 = vsel %vm647_vm0, %v5432_v48, %v5433_v27  ;;  %5190 = vmatmul.mubr.msk.bf16.vlgmr.msra.gmra.mrb[8].mxu0 %vm1144_vm13, %v1132_v5 }
 0x3ad   : > { %v5449_v49 = vpack.i.bf16 %v6060_v30, %v6069_v33  ;;  %5192 = vmatmul.mubr.msk.bf16.vlgmr.msra.gmra.mrb[8].mxu1 %vm1144_vm13, %v1132_v5  ;;  %v1127_v2 = vsel %vm1123_vm7, %v1050_v11, %v1043_v21  ;;  %v1129_v46 = vsel %vm1125_vm6, %v5985_v20, %v1045_v9  ;;  %v1466_v27 = vsel %vm1084_vm4, %v6036_v14, %v6039_v41 }
 0x3ae   : > { %5455 = vrot.lane.b32.xlu0 %v5454_v32, %s5570_s24  ;;  %v1343_v6 = vpack.c.bf16 %v1127_v2, %v1127_v2  ;;  %v1342_v48 = vpack.c.bf16 %v5193_v42, %v5193_v42  ;;  %v1345_v54 = vpack.c.bf16 %v1129_v46, %v1129_v46  ;;  %v1477_v5 = vpack.c.bf16 %v1466_v27, %v1466_v27 }
 0x3af   : > { %5450 = vrot.lane.b32.xlu1 %v5449_v49, %s5570_s24  ;;  %v1468_v21 = vsel %vm1086_vm5, %v6078_v47, %v6075_v10  ;;  %v7048_v11 = vmov 0   ;;  %v1465_v60 = vsel %vm1083_vm1, %v6039_v41, %v6078_v47  ;;  %v1467_v45 = vsel %vm7041_vm3, %v6075_v10, %v6036_v14 }
 0x3b0   : > { %1394 = vmatprep.mubr.bf16.mxu0 %v7048_v11  ;;  %1435 = vmatprep.mubr.bf16.mxu1 %v7048_v11  ;;  %v1351_v20 = vsel %vm1148_vm12, %v1343_v6, 0  ;;  %v1479_v9 = vpack.c.bf16 %v1468_v21, %v1468_v21  ;;  %v1357_v32 = vsel %vm1148_vm12, %v1345_v54, 0  ;;  %v1476_v42 = vpack.c.bf16 %v1465_v60, %v1465_v60  ;;  %v5198_v6 = vld [vmem:[%s7014_s6 + $0xc] sm:$0xf]  ;;  %v5446_v54 = vpop.permute.xlu0 %5445 }
 0x3b1   : > { %1363 = vmatpush1.bf16.msra.mxu0 %v1351_v20  ;;  %1404 = vmatpush1.bf16.msra.mxu1 %v1357_v32  ;;  %v1478_v49 = vpack.c.bf16 %v1467_v45, %v1467_v45  ;;  %v7049_v2 = vpack.i.bf16 %v5830_v35, %v5818_v23  ;;  %v1585_v27 = vpack.c.bf16 %v5795_v17, %v5795_v17  ;;  %v5441_v20 = vpop.permute.xlu1 %5440  ;;  %vm7051_vm11 = vcmp.eq.s32.totalorder %v5891_v61, 1 }
 0x3b2   : > { %5465 = vrot.lane.b32.xlu0 %v5828_v28, %s5568_s20  ;;  %5199 = vmatprep.subr.msk.bf16.mxu0 %vm1148_vm12, %v1477_v5  ;;  %v1484_v46 = vsel %vm1148_vm12, %v1476_v42, 0  ;;  %v7050_v5 = vpack.i.bf16 %v5816_v22, %v5820_v25  ;;  %v1584_v17 = vpack.c.bf16 %v5792_v16, %v5792_v16  ;;  %v1475_v60 = vpack.c.bf16 %v5198_v6, %v5198_v6  ;;  %v5203_v42 = vld [vmem:[%s7014_s6 + $0x30] sm:$0xf] }
 0x3b3   : > { %5460 = vrot.lane.b32.xlu1 %v5834_v40, %s5568_s20  ;;  %5201 = vmatprep.subr.msk.bf16.mxu1 %vm1148_vm12, %v1479_v9  ;;  %v1490_v21 = vsel %vm1148_vm12, %v1478_v49, 0  ;;  %v6145_v9 = vsel %vm7039_vm14, %v5975_v38, %v6011_v3  ;;  %v5448_v45 = vunpack.i.h.bf16 %v5446_v54  ;;  %v5447_v32 = vunpack.i.l.bf16 %v5446_v54 }
 0x3b4   : > { %5195 = vmatmul.mubr.msk.bf16.vlgmr.msra.gmra.mrb[12].mxu0 %vm1144_vm13, %v1342_v48  ;;  %vm7052_vm10 = vcmp.eq.s32.totalorder %v5895_v44, 1  ;;  %vm7053_vm14 = vcmp.eq.s32.totalorder %v5897_v62, 1  ;;  %v5443_v38 = vunpack.i.h.bf16 %v5441_v20  ;;  %v5442_v3 = vunpack.i.l.bf16 %v5441_v20 }
 0x3b5   : > { %5197 = vmatmul.mubr.msk.bf16.vlgmr.msra.gmra.mrb[12].mxu1 %vm1144_vm13, %v1342_v48  ;;  %1496 = vmatpush1.bf16.msra.mxu0 %v1484_v46  ;;  %v1587_v48 = vpack.c.bf16 %v5801_v19, %v5801_v19  ;;  %v6151_v19 = vsel %vm7051_vm11, %v5966_v53, %v6002_v59  ;;  %v6160_v16 = vsel %vm7052_vm10, %v6033_v63, %v6014_v13  ;;  %vm7054_vm10 = vcmask 64512  }
 0x3b6   : > { %5475 = vrot.lane.b32.xlu0 %v7049_v2, %s5569_s21  ;;  %1537 = vmatpush1.bf16.msra.mxu1 %v1490_v21  ;;  %v6166_v53 = vsel %vm7053_vm14, %v5980_v39, %v6022_v15  ;;  %v1470_v59 = vsel %vm7040_vm2, %v6039_v41, %v6036_v14  ;;  %v5494_v13 = vpack.i.bf16 %v6151_v19, %v6145_v9  ;;  %v1592_v15 = vsel %vm1148_vm12, %v1584_v17, 0  ;;  %vm7055_vm11 = vmmov %vm7054_vm10 }
 0x3b7   : > { %5470 = vrot.lane.b32.xlu1 %v7050_v5, %s5569_s21  ;;  %5204 = vmatprep.subr.msk.bf16.mxu0 %vm1148_vm12, %v1585_v27  ;;  %v1472_v39 = vsel %vm1126_vm15, %v6075_v10, %v6078_v47  ;;  %v1693_v63 = vpack.c.bf16 %v1470_v59, %v1470_v59  ;;  %v1469_v49 = vsel %vm1123_vm7, %v6078_v47, %v6039_v41  ;;  %vm7056_vm14 = vmmov %vm7054_vm10  ;;  %s6934_s21 = scalar_lea.vmem %s7009_s1, %s5330_s15 }
 0x3b8   : > { %5206 = vmatprep.subr.msk.bf16.mxu1 %vm1148_vm12, %v1587_v48  ;;  %1527 = vmatprep.mubr.bf16.mxu0 %v7048_v11  ;;  %v6199_v2 = vsel %vm647_vm0, %v5443_v38, %v5447_v32  ;;  %v1695_v27 = vpack.c.bf16 %v1472_v39, %v1472_v39  ;;  %v1471_v6 = vsel %vm1125_vm6, %v6036_v14, %v6075_v10 }
 0x3b9   : > { %1568 = vmatprep.mubr.bf16.mxu1 %v7048_v11  ;;  %v1812_v54 = vsel %vm647_vm0, %v5448_v45, %v5442_v3  ;;  %v1817_v5 = vsel %vm647_vm0, %v5442_v3, %v5443_v38  ;;  %v1583_v41 = vpack.c.bf16 %v5203_v42, %v5203_v42  ;;  %v1692_v47 = vpack.c.bf16 %v1469_v49, %v1469_v49 }
 0x3ba   : > { %5485 = vrot.lane.b32.xlu0 %v5737_v31, %s5570_s24  ;;  %v1586_v31 = vpack.c.bf16 %v5798_v18, %v5798_v18  ;;  %v6186_v18 = vsel %vm647_vm0, %v5447_v32, %v5448_v45  ;;  %v1694_v21 = vpack.c.bf16 %v1471_v6, %v1471_v6  ;;  %v1821_v10 = vsel %vm1086_vm5, %v1817_v5, %v1812_v54  ;;  %v5208_v45 = vld [vmem:[%s7014_s6 + $0x54] sm:$0xf] }
 0x3bb   : > { %5480 = vrot.lane.b32.xlu1 %v5745_v34, %s5570_s24  ;;  %v5489_v34 = vpack.i.bf16 %v6160_v16, %v6166_v53  ;;  %v1819_v14 = vsel %vm1084_vm4, %v6186_v18, %v6199_v2  ;;  %v1700_v48 = vsel %vm1148_vm12, %v1692_v47, 0  ;;  %v1818_v32 = vsel %vm1083_vm1, %v6199_v2, %v1817_v5 }
 0x3bc   : > { %5200 = vmatmul.mubr.msk.bf16.vlgmr.msra.gmra.mrb[16].mxu0 %vm1144_vm13, %v1475_v60  ;;  %v1598_v46 = vsel %vm1148_vm12, %v1586_v31, 0  ;;  %v1830_v20 = vpack.c.bf16 %v1819_v14, %v1819_v14  ;;  %v1706_v17 = vsel %vm1148_vm12, %v1694_v21, 0  ;;  %v1820_v38 = vsel %vm7041_vm3, %v1812_v54, %v6186_v18 }
 0x3bd   : > { %5202 = vmatmul.mubr.msk.bf16.vlgmr.msra.gmra.mrb[16].mxu1 %vm1144_vm13, %v1475_v60  ;;  %1604 = vmatpush1.bf16.msra.mxu0 %v1592_v15  ;;  %v1832_v60 = vpack.c.bf16 %v1821_v10, %v1821_v10  ;;  %v1691_v31 = vpack.c.bf16 %v5208_v45, %v5208_v45  ;;  %v1829_v59 = vpack.c.bf16 %v1818_v32, %v1818_v32  ;;  %v5228_v32 = vld [vmem:[%s7014_s6 + $0x4] sm:$0xf] }
 0x3be   : > { %5495 = vrot.lane.b32.xlu0 %v5494_v13, %s5570_s24  ;;  %1645 = vmatpush1.bf16.msra.mxu1 %v1598_v46  ;;  %v1831_v3 = vpack.c.bf16 %v1820_v38, %v1820_v38  ;;  %v1938_v13 = vpack.c.bf16 %v5913_v43, %v5913_v43  ;;  %v1939_v42 = vpack.c.bf16 %v5917_v36, %v5917_v36  ;;  %v5218_v36 = vld [vmem:[%s7014_s6 + $0x3c] sm:$0xf] }
 0x3bf   : > { %5490 = vrot.lane.b32.xlu1 %v5489_v34, %s5570_s24  ;;  %5209 = vmatprep.subr.msk.bf16.mxu0 %vm1148_vm12, %v1693_v63  ;;  %v1837_v39 = vsel %vm1148_vm12, %v1829_v59, 0  ;;  %v1940_v34 = vpack.c.bf16 %v5929_v1, %v5929_v1  ;;  %v5213_v63 = vld [vmem:[%s7014_s6 + $0x18] sm:$0xf]  ;;  %v1937_v1 = vpack.c.bf16 %v5925_v37, %v5925_v37  ;;  %v1823_v49 = vsel %vm7040_vm2, %v6199_v2, %v6186_v18 }
 0x3c0   : > { %5211 = vmatprep.subr.msk.bf16.mxu1 %vm1148_vm12, %v1695_v27  ;;  %1635 = vmatprep.mubr.bf16.mxu0 %v7048_v11  ;;  %v1843_v15 = vsel %vm1148_vm12, %v1831_v3, 0  ;;  %v1828_v43 = vpack.c.bf16 %v5213_v63, %v5213_v63  ;;  %v1825_v46 = vsel %vm1126_vm15, %v1812_v54, %v1817_v5  ;;  %v2046_v6 = vpack.c.bf16 %v1823_v49, %v1823_v49 }
 0x3c1   : > { %1676 = vmatprep.mubr.bf16.mxu1 %v7048_v11  ;;  %v1945_v27 = vsel %vm1148_vm12, %v1937_v1, 0  ;;  %v1951_v37 = vsel %vm1148_vm12, %v1939_v42, 0  ;;  %v1822_v47 = vsel %vm1123_vm7, %v1817_v5, %v6199_v2  ;;  %v1824_v21 = vsel %vm1125_vm6, %v6186_v18, %v1812_v54  ;;  %v5223_v18 = vld [vmem:[%s7014_s6 + $0x60] sm:$0xf] }
 0x3c2   : > { %v1936_v14 = vpack.c.bf16 %v5218_v36, %v5218_v36  ;;  %v2045_v10 = vpack.c.bf16 %v1822_v47, %v1822_v47  ;;  %v2044_v54 = vpack.c.bf16 %v5223_v18, %v5223_v18  ;;  %v2333_v59 = vpack.c.bf16 %v6048_v0, %v6048_v0 }
 0x3c3   : > { %v2335_v3 = vpack.c.bf16 %v6069_v33, %v6069_v33  ;;  %v2332_v47 = vpack.c.bf16 %v6060_v30, %v6060_v30 }
 0x3c4   : > { %5205 = vmatmul.mubr.msk.bf16.vlgmr.msra.gmra.mrb[20].mxu0 %vm1144_vm13, %v1583_v41  ;;  %v2053_v2 = vsel %vm1148_vm12, %v2045_v10, 0 }
 0x3c5   : > { %5207 = vmatmul.mubr.msk.bf16.vlgmr.msra.gmra.mrb[20].mxu1 %vm1144_vm13, %v1583_v41  ;;  %1712 = vmatpush1.bf16.msra.mxu0 %v1700_v48  ;;  %v2048_v41 = vpack.c.bf16 %v1825_v46, %v1825_v46  ;;  %v2047_v48 = vpack.c.bf16 %v1824_v21, %v1824_v21  ;;  %v2334_v21 = vpack.c.bf16 %v6054_v29, %v6054_v29 }
 0x3c6   : > { %1753 = vmatpush1.bf16.msra.mxu1 %v1706_v17  ;;  %5214 = vmatprep.subr.msk.bf16.mxu0 %vm1148_vm12, %v1830_v20 }
 0x3c7   : > { %5216 = vmatprep.subr.msk.bf16.mxu1 %vm1148_vm12, %v1832_v60  ;;  %1743 = vmatprep.mubr.bf16.mxu0 %v7048_v11  ;;  %v2059_v5 = vsel %vm1148_vm12, %v2047_v48, 0 }
 0x3c8   : > { %1784 = vmatprep.mubr.bf16.mxu1 %v7048_v11 }
 0x3cc   : > { %5210 = vmatmul.mubr.msk.bf16.vlgmr.msra.gmra.mrb[24].mxu0 %vm1144_vm13, %v1691_v31 }
 0x3cd   : > { %5212 = vmatmul.mubr.msk.bf16.vlgmr.msra.gmra.mrb[24].mxu1 %vm1144_vm13, %v1691_v31  ;;  %1849 = vmatpush1.bf16.msra.mxu0 %v1837_v39 }
 0x3ce   : > { %1890 = vmatpush1.bf16.msra.mxu1 %v1843_v15  ;;  %5219 = vmatprep.subr.msk.bf16.mxu0 %vm1148_vm12, %v1938_v13 }
 0x3cf   : > { %5221 = vmatprep.subr.msk.bf16.mxu1 %vm1148_vm12, %v1940_v34  ;;  %1880 = vmatprep.mubr.bf16.mxu0 %v7048_v11 }
 0x3d0   : > { %1921 = vmatprep.mubr.bf16.mxu1 %v7048_v11 }
 0x3d4   : > { %5215 = vmatmul.mubr.msk.bf16.vlgmr.msra.gmra.mrb[28].mxu0 %vm1144_vm13, %v1828_v43 }
 0x3d5   : > { %5217 = vmatmul.mubr.msk.bf16.vlgmr.msra.gmra.mrb[28].mxu1 %vm1144_vm13, %v1828_v43  ;;  %1957 = vmatpush1.bf16.msra.mxu0 %v1945_v27  ;;  %v2223_v43 = vpack.c.bf16 %v5228_v32, %v5228_v32 }
 0x3d6   : > { %1998 = vmatpush1.bf16.msra.mxu1 %v1951_v37  ;;  %5224 = vmatprep.subr.msk.bf16.mxu0 %vm1148_vm12, %v2046_v6 }
 0x3d7   : > { %5226 = vmatprep.subr.msk.bf16.mxu1 %vm1148_vm12, %v2048_v41  ;;  %1988 = vmatprep.mubr.bf16.mxu0 %v7048_v11 }
 0x3d8   : > { %2029 = vmatprep.mubr.bf16.mxu1 %v7048_v11 }
 0x3dc   : > { %5220 = vmatmul.mubr.msk.bf16.vlgmr.msra.gmra.mrb[32].mxu0 %vm1144_vm13, %v1936_v14 }
 0x3dd   : > { %5222 = vmatmul.mubr.msk.bf16.vlgmr.msra.gmra.mrb[32].mxu1 %vm1144_vm13, %v1936_v14  ;;  %2065 = vmatpush1.bf16.msra.mxu0 %v2053_v2 }
 0x3de   : > { %2106 = vmatpush1.bf16.msra.mxu1 %v2059_v5  ;;  %2096 = vmatprep.mubr.bf16.mxu0 %v7048_v11 }
 0x3df   : > { %2137 = vmatprep.mubr.bf16.mxu1 %v7048_v11 }
 0x3e4   : > { %5225 = vmatmul.mubr.msk.bf16.vlgmr.msra.gmra.mrb[36].mxu0 %vm1144_vm13, %v2044_v54 }
 0x3e5   : > { %5227 = vmatmul.mubr.msk.bf16.vlgmr.msra.gmra.mrb[36].mxu1 %vm1144_vm13, %v2044_v54  ;;  %2275 = vmatprep.mubr.bf16.mxu0 %v7048_v11 }
 0x3e6   : > { %2316 = vmatprep.mubr.bf16.mxu1 %v7048_v11 }
 0x420   : > { %v5456_v20 = vpop.permute.xlu0 %5455 }
 0x421   : > { %v5458_v17 = vunpack.i.h.bf16 %v5456_v20  ;;  %v5457_v60 = vunpack.i.l.bf16 %v5456_v20  ;;  %v5451_v45 = vpop.permute.xlu1 %5450 }
 0x422   : > { %v5453_v38 = vunpack.i.h.bf16 %v5451_v45  ;;  %v5452_v31 = vunpack.i.l.bf16 %v5451_v45 }
 0x423   : > { %v6299_v13 = vsel %vm647_vm0, %v5457_v60, %v5458_v17 }
 0x424   : > { %v6302_v39 = vsel %vm647_vm0, %v5453_v38, %v5457_v60  ;;  %v6305_v34 = vsel %vm647_vm0, %v5458_v17, %v5452_v31  ;;  %v6308_v15 = vsel %vm647_vm0, %v5452_v31, %v5453_v38  ;;  %v5466_v63 = vpop.permute.xlu0 %5465 }
 0x425   : > { %v5468_v1 = vunpack.i.h.bf16 %v5466_v63  ;;  %v5467_v42 = vunpack.i.l.bf16 %v5466_v63  ;;  %v5461_v0 = vpop.permute.xlu1 %5460  ;;  %v2214_v33 = vsel %vm1084_vm4, %v6299_v13, %v6302_v39  ;;  %v2216_v49 = vsel %vm1086_vm5, %v6308_v15, %v6305_v34 }
 0x426   : > { %v5463_v46 = vunpack.i.h.bf16 %v5461_v0  ;;  %v5462_v27 = vunpack.i.l.bf16 %v5461_v0  ;;  %v2225_v6 = vpack.c.bf16 %v2214_v33, %v2214_v33  ;;  %v2227_v37 = vpack.c.bf16 %v2216_v49, %v2216_v49 }
 0x427   : > { %v2213_v41 = vsel %vm1083_vm1, %v6302_v39, %v6308_v15  ;;  %v2215_v36 = vsel %vm7041_vm3, %v6305_v34, %v6299_v13  ;;  %v6331_v14 = vsel %vm7054_vm10, %v5467_v42, %v5468_v1  ;;  %v2218_v2 = vsel %vm7040_vm2, %v6302_v39, %v6299_v13 }
 0x428   : > { %v6334_v10 = vsel %vm7055_vm11, %v5463_v46, %v5467_v42  ;;  %5229 = vmatprep.subr.msk.bf16.mxu0 %vm1148_vm12, %v2225_v6  ;;  %5231 = vmatprep.subr.msk.bf16.mxu1 %vm1148_vm12, %v2227_v37  ;;  %v5476_v48 = vpop.permute.xlu0 %5475  ;;  %v2224_v29 = vpack.c.bf16 %v2213_v41, %v2213_v41  ;;  %v2226_v54 = vpack.c.bf16 %v2215_v36, %v2215_v36  ;;  %vm7057_vm11 = vcmask 982016  }
 0x429   : > { %v5478_v30 = vunpack.i.h.bf16 %v5476_v48  ;;  %v5477_v5 = vunpack.i.l.bf16 %v5476_v48  ;;  %v5471_v18 = vpop.permute.xlu1 %5470  ;;  %v6343_v20 = vsel %vm7056_vm14, %v5468_v1, %v5462_v27  ;;  %v3267_v17 = vsel %vm7054_vm10, %v5462_v27, %v5463_v46  ;;  %vm7058_vm2 = vmmov %vm7057_vm11 }
 0x42a   : > { %v5473_v60 = vunpack.i.h.bf16 %v5471_v18  ;;  %v5472_v45 = vunpack.i.l.bf16 %v5471_v18  ;;  %v2232_v38 = vsel %vm1148_vm12, %v2224_v29, 0  ;;  %v2238_v31 = vsel %vm1148_vm12, %v2226_v54, 0  ;;  %vm7059_vm3 = vmmov %vm7058_vm2 }
 0x42b   : > { %v3278_v32 = vsel %vm7057_vm11, %v5477_v5, %v5478_v30  ;;  %v2220_v63 = vsel %vm1126_vm15, %v6305_v34, %v6308_v15  ;;  %vm7060_vm14 = vmmov %vm7058_vm2  ;;  %2244 = vmatpush1.bf16.msra.mxu0 %v2232_v38  ;;  %2285 = vmatpush1.bf16.msra.mxu1 %v2238_v31  ;;  %v2340_v49 = vsel %vm1148_vm12, %v2332_v47, 0  ;;  %v2441_v47 = vpack.c.bf16 %v2218_v2, %v2218_v2 }
 0x42c   : > { %v3277_v42 = vsel %vm7058_vm2, %v5473_v60, %v5477_v5  ;;  %v3276_v1 = vsel %vm7059_vm3, %v5472_v45, %v5473_v60  ;;  %v3284_v0 = vsel %vm7060_vm14, %v5478_v30, %v5472_v45  ;;  %v5486_v33 = vpop.permute.xlu0 %5485  ;;  %5234 = vmatprep.subr.msk.bf16.mxu0 %vm1148_vm12, %v2333_v59  ;;  %5236 = vmatprep.subr.msk.bf16.mxu1 %vm1148_vm12, %v2335_v3  ;;  %v2346_v3 = vsel %vm1148_vm12, %v2334_v21, 0 }
 0x42d   : > { %v5488_v46 = vunpack.i.h.bf16 %v5486_v33  ;;  %v5487_v27 = vunpack.i.l.bf16 %v5486_v33  ;;  %v5481_v6 = vpop.permute.xlu1 %5480  ;;  %v6362_v37 = vsel %vm983_vm8, %v3277_v42, %v6334_v10  ;;  %v6367_v41 = vsel %vm984_vm9, %v3278_v32, %v6331_v14 }
 0x42e   : > { %v5483_v36 = vunpack.i.h.bf16 %v5481_v6  ;;  %v5482_v48 = vunpack.i.l.bf16 %v5481_v6  ;;  %v5504_v59 = vpack.i.bf16 %v6367_v41, %v6362_v37  ;;  %5230 = vmatmul.mubr.msk.bf16.vlgmr.msra.gmra.mrb[40].mxu0 %vm1144_vm13, %v2223_v43  ;;  %5232 = vmatmul.mubr.msk.bf16.vlgmr.msra.gmra.mrb[40].mxu1 %vm1144_vm13, %v2223_v43  ;;  %v2443_v51 = vpack.c.bf16 %v2220_v63, %v2220_v63  ;;  %v5233_v43 = vld [vmem:[%s7014_s6 + $0x28] sm:$0xf]  ;;  %v5243_v6 = vld [vmem:[%s7014_s6 + $0x10] sm:$0xf] }
 0x42f   : > { %vm7061_vm8 = vcmp.eq.s32.totalorder %v5856_v55, 1  ;;  %vm7062_vm9 = vcmp.eq.s32.totalorder %v5858_v56, 1  ;;  %v6384_v2 = vsel %vm647_vm0, %v5487_v27, %v5488_v46  ;;  %2352 = vmatpush1.bf16.msra.mxu0 %v2340_v49  ;;  %2393 = vmatpush1.bf16.msra.mxu1 %v2346_v3  ;;  %v2217_v18 = vsel %vm1123_vm7, %v6308_v15, %v6302_v39 }
 0x430   : > { %v6376_v30 = vsel %vm7061_vm8, %v3276_v1, %v3267_v17  ;;  %v6381_v52 = vsel %vm7062_vm9, %v3284_v0, %v6343_v20  ;;  %v6390_v21 = vsel %vm647_vm0, %v5483_v36, %v5487_v27  ;;  %v6393_v55 = vsel %vm647_vm0, %v5488_v46, %v5482_v48  ;;  %5239 = vmatprep.subr.msk.bf16.mxu0 %vm1148_vm12, %v2441_v47  ;;  %v7069_v46 = vld [vmem:[#allocation5_spill] sm:$0xff] }
 0x431   : > { %5241 = vmatprep.subr.msk.bf16.mxu1 %vm1148_vm12, %v2443_v51  ;;  %v5499_v56 = vpack.i.bf16 %v6376_v30, %v6381_v52  ;;  %v6400_v5 = vsel %vm647_vm0, %v5482_v48, %v5483_v36  ;;  %5505 = vrot.lane.b32.xlu0 %v5504_v59, %s5570_s24  ;;  %v2219_v29 = vsel %vm1125_vm6, %v6299_v13, %v6305_v34  ;;  %vm7063_vm2 = vcmp.eq.s32.totalorder %v5884_v57, 1  ;;  %v5496_v36 = vpop.permute.xlu0 %5495  ;;  %v5491_v48 = vpop.permute.xlu1 %5490  ;;  %v7070_v59 = vld [vmem:[#allocation4_spill] sm:$0xff]  ;;  %v7071_v51 = vld [vmem:[#allocation3_spill] sm:$0xff] }
 0x432   : > { %2383 = vmatprep.mubr.bf16.mxu0 %v7048_v11  ;;  %2424 = vmatprep.mubr.bf16.mxu1 %v7048_v11  ;;  %v2331_v54 = vpack.c.bf16 %v5233_v43, %v5233_v43  ;;  %v2440_v60 = vpack.c.bf16 %v2217_v18, %v2217_v18  ;;  %v2442_v45 = vpack.c.bf16 %v2219_v29, %v2219_v29  ;;  %vm7064_vm3 = vcmp.eq.s32.totalorder %v5891_v61, 1 }
 0x433   : > { %5500 = vrot.lane.b32.xlu1 %v5499_v56, %s5570_s24  ;;  %v2563_v38 = vsel %vm1084_vm4, %v6384_v2, %v6390_v21  ;;  %v2565_v39 = vsel %vm1086_vm5, %v6400_v5, %v6393_v55  ;;  %v6427_v34 = vsel %vm7063_vm2, %v6334_v10, %v3277_v42  ;;  %v6432_v15 = vsel %vm7064_vm3, %v6331_v14, %v3278_v32  ;;  %v4348_v32 = vld [vmem:[%s7015_s7] sm:$0xf] }
 0x434   : > { %v2574_v31 = vpack.c.bf16 %v2563_v38, %v2563_v38  ;;  %v2576_v13 = vpack.c.bf16 %v2565_v39, %v2565_v39  ;;  %vm7065_vm10 = vcmp.eq.s32.totalorder %v5895_v44, 1  ;;  %vm7066_vm11 = vcmp.eq.s32.totalorder %v5897_v62, 1 }
 0x435   : > { %5515 = vrot.lane.b32.xlu0 %v5828_v28, %s5570_s24  ;;  %v6436_v63 = vsel %vm7065_vm10, %v3267_v17, %v3276_v1  ;;  %v2448_v28 = vsel %vm1148_vm12, %v2440_v60, 0  ;;  %v6445_v57 = vsel %vm7066_vm11, %v6343_v20, %v3284_v0  ;;  %v2454_v61 = vsel %vm1148_vm12, %v2442_v45, 0  ;;  %v7068_v0 = vld [vmem:[#allocation2_spill] sm:$0xff] }
 0x436   : > { %5235 = vmatmul.mubr.msk.bf16.vlgmr.msra.gmra.mrb[44].mxu0 %vm1144_vm13, %v2331_v54  ;;  %5237 = vmatmul.mubr.msk.bf16.vlgmr.msra.gmra.mrb[44].mxu1 %vm1144_vm13, %v2331_v54  ;;  %v5524_v44 = vpack.i.bf16 %v6432_v15, %v6427_v34  ;;  %v2562_v14 = vsel %vm1083_vm1, %v6390_v21, %v6400_v5  ;;  %v5519_v62 = vpack.i.bf16 %v6436_v63, %v6445_v57  ;;  %vm7067_vm14 = vcmp.eq.s32.totalorder %v5960_v50, 1 }
 0x437   : > { %5510 = vrot.lane.b32.xlu1 %v5834_v40, %s5570_s24  ;;  %2460 = vmatpush1.bf16.msra.mxu0 %v2448_v28  ;;  %v5238_v40 = vld [vmem:[%s7014_s6 + $0x4c] sm:$0xf]  ;;  %v2564_v10 = vsel %vm7067_vm14, %v6393_v55, %v6384_v2  ;;  %v2573_v17 = vpack.c.bf16 %v2562_v14, %v2562_v14  ;;  %v2682_v33 = vpack.c.bf16 %v7068_v0, %v7068_v0  ;;  %vm7072_vm8 = vcmp.eq.s32.totalorder %v5970_v58, 1  ;;  %v5248_v28 = vld [vmem:[%s7014_s6 + $0x34] sm:$0xf]  ;;  %vm7073_vm9 = vmmov %vm7067_vm14 }
 0x438   : > { %2501 = vmatpush1.bf16.msra.mxu1 %v2454_v61  ;;  %5244 = vmatprep.subr.msk.bf16.mxu0 %vm1148_vm12, %v2574_v31  ;;  %v2439_v20 = vpack.c.bf16 %v5238_v40, %v5238_v40  ;;  %v2575_v42 = vpack.c.bf16 %v2564_v10, %v2564_v10  ;;  %v2684_v27 = vpack.c.bf16 %v7069_v46, %v7069_v46  ;;  %v5498_v18 = vunpack.i.h.bf16 %v5496_v36  ;;  %v5253_v0 = vld [vmem:[%s7014_s6 + $0x58] sm:$0xf]  ;;  %vm7074_vm2 = vmmov %vm7072_vm8  ;;  %v5308_v58 = vld [vmem:[%s7014_s6 + $0x44] sm:$0xf] }
 0x439   : > { %5246 = vmatprep.subr.msk.bf16.mxu1 %vm1148_vm12, %v2576_v13  ;;  %5525 = vrot.lane.b32.xlu0 %v5524_v44, %s5570_s24  ;;  %v2581_v1 = vsel %vm1148_vm12, %v2573_v17, 0  ;;  %v2572_v47 = vpack.c.bf16 %v5243_v6, %v5243_v6  ;;  %v2681_v3 = vpack.c.bf16 %v7070_v59, %v7070_v59  ;;  %v2683_v43 = vpack.c.bf16 %v7071_v51, %v7071_v51  ;;  %vm7075_vm3 = vmmov %vm7073_vm9 }
 0x43a   : > { %2491 = vmatprep.mubr.bf16.mxu0 %v7048_v11  ;;  %2532 = vmatprep.mubr.bf16.mxu1 %v7048_v11  ;;  %v2587_v49 = vsel %vm1148_vm12, %v2575_v42, 0  ;;  %v2567_v56 = vsel %vm7072_vm8, %v6390_v21, %v6384_v2  ;;  %v5497_v29 = vunpack.i.l.bf16 %v5496_v36  ;;  %v5493_v54 = vunpack.i.h.bf16 %v5491_v48  ;;  %vm7076_vm10 = vmmov %vm7074_vm2 }
 0x43b   : > { %5520 = vrot.lane.b32.xlu1 %v5519_v62, %s5570_s24  ;;  %v2569_v60 = vsel %vm1126_vm15, %v6393_v55, %v6400_v5  ;;  %v5492_v45 = vunpack.i.l.bf16 %v5491_v48  ;;  %v2689_v38 = vsel %vm1148_vm12, %v2681_v3, 0  ;;  %v2790_v31 = vpack.c.bf16 %v2567_v56, %v2567_v56  ;;  %v5258_v3 = vld [vmem:[%s7014_s6 + $0x1c] sm:$0xf]  ;;  %vm7077_vm11 = vmmov %vm7075_vm3 }
 0x43c   : > { %v2695_v39 = vsel %vm1148_vm12, %v2683_v43, 0  ;;  %v2792_v13 = vpack.c.bf16 %v2569_v60, %v2569_v60  ;;  %v2566_v61 = vsel %vm1123_vm7, %v6400_v5, %v6390_v21  ;;  %v6512_v44 = vsel %vm647_vm0, %v5497_v29, %v5498_v18  ;;  %vm7078_vm14 = vmmov %vm7074_vm2 }
 0x43d   : > { %v2907_v40 = vsel %vm647_vm0, %v5493_v54, %v5497_v29  ;;  %v2568_v14 = vsel %vm1125_vm6, %v6384_v2, %v6393_v55  ;;  %v2909_v62 = vsel %vm647_vm0, %v5498_v18, %v5492_v45  ;;  %v2914_v10 = vsel %vm647_vm0, %v5492_v45, %v5493_v54  ;;  %v1195_v18 = vpop.f32.mrb[4].mxu0 }
 0x43e   : > { %5240 = vmatmul.mubr.msk.bf16.vlgmr.msra.gmra.mrb[48].mxu0 %vm1144_vm13, %v2439_v20  ;;  %5242 = vmatmul.mubr.msk.bf16.vlgmr.msra.gmra.mrb[48].mxu1 %vm1144_vm13, %v2439_v20  ;;  %v2680_v21 = vpack.c.bf16 %v5248_v28, %v5248_v28  ;;  %v2789_v5 = vpack.c.bf16 %v2566_v61, %v2566_v61  ;;  %v2791_v20 = vpack.c.bf16 %v2568_v14, %v2568_v14  ;;  %v1197_v29 = vpop.f32.mrb[5].mxu0 }
 0x43f   : > { %4351 = vperm.xlu1 %5358, %v4348_v32   ;;  %2593 = vmatpush1.bf16.msra.mxu0 %v2581_v1  ;;  %v2916_v17 = vsel %vm1084_vm4, %v6512_v44, %v2907_v40  ;;  %v2918_v2 = vsel %vm1086_vm5, %v2914_v10, %v2909_v62  ;;  %v2788_v46 = vpack.c.bf16 %v5253_v0, %v5253_v0  ;;  %v1199_v45 = vpop.f32.mrb[6].mxu0 }
 0x440   : > { %2634 = vmatpush1.bf16.msra.mxu1 %v2587_v49  ;;  %5249 = vmatprep.subr.msk.bf16.mxu0 %vm1148_vm12, %v2682_v33  ;;  %v2797_v55 = vsel %vm1148_vm12, %v2789_v5, 0  ;;  %v2927_v32 = vpack.c.bf16 %v2916_v17, %v2916_v17  ;;  %v2803_v42 = vsel %vm1148_vm12, %v2791_v20, 0  ;;  %v2929_v1 = vpack.c.bf16 %v2918_v2, %v2918_v2 }
 0x441   : > { %5251 = vmatprep.subr.msk.bf16.mxu1 %vm1148_vm12, %v2684_v27  ;;  %2624 = vmatprep.mubr.bf16.mxu0 %v7048_v11  ;;  %v2915_v33 = vsel %vm1083_vm1, %v2907_v40, %v2914_v10  ;;  %v2917_v49 = vsel %vm7073_vm9, %v2909_v62, %v6512_v44  ;;  %v3035_v36 = vpack.c.bf16 %v6145_v9, %v6145_v9 }
 0x442   : > { %2665 = vmatprep.mubr.bf16.mxu1 %v7048_v11  ;;  %v2926_v27 = vpack.c.bf16 %v2915_v33, %v2915_v33  ;;  %v2928_v6 = vpack.c.bf16 %v2917_v49, %v2917_v49  ;;  %v2925_v9 = vpack.c.bf16 %v5258_v3, %v5258_v3  ;;  %v3036_v51 = vpack.c.bf16 %v6151_v19, %v6151_v19 }
 0x443   : > { %v2920_v43 = vsel %vm7074_vm2, %v2907_v40, %v6512_v44  ;;  %v2922_v56 = vsel %vm1126_vm15, %v2909_v62, %v2914_v10  ;;  %v4138_v24 = vpack.c.bf16 %v6445_v57, %v6445_v57  ;;  %v4135_v57 = vpack.c.bf16 %v6436_v63, %v6436_v63 }
 0x444   : > { %v2934_v48 = vsel %vm1148_vm12, %v2926_v27, 0  ;;  %v2940_v59 = vsel %vm1148_vm12, %v2928_v6, 0  ;;  %v3143_v60 = vpack.c.bf16 %v2920_v43, %v2920_v43  ;;  %v3048_v19 = vsel %vm1148_vm12, %v3036_v51, 0 }
 0x446   : > { %5245 = vmatmul.mubr.msk.bf16.vlgmr.msra.gmra.mrb[52].mxu0 %vm1144_vm13, %v2572_v47  ;;  %5247 = vmatmul.mubr.msk.bf16.vlgmr.msra.gmra.mrb[52].mxu1 %vm1144_vm13, %v2572_v47  ;;  %v3037_v47 = vpack.c.bf16 %v6166_v53, %v6166_v53  ;;  %v3034_v53 = vpack.c.bf16 %v6160_v16, %v6160_v16  ;;  %v3145_v16 = vpack.c.bf16 %v2922_v56, %v2922_v56 }
 0x447   : > { %2701 = vmatpush1.bf16.msra.mxu0 %v2689_v38  ;;  %2742 = vmatpush1.bf16.msra.mxu1 %v2695_v39  ;;  %v5263_v38 = vld [vmem:[%s7014_s6 + $0x40] sm:$0xf]  ;;  %v1200_v39 = vpop.f32.mrb[7].mxu0 }
 0x448   : > { %5254 = vmatprep.subr.msk.bf16.mxu0 %vm1148_vm12, %v2790_v31  ;;  %5256 = vmatprep.subr.msk.bf16.mxu1 %vm1148_vm12, %v2792_v13  ;;  %v3042_v54 = vsel %vm1148_vm12, %v3034_v53, 0  ;;  %v2919_v31 = vsel %vm1123_vm7, %v2914_v10, %v2907_v40  ;;  %v2921_v13 = vsel %vm1125_vm6, %v6512_v44, %v2909_v62  ;;  %v3033_v28 = vpack.c.bf16 %v5263_v38, %v5263_v38  ;;  %v5268_v62 = vld [vmem:[%s7014_s6 + $0x64] sm:$0xf] }
 0x449   : > { %2732 = vmatprep.mubr.bf16.mxu0 %v7048_v11  ;;  %2773 = vmatprep.mubr.bf16.mxu1 %v7048_v11  ;;  %v3142_v61 = vpack.c.bf16 %v2919_v31, %v2919_v31  ;;  %v3144_v14 = vpack.c.bf16 %v2921_v13, %v2921_v13  ;;  %v3141_v17 = vpack.c.bf16 %v5268_v62, %v5268_v62 }
 0x44b   : > { %v3150_v10 = vsel %vm1148_vm12, %v3142_v61, 0  ;;  %v3156_v44 = vsel %vm1148_vm12, %v3144_v14, 0 }
 0x44e   : > { %5250 = vmatmul.mubr.msk.bf16.vlgmr.msra.gmra.mrb[56].mxu0 %vm1144_vm13, %v2680_v21  ;;  %5252 = vmatmul.mubr.msk.bf16.vlgmr.msra.gmra.mrb[56].mxu1 %vm1144_vm13, %v2680_v21  ;;  %v1236_v21 = vpop.f32.mrb[4].mxu1 }
 0x44f   : > { %2809 = vmatpush1.bf16.msra.mxu0 %v2797_v55  ;;  %2850 = vmatpush1.bf16.msra.mxu1 %v2803_v42  ;;  %v1238_v5 = vpop.f32.mrb[5].mxu1 }
 0x450   : > { %5259 = vmatprep.subr.msk.bf16.mxu0 %vm1148_vm12, %v2927_v32  ;;  %5261 = vmatprep.subr.msk.bf16.mxu1 %vm1148_vm12, %v2929_v1  ;;  %v1240_v40 = vpop.f32.mrb[6].mxu1 }
 0x451   : > { %2840 = vmatprep.mubr.bf16.mxu0 %v7048_v11  ;;  %2881 = vmatprep.mubr.bf16.mxu1 %v7048_v11  ;;  %v1241_v20 = vpop.f32.mrb[7].mxu1 }
 0x456   : > { %5255 = vmatmul.mubr.msk.bf16.vlgmr.msra.gmra.mrb[60].mxu0 %vm1144_vm13, %v2788_v46  ;;  %5257 = vmatmul.mubr.msk.bf16.vlgmr.msra.gmra.mrb[60].mxu1 %vm1144_vm13, %v2788_v46 }
 0x457   : > { %2946 = vmatpush1.bf16.msra.mxu0 %v2934_v48  ;;  %2987 = vmatpush1.bf16.msra.mxu1 %v2940_v59 }
 0x458   : > { %5264 = vmatprep.subr.msk.bf16.mxu0 %vm1148_vm12, %v3035_v36  ;;  %5266 = vmatprep.subr.msk.bf16.mxu1 %vm1148_vm12, %v3037_v47 }
 0x459   : > { %2977 = vmatprep.mubr.bf16.mxu0 %v7048_v11  ;;  %3018 = vmatprep.mubr.bf16.mxu1 %v7048_v11 }
 0x45e   : > { %5260 = vmatmul.mubr.msk.bf16.vlgmr.msra.gmra.mrb[64].mxu0 %vm1144_vm13, %v2925_v9  ;;  %5262 = vmatmul.mubr.msk.bf16.vlgmr.msra.gmra.mrb[64].mxu1 %vm1144_vm13, %v2925_v9 }
 0x45f   : > { %3054 = vmatpush1.bf16.msra.mxu0 %v3042_v54  ;;  %3095 = vmatpush1.bf16.msra.mxu1 %v3048_v19 }
 0x460   : > { %5269 = vmatprep.subr.msk.bf16.mxu0 %vm1148_vm12, %v3143_v60  ;;  %5271 = vmatprep.subr.msk.bf16.mxu1 %vm1148_vm12, %v3145_v16 }
 0x461   : > { %3085 = vmatprep.mubr.bf16.mxu0 %v7048_v11  ;;  %3126 = vmatprep.mubr.bf16.mxu1 %v7048_v11 }
 0x466   : > { %5265 = vmatmul.mubr.msk.bf16.vlgmr.msra.gmra.mrb[68].mxu0 %vm1144_vm13, %v3033_v28  ;;  %5267 = vmatmul.mubr.msk.bf16.vlgmr.msra.gmra.mrb[68].mxu1 %vm1144_vm13, %v3033_v28 }
 0x467   : > { %3162 = vmatpush1.bf16.msra.mxu0 %v3150_v10  ;;  %3203 = vmatpush1.bf16.msra.mxu1 %v3156_v44 }
 0x468   : > { %3193 = vmatprep.mubr.bf16.mxu0 %v7048_v11  ;;  %3234 = vmatprep.mubr.bf16.mxu1 %v7048_v11 }
 0x46e   : > { %5270 = vmatmul.mubr.msk.bf16.vlgmr.msra.gmra.mrb[72].mxu0 %vm1144_vm13, %v3141_v17  ;;  %5272 = vmatmul.mubr.msk.bf16.vlgmr.msra.gmra.mrb[72].mxu1 %vm1144_vm13, %v3141_v17 }
 0x46f   : > { %3376 = vmatprep.mubr.bf16.mxu0 %v7048_v11  ;;  %3417 = vmatprep.mubr.bf16.mxu1 %v7048_v11 }
 0x47f   : > { %v1292_v2 = vpop.f32.mrb[8].mxu0 }
 0x480   : > { %v1333_v55 = vpop.f32.mrb[8].mxu1  ;;  %v1293_v32 = vadd.f32 %v1292_v2, %v1195_v18  ;;  %v1294_v42 = vpop.f32.mrb[9].mxu0 }
 0x481   : > { %v1334_v1 = vadd.f32 %v1333_v55, %v1236_v21  ;;  %v1335_v0 = vpop.f32.mrb[9].mxu1  ;;  %v1295_v33 = vadd.f32 %v1294_v42, %v1197_v29  ;;  %v1296_v49 = vpop.f32.mrb[10].mxu0 }
 0x482   : > { %v1336_v46 = vadd.f32 %v1335_v0, %v1238_v5  ;;  %v1337_v27 = vpop.f32.mrb[10].mxu1  ;;  %v1297_v6 = vpop.f32.mrb[11].mxu0 }
 0x483   : > { %v1338_v36 = vpop.f32.mrb[11].mxu1 }
 0x487   : > { %v1396_v48 = vpop.f32.mrb[12].mxu0 }
 0x488   : > { %v1444_v47 = vadd.f32 %v1396_v48, %v1293_v32  ;;  %v1398_v59 = vpop.f32.mrb[13].mxu0  ;;  %v1437_v3 = vpop.f32.mrb[12].mxu1 }
 0x489   : > { %v1445_v9 = vadd.f32 %v1398_v59, %v1295_v33  ;;  %v1400_v53 = vpop.f32.mrb[14].mxu0  ;;  %v1446_v51 = vadd.f32 %v1437_v3, %v1334_v1  ;;  %v1439_v43 = vpop.f32.mrb[13].mxu1 }
 0x48a   : > { %v1401_v56 = vpop.f32.mrb[15].mxu0  ;;  %v1447_v54 = vadd.f32 %v1439_v43, %v1336_v46  ;;  %v1441_v18 = vpop.f32.mrb[14].mxu1 }
 0x48b   : > { %v1442_v60 = vpop.f32.mrb[15].mxu1 }
 0x48f   : > { %v1529_v45 = vpop.f32.mrb[16].mxu0 }
 0x490   : > { %v1577_v19 = vadd.f32 %v1529_v45, %v1444_v47  ;;  %v1531_v29 = vpop.f32.mrb[17].mxu0  ;;  %v1570_v16 = vpop.f32.mrb[16].mxu1 }
 0x491   : > { %v1578_v38 = vadd.f32 %v1531_v29, %v1445_v9  ;;  %v1533_v31 = vpop.f32.mrb[18].mxu0  ;;  %v1579_v39 = vadd.f32 %v1570_v16, %v1446_v51  ;;  %v1572_v13 = vpop.f32.mrb[17].mxu1 }
 0x492   : > { %v1534_v28 = vpop.f32.mrb[19].mxu0  ;;  %v1580_v61 = vadd.f32 %v1572_v13, %v1447_v54  ;;  %v1574_v14 = vpop.f32.mrb[18].mxu1 }
 0x493   : > { %v1575_v21 = vpop.f32.mrb[19].mxu1 }
 0x497   : > { %v1637_v5 = vpop.f32.mrb[20].mxu0 }
 0x498   : > { %v1685_v40 = vadd.f32 %v1637_v5, %v1577_v19  ;;  %v1639_v10 = vpop.f32.mrb[21].mxu0  ;;  %v1678_v20 = vpop.f32.mrb[20].mxu1 }
 0x499   : > { %v1686_v44 = vadd.f32 %v1639_v10, %v1578_v38  ;;  %v1641_v62 = vpop.f32.mrb[22].mxu0  ;;  %v1687_v17 = vadd.f32 %v1678_v20, %v1579_v39  ;;  %v1680_v2 = vpop.f32.mrb[21].mxu1 }
 0x49a   : > { %v1642_v55 = vpop.f32.mrb[23].mxu0  ;;  %v1688_v32 = vadd.f32 %v1680_v2, %v1580_v61  ;;  %v1682_v42 = vpop.f32.mrb[22].mxu1 }
 0x49b   : > { %v1683_v1 = vpop.f32.mrb[23].mxu1 }
 0x49c   : > { %v3436_v1 = vpack.c.bf16 %v6381_v52, %v6381_v52 }
 0x49f   : > { %v1745_v0 = vpop.f32.mrb[24].mxu0 }
 0x4a0   : > { %v6599_v33 = vadd.f32 %v1745_v0, %v1685_v40  ;;  %v1747_v49 = vpop.f32.mrb[25].mxu0  ;;  %v1786_v46 = vpop.f32.mrb[24].mxu1  ;;  %v5273_v40 = vld [vmem:[%s7014_s6 + $0x8] sm:$0xf] }
 0x4a1   : > { %v6601_v27 = vadd.f32 %v1747_v49, %v1686_v44  ;;  %v1749_v6 = vpop.f32.mrb[26].mxu0  ;;  %v6603_v36 = vadd.f32 %v1786_v46, %v1687_v17  ;;  %v1788_v48 = vpop.f32.mrb[25].mxu1  ;;  %v3434_v17 = vpack.c.bf16 %v6362_v37, %v6362_v37  ;;  %v3324_v0 = vpack.c.bf16 %v5273_v40, %v5273_v40 }
 0x4a2   : > { %v1750_v47 = vpop.f32.mrb[27].mxu0  ;;  %v6605_v59 = vadd.f32 %v1788_v48, %v1688_v32  ;;  %v1790_v3 = vpop.f32.mrb[26].mxu1  ;;  %v3433_v49 = vpack.c.bf16 %v6376_v30, %v6376_v30  ;;  %v3435_v46 = vpack.c.bf16 %v6367_v41, %v6367_v41 }
 0x4a3   : > { %v5506_v9 = vpop.permute.xlu0 %5505  ;;  %v1791_v53 = vpop.f32.mrb[27].mxu1 }
 0x4a4   : > { %v5508_v51 = vunpack.i.h.bf16 %v5506_v9  ;;  %v5507_v43 = vunpack.i.l.bf16 %v5506_v9 }
 0x4a5   : > { %v5501_v56 = vpop.permute.xlu1 %5500 }
 0x4a6   : > { %v5503_v54 = vunpack.i.h.bf16 %v5501_v56  ;;  %v5502_v18 = vunpack.i.l.bf16 %v5501_v56  ;;  %v3307_v60 = vsel %vm647_vm0, %v5507_v43, %v5508_v51 }
 0x4a7   : > { %v6611_v16 = vpop.f32.mrb[28].mxu0  ;;  %v5516_v44 = vpop.permute.xlu0 %5515 }
 0x4a8   : > { %v3306_v45 = vsel %vm647_vm0, %v5503_v54, %v5507_v43  ;;  %v3308_v19 = vsel %vm647_vm0, %v5508_v51, %v5502_v18  ;;  %v3313_v29 = vsel %vm647_vm0, %v5502_v18, %v5503_v54  ;;  %v6617_v39 = vpop.f32.mrb[29].mxu0  ;;  %v6619_v14 = vpop.f32.mrb[28].mxu1  ;;  %v5518_v6 = vunpack.i.h.bf16 %v5516_v44 }
 0x4a9   : > { %v3315_v38 = vsel %vm1084_vm4, %v3307_v60, %v3306_v45  ;;  %v3317_v31 = vsel %vm1086_vm5, %v3313_v29, %v3308_v19  ;;  %v1886_v61 = vpop.f32.mrb[30].mxu0  ;;  %v3314_v21 = vsel %vm1083_vm1, %v3306_v45, %v3313_v29  ;;  %v3316_v5 = vsel %vm7075_vm3, %v3308_v19, %v3307_v60  ;;  %v6628_v20 = vpop.f32.mrb[29].mxu1 }
 0x4aa   : > { %v3326_v13 = vpack.c.bf16 %v3315_v38, %v3315_v38  ;;  %v3328_v28 = vpack.c.bf16 %v3317_v31, %v3317_v31  ;;  %v1887_v10 = vpop.f32.mrb[31].mxu0  ;;  %v1927_v62 = vpop.f32.mrb[30].mxu1  ;;  %v3325_v55 = vpack.c.bf16 %v3314_v21, %v3314_v21  ;;  %v3327_v32 = vpack.c.bf16 %v3316_v5, %v3316_v5  ;;  %v5278_v5 = vld [vmem:[%s7014_s6 + $0x2c] sm:$0xf] }
 0x4ab   : > { %v5511_v2 = vpop.permute.xlu1 %5510  ;;  %v1928_v42 = vpop.f32.mrb[31].mxu1  ;;  %v5517_v48 = vunpack.i.l.bf16 %v5516_v44  ;;  %v3319_v9 = vsel %vm7076_vm10, %v3306_v45, %v3307_v60  ;;  %v3321_v52 = vsel %vm1126_vm15, %v3308_v19, %v3313_v29  ;;  %v3441_v43 = vsel %vm1148_vm12, %v3433_v49, 0 }
 0x4ac   : > { %5274 = vmatprep.subr.msk.bf16.mxu0 %vm1148_vm12, %v3326_v13  ;;  %5276 = vmatprep.subr.msk.bf16.mxu1 %vm1148_vm12, %v3328_v28  ;;  %v3333_v47 = vsel %vm1148_vm12, %v3325_v55, 0  ;;  %v3339_v37 = vsel %vm1148_vm12, %v3327_v32, 0  ;;  %v5513_v3 = vunpack.i.h.bf16 %v5511_v2  ;;  %v5512_v30 = vunpack.i.l.bf16 %v5511_v2 }
 0x4ad   : > { %3345 = vmatpush1.bf16.msra.mxu0 %v3333_v47  ;;  %3386 = vmatpush1.bf16.msra.mxu1 %v3339_v37  ;;  %v6652_v18 = vsel %vm647_vm0, %v5517_v48, %v5518_v6  ;;  %v3447_v38 = vsel %vm1148_vm12, %v3435_v46, 0  ;;  %v3542_v31 = vpack.c.bf16 %v3319_v9, %v3319_v9  ;;  %v3544_v13 = vpack.c.bf16 %v3321_v52, %v3321_v52  ;;  %v5283_v47 = vld [vmem:[%s7014_s6 + $0x50] sm:$0xf] }
 0x4ae   : > { %5279 = vmatprep.subr.msk.bf16.mxu0 %vm1148_vm12, %v3434_v17  ;;  %5281 = vmatprep.subr.msk.bf16.mxu1 %vm1148_vm12, %v3436_v1  ;;  %v6658_v21 = vsel %vm647_vm0, %v5513_v3, %v5517_v48  ;;  %v3318_v40 = vsel %vm1123_vm7, %v3313_v29, %v3306_v45  ;;  %v3320_v10 = vsel %vm1125_vm6, %v3307_v60, %v3308_v19 }
 0x4af   : > { %v6646_v53 = vpop.f32.mrb[32].mxu0  ;;  %v6668_v62 = vsel %vm647_vm0, %v5518_v6, %v5512_v30  ;;  %v6671_v17 = vsel %vm647_vm0, %v5512_v30, %v5513_v3  ;;  %v3432_v2 = vpack.c.bf16 %v5278_v5, %v5278_v5  ;;  %v3541_v45 = vpack.c.bf16 %v3318_v40, %v3318_v40 }
 0x4b0   : > { %v1992_v41 = vpop.f32.mrb[33].mxu0  ;;  %v2031_v51 = vpop.f32.mrb[32].mxu1  ;;  %5275 = vmatmul.mubr.msk.bf16.vlgmr.msra.gmra.mrb[76].mxu0 %vm1144_vm13, %v3324_v0  ;;  %5277 = vmatmul.mubr.msk.bf16.vlgmr.msra.gmra.mrb[76].mxu1 %vm1144_vm13, %v3324_v0  ;;  %v3543_v29 = vpack.c.bf16 %v3320_v10, %v3320_v10  ;;  %v3664_v60 = vsel %vm1084_vm4, %v6652_v18, %v6658_v21  ;;  %v3666_v19 = vsel %vm1086_vm5, %v6671_v17, %v6668_v62 }
 0x4b1   : > { %v1994_v56 = vpop.f32.mrb[34].mxu0  ;;  %v2033_v54 = vpop.f32.mrb[33].mxu1  ;;  %3453 = vmatpush1.bf16.msra.mxu0 %v3441_v43  ;;  %3494 = vmatpush1.bf16.msra.mxu1 %v3447_v38  ;;  %v3675_v1 = vpack.c.bf16 %v3664_v60, %v3664_v60  ;;  %v3549_v46 = vsel %vm1148_vm12, %v3541_v45, 0  ;;  %v3677_v48 = vpack.c.bf16 %v3666_v19, %v3666_v19  ;;  %v3663_v37 = vsel %vm1083_vm1, %v6658_v21, %v6671_v17 }
 0x4b2   : > { %v1995_v28 = vpop.f32.mrb[35].mxu0  ;;  %v2035_v61 = vpop.f32.mrb[34].mxu1  ;;  %5284 = vmatprep.subr.msk.bf16.mxu0 %vm1148_vm12, %v3542_v31  ;;  %5286 = vmatprep.subr.msk.bf16.mxu1 %vm1148_vm12, %v3544_v13  ;;  %v3555_v6 = vsel %vm1148_vm12, %v3543_v29, 0  ;;  %v3665_v52 = vsel %vm7077_vm11, %v6668_v62, %v6652_v18  ;;  %v1930_v30 = vadd.f32 %v6611_v16, %v6599_v33  ;;  %v1931_v56 = vadd.f32 %v6617_v39, %v6601_v27 }
 0x4b3   : > { %v2036_v44 = vpop.f32.mrb[35].mxu1  ;;  %3484 = vmatprep.mubr.bf16.mxu0 %v7048_v11  ;;  %3525 = vmatprep.mubr.bf16.mxu1 %v7048_v11  ;;  %v1932_v38 = vadd.f32 %v6619_v14, %v6603_v36  ;;  %v1933_v31 = vadd.f32 %v6628_v20, %v6605_v59  ;;  %v3540_v13 = vpack.c.bf16 %v5283_v47, %v5283_v47 }
 0x4b4   : > { %v3674_v33 = vpack.c.bf16 %v3663_v37, %v3663_v37  ;;  %v2038_v16 = vadd.f32 %v6646_v53, %v1930_v30  ;;  %v3676_v28 = vpack.c.bf16 %v3665_v52, %v3665_v52  ;;  %v2039_v61 = vadd.f32 %v1992_v41, %v1931_v56  ;;  %v5288_v41 = vld [vmem:[%s7014_s6 + $0x14] sm:$0xf] }
 0x4b5   : > { %v2040_v5 = vadd.f32 %v2031_v51, %v1932_v38  ;;  %v2041_v40 = vadd.f32 %v2033_v54, %v1933_v31  ;;  %v3783_v20 = vpack.c.bf16 %v5816_v22, %v5816_v22  ;;  %v3785_v53 = vpack.c.bf16 %v5830_v35, %v5830_v35  ;;  %v5526_v51 = vpop.permute.xlu0 %5525  ;;  %v5521_v54 = vpop.permute.xlu1 %5520 }
 0x4b6   : > { %v3682_v59 = vsel %vm1148_vm12, %v3674_v33, 0  ;;  %v3688_v14 = vsel %vm1148_vm12, %v3676_v28, 0  ;;  %v3673_v22 = vpack.c.bf16 %v5288_v41, %v5288_v41  ;;  %v3782_v35 = vpack.c.bf16 %v5820_v25, %v5820_v25 }
 0x4b7   : > { %v2098_v55 = vpop.f32.mrb[36].mxu0  ;;  %v3784_v44 = vpack.c.bf16 %v5818_v23, %v5818_v23  ;;  %v5527_v45 = vunpack.i.l.bf16 %v5526_v51  ;;  %v3668_v29 = vsel %vm7078_vm14, %v6658_v21, %v6652_v18  ;;  %v3670_v60 = vsel %vm1126_vm15, %v6668_v62, %v6671_v17 }
 0x4b8   : > { %v2100_v32 = vpop.f32.mrb[37].mxu0  ;;  %v2139_v42 = vpop.f32.mrb[36].mxu1  ;;  %5280 = vmatmul.mubr.msk.bf16.vlgmr.msra.gmra.mrb[80].mxu0 %vm1144_vm13, %v3432_v2  ;;  %5282 = vmatmul.mubr.msk.bf16.vlgmr.msra.gmra.mrb[80].mxu1 %vm1144_vm13, %v3432_v2  ;;  %v6713_v10 = vadd.f32 %v2098_v55, %v2038_v16  ;;  %v5528_v2 = vunpack.i.h.bf16 %v5526_v51  ;;  %v5523_v19 = vunpack.i.h.bf16 %v5521_v54  ;;  %v5522_v55 = vunpack.i.l.bf16 %v5521_v54  ;;  %v5303_v16 = vld [vmem:[%s7014_s6 + $0x20] sm:$0xf]  ;;  %v5313_v51 = vld [vmem:[%s7014_s6 + $0x68] sm:$0xf] }
 0x4b9   : > { %v2102_v0 = vpop.f32.mrb[38].mxu0  ;;  %v2141_v49 = vpop.f32.mrb[37].mxu1  ;;  %3561 = vmatpush1.bf16.msra.mxu0 %v3549_v46  ;;  %3602 = vmatpush1.bf16.msra.mxu1 %v3555_v6  ;;  %v6715_v27 = vadd.f32 %v2100_v32, %v2039_v61  ;;  %v6717_v36 = vadd.f32 %v2139_v42, %v2040_v5  ;;  %v3790_v23 = vsel %vm1148_vm12, %v3782_v35, 0  ;;  %v3796_v25 = vsel %vm1148_vm12, %v3784_v44, 0 }
 0x4ba   : > { %v2103_v3 = vpop.f32.mrb[39].mxu0  ;;  %v2143_v9 = vpop.f32.mrb[38].mxu1  ;;  %5289 = vmatprep.subr.msk.bf16.mxu0 %vm1148_vm12, %v3675_v1  ;;  %5291 = vmatprep.subr.msk.bf16.mxu1 %vm1148_vm12, %v3677_v48  ;;  %v6719_v39 = vadd.f32 %v2141_v49, %v2041_v40  ;;  %v3891_v32 = vpack.c.bf16 %v3668_v29, %v3668_v29  ;;  %v3893_v42 = vpack.c.bf16 %v3670_v60, %v3670_v60  ;;  %v5293_v0 = vld [vmem:[%s7014_s6 + $0x38] sm:$0xf]  ;;  %v4143_v40 = vsel %vm1148_vm12, %v4135_v57, 0 }
 0x4bb   : > { %v2144_v43 = vpop.f32.mrb[39].mxu1  ;;  %3592 = vmatprep.mubr.bf16.mxu0 %v7048_v11  ;;  %3633 = vmatprep.mubr.bf16.mxu1 %v7048_v11  ;;  %v6753_v1 = vsel %vm647_vm0, %v5527_v45, %v5528_v2  ;;  %v3667_v49 = vsel %vm1123_vm7, %v6671_v17, %v6658_v21  ;;  %v3669_v46 = vsel %vm1125_vm6, %v6652_v18, %v6668_v62 }
 0x4bc   : > { %v4008_v6 = vsel %vm647_vm0, %v5523_v19, %v5527_v45  ;;  %v4010_v48 = vsel %vm647_vm0, %v5528_v2, %v5522_v55  ;;  %v4015_v47 = vsel %vm647_vm0, %v5522_v55, %v5523_v19  ;;  %v3781_v21 = vpack.c.bf16 %v5293_v0, %v5293_v0  ;;  %vm7079_vm0 = vmmov %vm7075_vm3 }
 0x4bd   : > { %v3890_v17 = vpack.c.bf16 %v3667_v49, %v3667_v49  ;;  %v3892_v37 = vpack.c.bf16 %v3669_v46, %v3669_v46  ;;  %v4017_v18 = vsel %vm1084_vm4, %v6753_v1, %v4008_v6  ;;  %v4019_v62 = vsel %vm1086_vm5, %v4015_v47, %v4010_v48 }
 0x4be   : > { %v4028_v52 = vpack.c.bf16 %v4017_v18, %v4017_v18  ;;  %v4030_v30 = vpack.c.bf16 %v4019_v62, %v4019_v62  ;;  %v4016_v26 = vsel %vm1083_vm1, %v4008_v6, %v4015_v47  ;;  %v4018_v43 = vsel %vm7079_vm0, %v4010_v48, %v6753_v1  ;;  %vm7080_vm1 = vmmov %vm7074_vm2 }
 0x4bf   : > { %v3898_v3 = vsel %vm1148_vm12, %v3890_v17, 0  ;;  %v3904_v9 = vsel %vm1148_vm12, %v3892_v37, 0  ;;  %v3889_v56 = vpack.c.bf16 %v5298_v12, %v5298_v12  ;;  %v4027_v38 = vpack.c.bf16 %v4016_v26, %v4016_v26 }
 0x4c0   : > { %5285 = vmatmul.mubr.msk.bf16.vlgmr.msra.gmra.mrb[84].mxu0 %vm1144_vm13, %v3540_v13  ;;  %5287 = vmatmul.mubr.msk.bf16.vlgmr.msra.gmra.mrb[84].mxu1 %vm1144_vm13, %v3540_v13  ;;  %v4029_v31 = vpack.c.bf16 %v4018_v43, %v4018_v43  ;;  %v4136_v13 = vpack.c.bf16 %v6427_v34, %v6427_v34  ;;  %v4026_v34 = vpack.c.bf16 %v5303_v16, %v5303_v16 }
 0x4c1   : > { %3694 = vmatpush1.bf16.msra.mxu0 %v3682_v59  ;;  %3735 = vmatpush1.bf16.msra.mxu1 %v3688_v14  ;;  %v4035_v50 = vsel %vm1148_vm12, %v4027_v38, 0  ;;  %v4137_v28 = vpack.c.bf16 %v6432_v15, %v6432_v15  ;;  %v4021_v61 = vsel %vm7080_vm1, %v4008_v6, %v6753_v1  ;;  %v4023_v5 = vsel %vm1126_vm15, %v4010_v48, %v4015_v47 }
 0x4c2   : > { %5294 = vmatprep.subr.msk.bf16.mxu0 %vm1148_vm12, %v3783_v20  ;;  %5296 = vmatprep.subr.msk.bf16.mxu1 %vm1148_vm12, %v3785_v53  ;;  %v4041_v33 = vsel %vm1148_vm12, %v4029_v31, 0  ;;  %v4244_v14 = vpack.c.bf16 %v4021_v61, %v4021_v61  ;;  %v4246_v63 = vpack.c.bf16 %v4023_v5, %v4023_v5  ;;  %v4020_v4 = vsel %vm1123_vm7, %v4015_v47, %v4008_v6 }
 0x4c3   : > { %3725 = vmatprep.mubr.bf16.mxu0 %v7048_v11  ;;  %3766 = vmatprep.mubr.bf16.mxu1 %v7048_v11  ;;  %v4149_v59 = vsel %vm1148_vm12, %v4137_v28, 0  ;;  %v4022_v15 = vsel %vm1125_vm6, %v6753_v1, %v4010_v48  ;;  %v4134_v20 = vpack.c.bf16 %v5308_v58, %v5308_v58  ;;  %v4243_v53 = vpack.c.bf16 %v4020_v4, %v4020_v4 }
 0x4c4   : > { %v4245_v41 = vpack.c.bf16 %v4022_v15, %v4022_v15  ;;  %v4242_v54 = vpack.c.bf16 %v5313_v51, %v5313_v51  ;;  %vm7081_vm6 = vcmask 1043456  }
 0x4c5   : > { %v4251_v7 = vsel %vm1148_vm12, %v4243_v53, 0  ;;  %vm7082_vm7 = vmmov %vm7081_vm6 }
 0x4c6   : > { %v4257_v8 = vsel %vm1148_vm12, %v4245_v41, 0  ;;  %vm7083_vm15 = vmmov %vm7081_vm6 }
 0x4c7   : > { %vm7084_vm4 = vmmov %vm7081_vm6 }
 0x4c8   : > { %5290 = vmatmul.mubr.msk.bf16.vlgmr.msra.gmra.mrb[88].mxu0 %vm1144_vm13, %v3673_v22  ;;  %5292 = vmatmul.mubr.msk.bf16.vlgmr.msra.gmra.mrb[88].mxu1 %vm1144_vm13, %v3673_v22  ;;  %vm7085_vm5 = vmmov %vm7084_vm4 }
 0x4c9   : > { %3802 = vmatpush1.bf16.msra.mxu0 %v3790_v23  ;;  %3843 = vmatpush1.bf16.msra.mxu1 %v3796_v25  ;;  %vm7086_vm8 = vmmov %vm7084_vm4 }
 0x4ca   : > { %5299 = vmatprep.subr.msk.bf16.mxu0 %vm1148_vm12, %v3891_v32  ;;  %5301 = vmatprep.subr.msk.bf16.mxu1 %vm1148_vm12, %v3893_v42  ;;  %vm7087_vm9 = vmmov %vm7084_vm4 }
 0x4cb   : > { %3833 = vmatprep.mubr.bf16.mxu0 %v7048_v11  ;;  %3874 = vmatprep.mubr.bf16.mxu1 %v7048_v11  ;;  %vm7088_vm2 = vmmov %vm7084_vm4 }
 0x4d0   : > { %5295 = vmatmul.mubr.msk.bf16.vlgmr.msra.gmra.mrb[92].mxu0 %vm1144_vm13, %v3781_v21  ;;  %5297 = vmatmul.mubr.msk.bf16.vlgmr.msra.gmra.mrb[92].mxu1 %vm1144_vm13, %v3781_v21 }
 0x4d1   : > { %3910 = vmatpush1.bf16.msra.mxu0 %v3898_v3  ;;  %3951 = vmatpush1.bf16.msra.mxu1 %v3904_v9 }
 0x4d2   : > { %5304 = vmatprep.subr.msk.bf16.mxu0 %vm1148_vm12, %v4028_v52  ;;  %5306 = vmatprep.subr.msk.bf16.mxu1 %vm1148_vm12, %v4030_v30 }
 0x4d3   : > { %3941 = vmatprep.mubr.bf16.mxu0 %v7048_v11  ;;  %3982 = vmatprep.mubr.bf16.mxu1 %v7048_v11 }
 0x4d8   : > { %5300 = vmatmul.mubr.msk.bf16.vlgmr.msra.gmra.mrb[96].mxu0 %vm1144_vm13, %v3889_v56  ;;  %5302 = vmatmul.mubr.msk.bf16.vlgmr.msra.gmra.mrb[96].mxu1 %vm1144_vm13, %v3889_v56 }
 0x4d9   : > { %4047 = vmatpush1.bf16.msra.mxu0 %v4035_v50  ;;  %4088 = vmatpush1.bf16.msra.mxu1 %v4041_v33 }
 0x4da   : > { %5309 = vmatprep.subr.msk.bf16.mxu0 %vm1148_vm12, %v4136_v13  ;;  %5311 = vmatprep.subr.msk.bf16.mxu1 %vm1148_vm12, %v4138_v24 }
 0x4db   : > { %4078 = vmatprep.mubr.bf16.mxu0 %v7048_v11  ;;  %4119 = vmatprep.mubr.bf16.mxu1 %v7048_v11 }
 0x4e0   : > { %5305 = vmatmul.mubr.msk.bf16.vlgmr.msra.gmra.mrb[100].mxu0 %vm1144_vm13, %v4026_v34  ;;  %5307 = vmatmul.mubr.msk.bf16.vlgmr.msra.gmra.mrb[100].mxu1 %vm1144_vm13, %v4026_v34 }
 0x4e1   : > { %4155 = vmatpush1.bf16.msra.mxu0 %v4143_v40  ;;  %4196 = vmatpush1.bf16.msra.mxu1 %v4149_v59 }
 0x4e2   : > { %5314 = vmatprep.subr.msk.bf16.mxu0 %vm1148_vm12, %v4244_v14  ;;  %5316 = vmatprep.subr.msk.bf16.mxu1 %vm1148_vm12, %v4246_v63 }
 0x4e3   : > { %4186 = vmatprep.mubr.bf16.mxu0 %v7048_v11  ;;  %4227 = vmatprep.mubr.bf16.mxu1 %v7048_v11 }
 0x4e8   : > { %5310 = vmatmul.mubr.msk.bf16.vlgmr.msra.gmra.mrb[104].mxu0 %vm1144_vm13, %v4134_v20  ;;  %5312 = vmatmul.mubr.msk.bf16.vlgmr.msra.gmra.mrb[104].mxu1 %vm1144_vm13, %v4134_v20 }
 0x4e9   : > { %4263 = vmatpush1.bf16.msra.mxu0 %v4251_v7  ;;  %4304 = vmatpush1.bf16.msra.mxu1 %v4257_v8 }
 0x4ea   : > { %4294 = vmatprep.mubr.bf16.mxu0 %v7048_v11  ;;  %4335 = vmatprep.mubr.bf16.mxu1 %v7048_v11 }
 0x4f0   : > { %5315 = vmatmul.mubr.msk.bf16.vlgmr.msra.gmra.mrb[108].mxu0 %vm1144_vm13, %v4242_v54  ;;  %5317 = vmatmul.mubr.msk.bf16.vlgmr.msra.gmra.mrb[108].mxu1 %vm1144_vm13, %v4242_v54 }
 0x4f1   : > { %4472 = vmatprep.mubr.bf16.mxu0 %v7048_v11  ;;  %4515 = vmatprep.mubr.bf16.mxu1 %v7048_v11 }
 0x501   : > { %v2277_v22 = vpop.f32.mrb[40].mxu0  ;;  %v2318_v35 = vpop.f32.mrb[40].mxu1 }
 0x502   : > { %v2325_v44 = vadd.f32 %v2277_v22, %v6713_v10  ;;  %v2279_v2 = vpop.f32.mrb[41].mxu0  ;;  %v2327_v45 = vadd.f32 %v2318_v35, %v6717_v36  ;;  %v2320_v29 = vpop.f32.mrb[41].mxu1 }
 0x503   : > { %v2326_v60 = vadd.f32 %v2279_v2, %v6715_v27  ;;  %v2328_v19 = vadd.f32 %v2320_v29, %v6719_v39  ;;  %v2281_v55 = vpop.f32.mrb[42].mxu0  ;;  %v2322_v23 = vpop.f32.mrb[42].mxu1 }
 0x504   : > { %v2282_v25 = vpop.f32.mrb[43].mxu0  ;;  %v2323_v32 = vpop.f32.mrb[43].mxu1 }
 0x509   : > { %v2385_v42 = vpop.f32.mrb[44].mxu0  ;;  %v2426_v0 = vpop.f32.mrb[44].mxu1 }
 0x50a   : > { %v2433_v1 = vadd.f32 %v2385_v42, %v2325_v44  ;;  %v2387_v49 = vpop.f32.mrb[45].mxu0  ;;  %v2435_v46 = vadd.f32 %v2426_v0, %v2327_v45  ;;  %v2428_v48 = vpop.f32.mrb[45].mxu1 }
 0x50b   : > { %v2434_v6 = vadd.f32 %v2387_v49, %v2326_v60  ;;  %v2389_v10 = vpop.f32.mrb[46].mxu0  ;;  %v2436_v47 = vadd.f32 %v2428_v48, %v2328_v19  ;;  %v2430_v21 = vpop.f32.mrb[46].mxu1 }
 0x50c   : > { %v2390_v36 = vpop.f32.mrb[47].mxu0  ;;  %v2431_v17 = vpop.f32.mrb[47].mxu1 }
 0x511   : > { %v2493_v37 = vpop.f32.mrb[48].mxu0  ;;  %v2534_v18 = vpop.f32.mrb[48].mxu1 }
 0x512   : > { %v2541_v27 = vadd.f32 %v2493_v37, %v2433_v1  ;;  %v2495_v39 = vpop.f32.mrb[49].mxu0  ;;  %v2543_v62 = vadd.f32 %v2534_v18, %v2435_v46  ;;  %v2536_v9 = vpop.f32.mrb[49].mxu1 }
 0x513   : > { %v2542_v3 = vadd.f32 %v2495_v39, %v2434_v6  ;;  %v2497_v52 = vpop.f32.mrb[50].mxu0  ;;  %v2544_v30 = vadd.f32 %v2536_v9, %v2436_v47  ;;  %v2538_v12 = vpop.f32.mrb[50].mxu1 }
 0x514   : > { %v2498_v26 = vpop.f32.mrb[51].mxu0  ;;  %v2539_v43 = vpop.f32.mrb[51].mxu1 }
 0x519   : > { %v2626_v56 = vpop.f32.mrb[52].mxu0  ;;  %v2667_v31 = vpop.f32.mrb[52].mxu1 }
 0x51a   : > { %v2674_v38 = vadd.f32 %v2626_v56, %v2541_v27  ;;  %v2628_v13 = vpop.f32.mrb[53].mxu0  ;;  %v2676_v24 = vadd.f32 %v2667_v31, %v2543_v62  ;;  %v2669_v33 = vpop.f32.mrb[53].mxu1 }
 0x51b   : > { %v2675_v50 = vadd.f32 %v2628_v13, %v2542_v3  ;;  %v2630_v16 = vpop.f32.mrb[54].mxu0  ;;  %v2677_v34 = vadd.f32 %v2669_v33, %v2544_v30  ;;  %v2671_v57 = vpop.f32.mrb[54].mxu1 }
 0x51c   : > { %v2631_v28 = vpop.f32.mrb[55].mxu0  ;;  %v2672_v61 = vpop.f32.mrb[55].mxu1 }
 0x521   : > { %v2734_v5 = vpop.f32.mrb[56].mxu0  ;;  %v2775_v59 = vpop.f32.mrb[56].mxu1 }
 0x522   : > { %v2782_v40 = vadd.f32 %v2734_v5, %v2674_v38  ;;  %v2736_v14 = vpop.f32.mrb[57].mxu0  ;;  %v2784_v63 = vadd.f32 %v2775_v59, %v2676_v24  ;;  %v2777_v4 = vpop.f32.mrb[57].mxu1 }
 0x523   : > { %v2783_v58 = vadd.f32 %v2736_v14, %v2675_v50  ;;  %v2738_v15 = vpop.f32.mrb[58].mxu0  ;;  %v2785_v20 = vadd.f32 %v2777_v4, %v2677_v34  ;;  %v2779_v53 = vpop.f32.mrb[58].mxu1 }
 0x524   : > { %v2739_v41 = vpop.f32.mrb[59].mxu0  ;;  %v2780_v7 = vpop.f32.mrb[59].mxu1 }
 0x529   : > { %v2842_v8 = vpop.f32.mrb[60].mxu0  ;;  %v2883_v54 = vpop.f32.mrb[60].mxu1 }
 0x52a   : > { %v2890_v51 = vadd.f32 %v2842_v8, %v2782_v40  ;;  %v2844_v22 = vpop.f32.mrb[61].mxu0  ;;  %v2892_v35 = vadd.f32 %v2883_v54, %v2784_v63  ;;  %v2885_v2 = vpop.f32.mrb[61].mxu1 }
 0x52b   : > { %v2891_v44 = vadd.f32 %v2844_v22, %v2783_v58  ;;  %v2846_v45 = vpop.f32.mrb[62].mxu0  ;;  %v2893_v29 = vadd.f32 %v2885_v2, %v2785_v20  ;;  %v2887_v60 = vpop.f32.mrb[62].mxu1 }
 0x52c   : > { %v2847_v19 = vpop.f32.mrb[63].mxu0  ;;  %v2888_v55 = vpop.f32.mrb[63].mxu1 }
 0x531   : > { %v2979_v23 = vpop.f32.mrb[64].mxu0  ;;  %v3020_v32 = vpop.f32.mrb[64].mxu1 }
 0x532   : > { %v3027_v25 = vadd.f32 %v2979_v23, %v2890_v51  ;;  %v2981_v42 = vpop.f32.mrb[65].mxu0  ;;  %v3029_v1 = vadd.f32 %v3020_v32, %v2892_v35  ;;  %v3022_v49 = vpop.f32.mrb[65].mxu1 }
 0x533   : > { %v3028_v0 = vadd.f32 %v2981_v42, %v2891_v44  ;;  %v2983_v46 = vpop.f32.mrb[66].mxu0  ;;  %v3030_v6 = vadd.f32 %v3022_v49, %v2893_v29  ;;  %v3024_v48 = vpop.f32.mrb[66].mxu1 }
 0x534   : > { %v2984_v10 = vpop.f32.mrb[67].mxu0  ;;  %v3025_v47 = vpop.f32.mrb[67].mxu1 }
 0x539   : > { %v3087_v21 = vpop.f32.mrb[68].mxu0  ;;  %v3128_v17 = vpop.f32.mrb[68].mxu1 }
 0x53a   : > { %v3135_v36 = vadd.f32 %v3087_v21, %v3027_v25  ;;  %v3089_v37 = vpop.f32.mrb[69].mxu0  ;;  %v3137_v27 = vadd.f32 %v3128_v17, %v3029_v1  ;;  %v3130_v39 = vpop.f32.mrb[69].mxu1 }
 0x53b   : > { %v3136_v18 = vadd.f32 %v3089_v37, %v3028_v0  ;;  %v3091_v62 = vpop.f32.mrb[70].mxu0  ;;  %v3138_v3 = vadd.f32 %v3130_v39, %v3030_v6  ;;  %v3132_v9 = vpop.f32.mrb[70].mxu1 }
 0x53c   : > { %v3092_v52 = vpop.f32.mrb[71].mxu0  ;;  %v3133_v30 = vpop.f32.mrb[71].mxu1 }
 0x541   : > { %v3195_v12 = vpop.f32.mrb[72].mxu0  ;;  %v3236_v43 = vpop.f32.mrb[72].mxu1 }
 0x542   : > { %v3243_v26 = vadd.f32 %v3195_v12, %v3135_v36  ;;  %v3197_v56 = vpop.f32.mrb[73].mxu0  ;;  %v3245_v38 = vadd.f32 %v3236_v43, %v3137_v27  ;;  %v3238_v13 = vpop.f32.mrb[73].mxu1 }
 0x543   : > { %v3244_v31 = vadd.f32 %v3197_v56, %v3136_v18  ;;  %v3199_v24 = vpop.f32.mrb[74].mxu0  ;;  %v3246_v50 = vadd.f32 %v3238_v13, %v3138_v3  ;;  %v3240_v16 = vpop.f32.mrb[74].mxu1 }
 0x544   : > { %v3200_v33 = vpop.f32.mrb[75].mxu0  ;;  %v3241_v34 = vpop.f32.mrb[75].mxu1 }
 0x583   : > { %v3378_v57 = vpop.f32.mrb[76].mxu0  ;;  %v3419_v28 = vpop.f32.mrb[76].mxu1 }
 0x584   : > { %v3426_v61 = vadd.f32 %v3378_v57, %v3243_v26  ;;  %v3428_v5 = vadd.f32 %v3419_v28, %v3245_v38  ;;  %v3380_v40 = vpop.f32.mrb[77].mxu0  ;;  %v3421_v59 = vpop.f32.mrb[77].mxu1 }
 0x585   : > { %v3427_v14 = vadd.f32 %v3380_v40, %v3244_v31  ;;  %v3429_v63 = vadd.f32 %v3421_v59, %v3246_v50  ;;  %v3382_v58 = vpop.f32.mrb[78].mxu0  ;;  %v3423_v4 = vpop.f32.mrb[78].mxu1 }
 0x586   : > { %v3383_v15 = vpop.f32.mrb[79].mxu0  ;;  %v3424_v20 = vpop.f32.mrb[79].mxu1 }
 0x58b   : > { %v3486_v53 = vpop.f32.mrb[80].mxu0  ;;  %v3527_v41 = vpop.f32.mrb[80].mxu1 }
 0x58c   : > { %v3534_v7 = vadd.f32 %v3486_v53, %v3426_v61  ;;  %v3536_v8 = vadd.f32 %v3527_v41, %v3428_v5  ;;  %v3488_v51 = vpop.f32.mrb[81].mxu0  ;;  %v3529_v54 = vpop.f32.mrb[81].mxu1 }
 0x58d   : > { %v3535_v22 = vadd.f32 %v3488_v51, %v3427_v14  ;;  %v3537_v35 = vadd.f32 %v3529_v54, %v3429_v63  ;;  %v3490_v44 = vpop.f32.mrb[82].mxu0  ;;  %v3531_v2 = vpop.f32.mrb[82].mxu1 }
 0x58e   : > { %v3491_v45 = vpop.f32.mrb[83].mxu0  ;;  %v3532_v29 = vpop.f32.mrb[83].mxu1 }
 0x593   : > { %v3594_v60 = vpop.f32.mrb[84].mxu0  ;;  %v3635_v19 = vpop.f32.mrb[84].mxu1 }
 0x594   : > { %v3642_v55 = vadd.f32 %v3594_v60, %v3534_v7  ;;  %v3644_v23 = vadd.f32 %v3635_v19, %v3536_v8  ;;  %v3596_v25 = vpop.f32.mrb[85].mxu0  ;;  %v3637_v32 = vpop.f32.mrb[85].mxu1 }
 0x595   : > { %v3643_v42 = vadd.f32 %v3596_v25, %v3535_v22  ;;  %v3645_v1 = vadd.f32 %v3637_v32, %v3537_v35  ;;  %v3598_v0 = vpop.f32.mrb[86].mxu0  ;;  %v3639_v49 = vpop.f32.mrb[86].mxu1 }
 0x596   : > { %v3599_v46 = vpop.f32.mrb[87].mxu0  ;;  %v3640_v6 = vpop.f32.mrb[87].mxu1 }
 0x597   : > { %v4352_v49 = vpop.permute.xlu1 %4351 }
 0x59b   : > { %v3727_v48 = vpop.f32.mrb[88].mxu0  ;;  %v3768_v10 = vpop.f32.mrb[88].mxu1 }
 0x59c   : > { %v3775_v47 = vadd.f32 %v3727_v48, %v3642_v55  ;;  %v3777_v21 = vadd.f32 %v3768_v10, %v3644_v23  ;;  %v3729_v36 = vpop.f32.mrb[89].mxu0  ;;  %v3770_v17 = vpop.f32.mrb[89].mxu1 }
 0x59d   : > { %v3776_v37 = vadd.f32 %v3729_v36, %v3643_v42  ;;  %v3778_v27 = vadd.f32 %v3770_v17, %v3645_v1  ;;  %v3731_v18 = vpop.f32.mrb[90].mxu0  ;;  %v3772_v39 = vpop.f32.mrb[90].mxu1 }
 0x59e   : > { %v3732_v62 = vpop.f32.mrb[91].mxu0  ;;  %v3773_v3 = vpop.f32.mrb[91].mxu1 }
 0x5a3   : > { %v3835_v9 = vpop.f32.mrb[92].mxu0  ;;  %v3876_v52 = vpop.f32.mrb[92].mxu1 }
 0x5a4   : > { %v3883_v30 = vadd.f32 %v3835_v9, %v3775_v47  ;;  %v3885_v12 = vadd.f32 %v3876_v52, %v3777_v21  ;;  %v3837_v26 = vpop.f32.mrb[93].mxu0  ;;  %v3878_v43 = vpop.f32.mrb[93].mxu1 }
 0x5a5   : > { %v3884_v56 = vadd.f32 %v3837_v26, %v3776_v37  ;;  %v3886_v38 = vadd.f32 %v3878_v43, %v3778_v27  ;;  %v3839_v31 = vpop.f32.mrb[94].mxu0  ;;  %v3880_v13 = vpop.f32.mrb[94].mxu1 }
 0x5a6   : > { %v3840_v24 = vpop.f32.mrb[95].mxu0  ;;  %v3881_v50 = vpop.f32.mrb[95].mxu1 }
 0x5ab   : > { %v3943_v33 = vpop.f32.mrb[96].mxu0  ;;  %v3984_v16 = vpop.f32.mrb[96].mxu1 }
 0x5ac   : > { %v3991_v34 = vadd.f32 %v3943_v33, %v3883_v30  ;;  %v3993_v57 = vadd.f32 %v3984_v16, %v3885_v12  ;;  %v3945_v28 = vpop.f32.mrb[97].mxu0  ;;  %v3986_v61 = vpop.f32.mrb[97].mxu1 }
 0x5ad   : > { %v3992_v5 = vadd.f32 %v3945_v28, %v3884_v56  ;;  %v3994_v40 = vadd.f32 %v3986_v61, %v3886_v38  ;;  %v3947_v59 = vpop.f32.mrb[98].mxu0  ;;  %v3988_v14 = vpop.f32.mrb[98].mxu1 }
 0x5ae   : > { %v3948_v63 = vpop.f32.mrb[99].mxu0  ;;  %v3989_v58 = vpop.f32.mrb[99].mxu1  ;;  %v4414_v59 = vld [vmem:[%s7017_s9 + $0x8] sm:$0xff]  ;;  %v4413_v14 = vld [vmem:[%s7017_s9] sm:$0xff] }
 0x5b3   : > { %v4080_v4 = vpop.f32.mrb[100].mxu0  ;;  %v4121_v15 = vpop.f32.mrb[100].mxu1 }
 0x5b4   : > { %v4128_v20 = vadd.f32 %v4080_v4, %v3991_v34  ;;  %v4130_v53 = vadd.f32 %v4121_v15, %v3993_v57  ;;  %v4082_v41 = vpop.f32.mrb[101].mxu0  ;;  %v4123_v7 = vpop.f32.mrb[101].mxu1 }
 0x5b5   : > { %v4129_v8 = vadd.f32 %v4082_v41, %v3992_v5  ;;  %v4131_v51 = vadd.f32 %v4123_v7, %v3994_v40  ;;  %v4084_v54 = vpop.f32.mrb[102].mxu0  ;;  %v4125_v22 = vpop.f32.mrb[102].mxu1 }
 0x5b6   : > { %v4085_v35 = vpop.f32.mrb[103].mxu0  ;;  %v4126_v44 = vpop.f32.mrb[103].mxu1 }
 0x5bb   : > { %v4188_v2 = vpop.f32.mrb[104].mxu0  ;;  %v4229_v45 = vpop.f32.mrb[104].mxu1 }
 0x5bc   : > { %v4236_v29 = vadd.f32 %v4188_v2, %v4128_v20  ;;  %v4238_v60 = vadd.f32 %v4229_v45, %v4130_v53  ;;  %v4190_v19 = vpop.f32.mrb[105].mxu0  ;;  %v4231_v55 = vpop.f32.mrb[105].mxu1 }
 0x5bd   : > { %v4237_v23 = vadd.f32 %v4190_v19, %v4129_v8  ;;  %v4239_v25 = vadd.f32 %v4231_v55, %v4131_v51  ;;  %v4192_v32 = vpop.f32.mrb[106].mxu0  ;;  %v4233_v42 = vpop.f32.mrb[106].mxu1 }
 0x5be   : > { %v4193_v1 = vpop.f32.mrb[107].mxu0  ;;  %v4234_v0 = vpop.f32.mrb[107].mxu1 }
 0x5c3   : > { %v4296_v46 = vpop.f32.mrb[108].mxu0  ;;  %v4337_v6 = vpop.f32.mrb[108].mxu1 }
 0x5c4   : > { %v4344_v48 = vadd.f32 %v4296_v46, %v4236_v29  ;;  %v4346_v10 = vadd.f32 %v4337_v6, %v4238_v60  ;;  %v4298_v47 = vpop.f32.mrb[109].mxu0  ;;  %v4339_v21 = vpop.f32.mrb[109].mxu1  ;;  %v4407_v46 = vld [vmem:[%s7016_s8 + $0x8] sm:$0xff] }
 0x5c5   : > { %v4345_v36 = vadd.f32 %v4298_v47, %v4237_v23  ;;  %v4347_v17 = vadd.f32 %v4339_v21, %v4239_v25  ;;  %v4300_v37 = vpop.f32.mrb[110].mxu0  ;;  %v4341_v27 = vpop.f32.mrb[110].mxu1 }
 0x5c6   : > { %v4354_v18 = vadd.f32 %v4352_v49, %v4344_v48  ;;  %v4356_v39 = vadd.f32 %v4352_v49, %v4346_v10  ;;  %v4301_v62 = vpop.f32.mrb[111].mxu0  ;;  %v4342_v3 = vpop.f32.mrb[111].mxu1 }
 0x5c7   : > { %v4355_v9 = vadd.f32 %v4352_v49, %v4345_v36  ;;  %v4357_v52 = vadd.f32 %v4352_v49, %v4347_v17  ;;  %v4406_v49 = vld [vmem:[%s7016_s8] sm:$0xff] }
 0x5c8   : > { %v4368_v30 = vmul.f32 %v4354_v18, %v4354_v18  ;;  %v4358_v12 = vsel %vm7081_vm6, %v4354_v18, 0.0  ;;  %v4370_v56 = vmul.f32 %v4356_v39, %v4356_v39  ;;  %v4361_v13 = vsel %vm7084_vm4, %v4356_v39, 0.0 }
 0x5c9   : > { %v4369_v26 = vmul.f32 %v4355_v9, %v4355_v9  ;;  %v4359_v43 = vsel %vm7082_vm7, %v4355_v9, 0.0  ;;  %v4371_v24 = vmul.f32 %v4357_v52, %v4357_v52  ;;  %v4363_v34 = vsel %vm7086_vm8, %v4357_v52, 0.0 }
 0x5ca   : > { %v4360_v38 = vadd.f32 %v4359_v43, %v4358_v12  ;;  %v4372_v31 = vsel %vm7083_vm15, %v4368_v30, 0.0  ;;  %v4375_v57 = vsel %vm7087_vm9, %v4370_v56, 0.0  ;;  %v4408_v21 = vpack.c.bf16 %v4407_v46, %v4406_v49  ;;  %v6937_v46 = vld [vmem:[%s6934_s21 + $0x8] sm:$0xff] }
 0x5cb   : > { %v4373_v50 = vsel %vm7085_vm5, %v4369_v26, 0.0  ;;  %v4377_v5 = vsel %vm7088_vm2, %v4371_v24, 0.0  ;;  %vm4628_vm5 = vcmask 130048  }
 0x5cc   : > { %v4362_v33 = vadd.f32 %v4361_v13, %v4360_v38  ;;  %v4374_v16 = vadd.f32 %v4373_v50, %v4372_v31 }
 0x5ce   : > { %v4364_v28 = vadd.f32 %v4363_v34, %v4362_v33  ;;  %v4376_v61 = vadd.f32 %v4375_v57, %v4374_v16 }
 0x5d0   : > { %4365 = vadd.xlane.f32.xlu0 %v4364_v28  ;;  %v4378_v40 = vadd.f32 %v4377_v5, %v4376_v61 }
 0x5d2   : > { %4379 = vadd.xlane.f32.xlu1 %v4378_v40 }
 0x5e3   : > { %4422 = vperm.xlu1 %5358, %v4414_v59  }
 0x5e6   : > { %4417 = vperm.xlu0 %5357, %v4413_v14  }
 0x65d   : > { %v4366_v63 = vpop.xlane.xlu0 %4365 }
 0x65e   : > { %v4367_v58 = vmul.f32 0.001953125, %v4366_v63 }
 0x65f   : > { %v4380_v4 = vpop.xlane.xlu1 %4379 }
 0x660   : > { %v4381_v15 = vmul.f32 0.001953125, %v4380_v4  ;;  %v4382_v20 = vmul.f32 %v4367_v58, %v4367_v58  ;;  %v4385_v7 = vsub.f32 %v4355_v9, %v4367_v58  ;;  %v4387_v8 = vsub.f32 %v4357_v52, %v4367_v58 }
 0x661   : > { %v4384_v51 = vsub.f32 %v4354_v18, %v4367_v58  ;;  %v4386_v54 = vsub.f32 %v4356_v39, %v4367_v58 }
 0x662   : > { %v4383_v53 = vsub.f32 %v4381_v15, %v4382_v20 }
 0x663   : > { %v4423_v36 = vpop.permute.xlu1 %4422 }
 0x664   : > { %v4388_v41 = vadd.f32 1e-05, %v4383_v53 }
 0x665   : > { %v4418_v17 = vpop.permute.xlu0 %4417 }
 0x666   : > { %5531 = vrsqrt.f32 %v4388_v41 }
 0x670   : > { %v5532_v22 = vpop.eup %5531 }
 0x671   : > { %v4391_v35 = vmul.f32 %v5532_v22, %v4385_v7  ;;  %v4393_v44 = vmul.f32 %v5532_v22, %v4387_v8  ;;  %v4390_v2 = vmul.f32 %v5532_v22, %v4384_v51  ;;  %v4392_v45 = vmul.f32 %v5532_v22, %v4386_v54  ;;  %v4606_v8 = vld [vmem:[%s7018_s10] sm:$0xff]  ;;  %v4607_v51 = vld [vmem:[%s7018_s10 + $0x8] sm:$0xff] }
 0x672   : > { %v6920_v54 = vpack.c.bf16 %v4607_v51, %v4606_v8  ;;  %v4808_v22 = vld [vmem:[%s7019_s11 + $0x8] sm:$0xff]  ;;  %v4610_v8 = vld [vmem:[%s6934_s21 + $0x10] sm:$0xff] }
 0x673   : > { %vm4395_vm3 = vcmp.ge.f32.partialorder %v4391_v35, 0.0  ;;  %v4399_v29 = vmul.f32 0.2, %v4391_v35  ;;  %vm4397_vm10 = vcmp.ge.f32.partialorder %v4393_v44, 0.0  ;;  %v4401_v60 = vmul.f32 0.2, %v4393_v44 }
 0x674   : > { %vm4394_vm11 = vcmp.ge.f32.partialorder %v4390_v2, 0.0  ;;  %v4398_v19 = vmul.f32 0.2, %v4390_v2  ;;  %vm4396_vm14 = vcmp.ge.f32.partialorder %v4392_v45, 0.0  ;;  %v4400_v55 = vmul.f32 0.2, %v4392_v45 }
 0x675   : > { %v4403_v23 = vsel %vm4395_vm3, %v4391_v35, %v4399_v29  ;;  %v4405_v25 = vsel %vm4397_vm10, %v4393_v44, %v4401_v60  ;;  %v4807_v35 = vld [vmem:[%s7019_s11] sm:$0xff]  ;;  %v4614_v51 = vld [vmem:[%s6934_s21 + $0x30] sm:$0xff] }
 0x676   : > { %v4410_v32 = vpack.c.bf16 %v4403_v23, %v4403_v23  ;;  %v4412_v42 = vpack.c.bf16 %v4405_v25, %v4405_v25  ;;  %v4402_v1 = vsel %vm4394_vm11, %v4390_v2, %v4398_v19  ;;  %v4404_v0 = vsel %vm4396_vm14, %v4392_v45, %v4400_v55 }
 0x677   : > { %v4409_v6 = vpack.c.bf16 %v4402_v1, %v4402_v1  ;;  %v4411_v48 = vpack.c.bf16 %v4404_v0, %v4404_v0 }
 0x678   : > { %5318 = vmatprep.subr.msk.bf16.mxu0 %vm1148_vm12, %v4410_v32  ;;  %5320 = vmatprep.subr.msk.bf16.mxu1 %vm1148_vm12, %v4412_v42 }
 0x679   : > { %v4429_v10 = vsel %vm1148_vm12, %v4409_v6, 0  ;;  %v4435_v47 = vsel %vm1148_vm12, %v4411_v48, 0 }
 0x67a   : > { %4441 = vmatpush1.bf16.msra.mxu0 %v4429_v10  ;;  %4484 = vmatpush1.bf16.msra.mxu1 %v4435_v47 }
 0x67d   : > { %5319 = vmatmul.mubr.msk.bf16.vlgmr.msra.gmra.mrb[112].mxu0 %vm1144_vm13, %v4408_v21  ;;  %5321 = vmatmul.mubr.msk.bf16.vlgmr.msra.gmra.mrb[112].mxu1 %vm1144_vm13, %v4408_v21  ;;  %v4613_v21 = vld [vmem:[%s6934_s21 + $0x28] sm:$0xff] }
 0x67e   : > { %4664 = vmatprep.mubr.bf16.mxu0 %v7048_v11  ;;  %4707 = vmatprep.mubr.bf16.mxu1 %v7048_v11 }
 0x750   : > { %v4474_v37 = vpop.f32.mrb[112].mxu0  ;;  %v4517_v27 = vpop.f32.mrb[112].mxu1 }
 0x751   : > { %v6879_v18 = vadd.f32 %v4474_v37, %v4418_v17  ;;  %v6881_v39 = vadd.f32 %v4517_v27, %v4418_v17  ;;  %v4476_v62 = vpop.f32.mrb[113].mxu0  ;;  %v4519_v3 = vpop.f32.mrb[113].mxu1 }
 0x752   : > { %v6883_v9 = vadd.f32 %v4476_v62, %v4418_v17  ;;  %v4478_v52 = vpop.f32.mrb[114].mxu0  ;;  %v4521_v30 = vpop.f32.mrb[114].mxu1  ;;  %v4520_v50 = vadd.f32 %v4519_v3, %v4418_v17  ;;  %v4615_v17 = vld [vmem:[%s6934_s21 + $0x38] sm:$0xff] }
 0x753   : > { %v4538_v12 = vmul.f32 %v6879_v18, %v6879_v18  ;;  %v6887_v26 = vadd.f32 %v4478_v52, %v4423_v36  ;;  %v4480_v43 = vpop.f32.mrb[115].mxu0  ;;  %v4523_v56 = vpop.f32.mrb[115].mxu1  ;;  %v4540_v24 = vmul.f32 %v6881_v39, %v6881_v39  ;;  %v6899_v16 = vadd.f32 %v4521_v30, %v4423_v36 }
 0x754   : > { %v4526_v38 = vadd.f32 %v6883_v9, %v6879_v18  ;;  %v4539_v31 = vmul.f32 %v6883_v9, %v6883_v9  ;;  %v6893_v13 = vadd.f32 %v4480_v43, %v4423_v36  ;;  %v6906_v5 = vadd.f32 %v4523_v56, %v4423_v36  ;;  %v4611_v36 = vld [vmem:[%s6934_s21 + $0x18] sm:$0xff] }
 0x755   : > { %v4542_v33 = vmul.f32 %v6887_v26, %v6887_v26  ;;  %v4544_v58 = vmul.f32 %v6899_v16, %v6899_v16  ;;  %v4541_v15 = vmul.f32 %v4520_v50, %v4520_v50  ;;  %v4618_v43 = vpack.c.bf16 %v4613_v21, %v6937_v46 }
 0x756   : > { %v4531_v34 = vadd.f32 %v6893_v13, %v6887_v26  ;;  %v4543_v57 = vmul.f32 %v6893_v13, %v6893_v13  ;;  %v4527_v28 = vadd.f32 %v4526_v38, %v6881_v39  ;;  %v4546_v61 = vadd.f32 %v4539_v31, %v4538_v12 }
 0x757   : > { %v4545_v41 = vmul.f32 %v6906_v5, %v6906_v5 }
 0x758   : > { %v4528_v40 = vadd.f32 %v4527_v28, %v4520_v50  ;;  %v4532_v59 = vadd.f32 %v4531_v34, %v6899_v16  ;;  %v4547_v14 = vadd.f32 %v4546_v61, %v4540_v24  ;;  %v4551_v63 = vadd.f32 %v4543_v57, %v4542_v33 }
 0x75a   : > { %4529 = vadd.xlane.f32.xlu0 %v4528_v40  ;;  %v4533_v4 = vadd.f32 %v4532_v59, %v6906_v5  ;;  %v4548_v20 = vadd.f32 %v4547_v14, %v4541_v15  ;;  %v4552_v53 = vadd.f32 %v4551_v63, %v4544_v58 }
 0x75c   : > { %4534 = vadd.xlane.f32.xlu1 %v4533_v4  ;;  %v4553_v7 = vadd.f32 %v4552_v53, %v4545_v41  ;;  %v4608_v4 = vld [vmem:[%s6934_s21] sm:$0xff] }
 0x75e   : > { %4549 = vadd.xlane.f32.xlu0 %v4548_v20 }
 0x762   : > { %4554 = vadd.xlane.f32.xlu0 %v4553_v7  ;;  %v4612_v7 = vld [vmem:[%s6934_s21 + $0x20] sm:$0xff] }
 0x76d   : > { %4626 = vrot.lane.b32.xlu1 %v6920_v54, %s5571_s27 }
 0x771   : > { %4816 = vperm.xlu1 %5358, %v4808_v22  }
 0x778   : > { %4811 = vperm.xlu0 %5357, %v4807_v35  }
 0x7e7   : > { %v4530_v44 = vpop.xlane.xlu0 %4529 }
 0x7e8   : > { %v4536_v2 = vmul.f32 0.001953125, %v4530_v44  ;;  %v4617_v44 = vpack.c.bf16 %v4612_v7, %v4608_v4 }
 0x7e9   : > { %v4535_v45 = vpop.xlane.xlu1 %4534 }
 0x7ea   : > { %v4537_v60 = vmul.f32 0.001953125, %v4535_v45  ;;  %v4558_v19 = vmul.f32 %v4536_v2, %v4536_v2  ;;  %v4562_v6 = vsub.f32 %v6879_v18, %v4536_v2  ;;  %v4564_v48 = vsub.f32 %v6881_v39, %v4536_v2 }
 0x7eb   : > { %v4550_v29 = vpop.xlane.xlu0 %4549  ;;  %v4563_v10 = vsub.f32 %v6883_v9, %v4536_v2  ;;  %v4565_v47 = vsub.f32 %v4520_v50, %v4536_v2  ;;  %v4620_v18 = vpack.c.bf16 %v4615_v17, %v4611_v36  ;;  %v4619_v2 = vpack.c.bf16 %v4614_v51, %v4610_v8 }
 0x7ec   : > { %v4556_v55 = vmul.f32 0.001953125, %v4550_v29  ;;  %v4559_v42 = vmul.f32 %v4537_v60, %v4537_v60  ;;  %v4567_v30 = vsub.f32 %v6893_v13, %v4537_v60  ;;  %v4569_v12 = vsub.f32 %v6906_v5, %v4537_v60 }
 0x7ed   : > { %v4566_v38 = vsub.f32 %v6887_v26, %v4537_v60  ;;  %v4568_v31 = vsub.f32 %v6899_v16, %v4537_v60  ;;  %v4627_v45 = vpop.permute.xlu1 %4626 }
 0x7ee   : > { %v4560_v23 = vsub.f32 %v4556_v55, %v4558_v19 }
 0x7ef   : > { %v4555_v25 = vpop.xlane.xlu0 %4554 }
 0x7f0   : > { %v4570_v32 = vadd.f32 1e-05, %v4560_v23  ;;  %v4557_v1 = vmul.f32 0.001953125, %v4555_v25 }
 0x7f1   : > { %v4817_v29 = vpop.permute.xlu1 %4816 }
 0x7f2   : > { %5533 = vrsqrt.f32 %v4570_v32  ;;  %v4561_v0 = vsub.f32 %v4557_v1, %v4559_v42 }
 0x7f4   : > { %v4571_v49 = vadd.f32 1e-05, %v4561_v0 }
 0x7f6   : > { %5535 = vrsqrt.f32 %v4571_v49 }
 0x7f7   : > { %v4812_v60 = vpop.permute.xlu0 %4811 }
 0x7fc   : > { %v5534_v37 = vpop.eup %5533 }
 0x7fd   : > { %v4575_v27 = vmul.f32 %v5534_v37, %v4563_v10  ;;  %v4577_v62 = vmul.f32 %v5534_v37, %v4565_v47  ;;  %v4574_v3 = vmul.f32 %v5534_v37, %v4562_v6  ;;  %v4576_v52 = vmul.f32 %v5534_v37, %v4564_v48 }
 0x7ff   : > { %vm4583_vm12 = vcmp.ge.f32.partialorder %v4575_v27, 0.0  ;;  %v4591_v39 = vmul.f32 0.2, %v4575_v27  ;;  %vm4585_vm13 = vcmp.ge.f32.partialorder %v4577_v62, 0.0  ;;  %v4593_v9 = vmul.f32 0.2, %v4577_v62 }
 0x800   : > { %v5536_v56 = vpop.eup %5535  ;;  %vm4582_vm0 = vcmp.ge.f32.partialorder %v4574_v3, 0.0  ;;  %v4590_v24 = vmul.f32 0.2, %v4574_v3  ;;  %vm4584_vm1 = vcmp.ge.f32.partialorder %v4576_v52, 0.0  ;;  %v4592_v13 = vmul.f32 0.2, %v4576_v52 }
 0x801   : > { %v4579_v50 = vmul.f32 %v5536_v56, %v4567_v30  ;;  %v4581_v33 = vmul.f32 %v5536_v56, %v4569_v12  ;;  %v4599_v34 = vsel %vm4583_vm12, %v4575_v27, %v4591_v39  ;;  %v4601_v57 = vsel %vm4585_vm13, %v4577_v62, %v4593_v9 }
 0x802   : > { %v4578_v28 = vmul.f32 %v5536_v56, %v4566_v38  ;;  %v4580_v61 = vmul.f32 %v5536_v56, %v4568_v31  ;;  %v4598_v63 = vsel %vm4582_vm0, %v4574_v3, %v4590_v24  ;;  %v4600_v58 = vsel %vm4584_vm1, %v4576_v52, %v4592_v13  ;;  %v4913_v13 = vld [vmem:[%s7021_s13] sm:$0xf] }
 0x803   : > { %vm4587_vm6 = vcmp.ge.f32.partialorder %v4579_v50, 0.0  ;;  %v4595_v5 = vmul.f32 0.2, %v4579_v50  ;;  %vm4589_vm7 = vcmp.ge.f32.partialorder %v4581_v33, 0.0  ;;  %v4597_v40 = vmul.f32 0.2, %v4581_v33 }
 0x804   : > { %vm4586_vm15 = vcmp.ge.f32.partialorder %v4578_v28, 0.0  ;;  %v4594_v26 = vmul.f32 0.2, %v4578_v28  ;;  %vm4588_vm4 = vcmp.ge.f32.partialorder %v4580_v61, 0.0  ;;  %v4596_v16 = vmul.f32 0.2, %v4580_v61 }
 0x805   : > { %v4603_v59 = vsel %vm4587_vm6, %v4579_v50, %v4595_v5  ;;  %v4605_v14 = vsel %vm4589_vm7, %v4581_v33, %v4597_v40  ;;  %vm7089_vm13 = vcmask 1043456  }
 0x806   : > { %v4622_v15 = vpack.c.bf16 %v4603_v59, %v4599_v34  ;;  %v4624_v20 = vpack.c.bf16 %v4605_v14, %v4601_v57  ;;  %v4602_v53 = vsel %vm4586_vm15, %v4578_v28, %v4594_v26  ;;  %v4604_v41 = vsel %vm4588_vm4, %v4580_v61, %v4596_v16  ;;  %vm7090_vm0 = vmmov %vm7089_vm13 }
 0x807   : > { %v4621_v22 = vpack.c.bf16 %v4602_v53, %v4598_v63  ;;  %v4623_v35 = vpack.c.bf16 %v4604_v41, %v4600_v58  ;;  %vm7091_vm1 = vmmov %vm7090_vm0 }
 0x808   : > { %4632 = vmatprep.subr.bf16.mxu0 %v4622_v15  ;;  %4675 = vmatprep.subr.bf16.mxu1 %v4624_v20  ;;  %vm7092_vm6 = vmmov %vm7090_vm0 }
 0x809   : > { %4633 = vmatpush1.bf16.msra.mxu0 %v4621_v22  ;;  %4676 = vmatpush1.bf16.msra.mxu1 %v4623_v35  ;;  %vm7093_vm7 = vmmov %vm7090_vm0 }
 0x80a   : > { %4721 = vmatprep.subr.bf16.mxu0 %v4618_v43  ;;  %4764 = vmatprep.subr.bf16.mxu1 %v4620_v18  ;;  %vm7094_vm15 = vmmov %vm7090_vm0 }
 0x80b   : > { %vm7095_vm4 = vmmov %vm7090_vm0 }
 0x80c   : > { %5322 = vmatmul.mubr.msk.bf16.vlgmr.msra.gmra.mrb[116].mxu0 %vm4628_vm5, %v4627_v45  ;;  %5323 = vmatmul.mubr.msk.bf16.vlgmr.msra.gmra.mrb[116].mxu1 %vm4628_vm5, %v4627_v45 }
 0x80d   : > { %4722 = vmatpush1.bf16.msra.mxu0 %v4617_v44  ;;  %4765 = vmatpush1.bf16.msra.mxu1 %v4619_v2 }
 0x80e   : > { %4753 = vmatprep.mubr.bf16.mxu0 %v7048_v11  ;;  %4796 = vmatprep.mubr.bf16.mxu1 %v7048_v11 }
 0x818   : > { %5324 = vmatmul.mubr.msk.bf16.vlgmr.msra.gmra.mrb[116].mxu0 %vm4628_vm5, %v6920_v54  ;;  %5325 = vmatmul.mubr.msk.bf16.vlgmr.msra.gmra.mrb[116].mxu1 %vm4628_vm5, %v6920_v54 }
 0x819   : > { %4954 = vmatprep.mubr.bf16.mxu0 %v7048_v11  ;;  %4995 = vmatprep.mubr.bf16.mxu1 %v7048_v11 }
 0x8eb   : > { %v4755_v19 = vpop.f32.mrb[116].mxu0  ;;  %v4798_v55 = vpop.f32.mrb[116].mxu1 }
 0x8ec   : > { %v6966_v23 = vadd.f32 %v4812_v60, %v4755_v19  ;;  %v4757_v25 = vpop.f32.mrb[117].mxu0  ;;  %v4800_v32 = vpop.f32.mrb[117].mxu1  ;;  %v6972_v54 = vadd.f32 %v4812_v60, %v4798_v55 }
 0x8ed   : > { %v6968_v42 = vadd.f32 %v4812_v60, %v4757_v25  ;;  %v4759_v1 = vpop.f32.mrb[118].mxu0  ;;  %v4802_v0 = vpop.f32.mrb[118].mxu1  ;;  %v4822_v36 = vadd.f32 %v4812_v60, %v4800_v32 }
 0x8ee   : > { %v4839_v49 = vmul.f32 %v6966_v23, %v6966_v23  ;;  %v4823_v46 = vadd.f32 %v4817_v29, %v4759_v1  ;;  %v4761_v6 = vpop.f32.mrb[119].mxu0  ;;  %v4804_v11 = vpop.f32.mrb[119].mxu1  ;;  %v4825_v47 = vadd.f32 %v4817_v29, %v4802_v0  ;;  %v4841_v52 = vmul.f32 %v6972_v54, %v6972_v54 }
 0x8ef   : > { %v4827_v48 = vadd.f32 %v6968_v42, %v6966_v23  ;;  %v4840_v10 = vmul.f32 %v6968_v42, %v6968_v42  ;;  %v4824_v21 = vadd.f32 %v4817_v29, %v4761_v6  ;;  %v4826_v62 = vadd.f32 %v4817_v29, %v4804_v11 }
 0x8f0   : > { %v4843_v17 = vmul.f32 %v4823_v46, %v4823_v46  ;;  %v4845_v12 = vmul.f32 %v4825_v47, %v4825_v47  ;;  %v4842_v50 = vmul.f32 %v4822_v36, %v4822_v36 }
 0x8f1   : > { %v4832_v37 = vadd.f32 %v4824_v21, %v4823_v46  ;;  %v4844_v27 = vmul.f32 %v4824_v21, %v4824_v21  ;;  %v4828_v3 = vadd.f32 %v4827_v48, %v6972_v54  ;;  %v4847_v30 = vadd.f32 %v4840_v10, %v4839_v49 }
 0x8f2   : > { %v4846_v56 = vmul.f32 %v4826_v62, %v4826_v62 }
 0x8f3   : > { %v4829_v43 = vadd.f32 %v4828_v3, %v4822_v36  ;;  %v4833_v18 = vadd.f32 %v4832_v37, %v4825_v47  ;;  %v4852_v39 = vadd.f32 %v4844_v27, %v4843_v17  ;;  %v4848_v31 = vadd.f32 %v4847_v30, %v4841_v52  ;;  %v4907_v17 = vld [vmem:[%s7020_s12] sm:$0xf] }
 0x8f5   : > { %4830 = vadd.xlane.f32.xlu1 %v4829_v43  ;;  %v4834_v9 = vadd.f32 %v4833_v18, %v4826_v62  ;;  %v4853_v38 = vadd.f32 %v4852_v39, %v4845_v12  ;;  %v4849_v33 = vadd.f32 %v4848_v31, %v4842_v50  ;;  %v4908_v12 = vpack.c.bf16 %v4907_v17, %v4907_v17 }
 0x8f7   : > { %4835 = vadd.xlane.f32.xlu0 %v4834_v9  ;;  %v4854_v24 = vadd.f32 %v4853_v38, %v4846_v56 }
 0x8f9   : > { %4855 = vadd.xlane.f32.xlu1 %v4854_v24 }
 0x8fb   : > { %4850 = vadd.xlane.f32.xlu0 %v4849_v33 }
 0x911   : > { %4916 = vperm.xlu0 %5357, %v4913_v13  }
 0x982   : > { %v4831_v34 = vpop.xlane.xlu1 %4830 }
 0x983   : > { %v4837_v28 = vmul.f32 0.001953125, %v4831_v34 }
 0x984   : > { %v4836_v57 = vpop.xlane.xlu0 %4835 }
 0x985   : > { %v4838_v61 = vmul.f32 0.001953125, %v4836_v57  ;;  %v4859_v14 = vmul.f32 %v4837_v28, %v4837_v28  ;;  %v4864_v51 = vsub.f32 %v6968_v42, %v4837_v28  ;;  %v4866_v35 = vsub.f32 %v4822_v36, %v4837_v28 }
 0x986   : > { %v4856_v5 = vpop.xlane.xlu1 %4855  ;;  %v4863_v29 = vsub.f32 %v6966_v23, %v4837_v28  ;;  %v4865_v60 = vsub.f32 %v6972_v54, %v4837_v28 }
 0x987   : > { %v4858_v40 = vmul.f32 0.001953125, %v4856_v5  ;;  %v4860_v26 = vmul.f32 %v4838_v61, %v4838_v61  ;;  %v4867_v20 = vsub.f32 %v4823_v46, %v4838_v61  ;;  %v4868_v53 = vsub.f32 %v4824_v21, %v4838_v61 }
 0x988   : > { %v4851_v16 = vpop.xlane.xlu0 %4850  ;;  %v4870_v41 = vsub.f32 %v4826_v62, %v4838_v61  ;;  %v4869_v8 = vsub.f32 %v4825_v47, %v4838_v61 }
 0x989   : > { %v4862_v59 = vsub.f32 %v4858_v40, %v4860_v26  ;;  %v4857_v63 = vmul.f32 0.001953125, %v4851_v16 }
 0x98b   : > { %v4872_v58 = vadd.f32 1e-05, %v4862_v59  ;;  %v4861_v4 = vsub.f32 %v4857_v63, %v4859_v14 }
 0x98d   : > { %5537 = vrsqrt.f32 %v4872_v58  ;;  %v4871_v15 = vadd.f32 1e-05, %v4861_v4 }
 0x98f   : > { %5539 = vrsqrt.f32 %v4871_v15 }
 0x990   : > { %v4917_v18 = vpop.permute.xlu0 %4916 }
 0x997   : > { %v5538_v7 = vpop.eup %5537 }
 0x998   : > { %v4880_v22 = vmul.f32 %v5538_v7, %v4868_v53  ;;  %v4882_v44 = vmul.f32 %v5538_v7, %v4870_v41  ;;  %v4879_v2 = vmul.f32 %v5538_v7, %v4867_v20  ;;  %v4881_v19 = vmul.f32 %v5538_v7, %v4869_v8 }
 0x999   : > { %v5540_v45 = vpop.eup %5539 }
 0x99a   : > { %v4876_v55 = vmul.f32 %v5540_v45, %v4864_v51  ;;  %vm4888_vm8 = vcmp.ge.f32.partialorder %v4880_v22, 0.0  ;;  %v4896_v25 = vmul.f32 0.2, %v4880_v22  ;;  %v4878_v32 = vmul.f32 %v5540_v45, %v4866_v35 }
 0x99b   : > { %vm4890_vm9 = vcmp.ge.f32.partialorder %v4882_v44, 0.0  ;;  %v4898_v1 = vmul.f32 0.2, %v4882_v44  ;;  %v4875_v0 = vmul.f32 %v5540_v45, %v4863_v29  ;;  %vm4887_vm2 = vcmp.ge.f32.partialorder %v4879_v2, 0.0 }
 0x99c   : > { %vm4884_vm3 = vcmp.ge.f32.partialorder %v4876_v55, 0.0  ;;  %v4892_v42 = vmul.f32 0.2, %v4876_v55  ;;  %v4904_v49 = vsel %vm4888_vm8, %v4880_v22, %v4896_v25  ;;  %vm4886_vm10 = vcmp.ge.f32.partialorder %v4878_v32, 0.0 }
 0x99d   : > { %v4894_v46 = vmul.f32 0.2, %v4878_v32  ;;  %v4906_v6 = vsel %vm4890_vm9, %v4882_v44, %v4898_v1  ;;  %vm4883_vm11 = vcmp.ge.f32.partialorder %v4875_v0, 0.0  ;;  %v4891_v11 = vmul.f32 0.2, %v4875_v0 }
 0x99e   : > { %v4900_v23 = vsel %vm4884_vm3, %v4876_v55, %v4892_v42  ;;  %v4895_v48 = vmul.f32 0.2, %v4879_v2  ;;  %v4877_v54 = vmul.f32 %v5540_v45, %v4865_v60  ;;  %vm4889_vm14 = vcmp.ge.f32.partialorder %v4881_v19, 0.0 }
 0x99f   : > { %v4910_v10 = vpack.c.bf16 %v4904_v49, %v4900_v23  ;;  %v4902_v47 = vsel %vm4886_vm10, %v4878_v32, %v4894_v46  ;;  %v4899_v21 = vsel %vm4883_vm11, %v4875_v0, %v4891_v11  ;;  %v4897_v36 = vmul.f32 0.2, %v4881_v19 }
 0x9a0   : > { %v4912_v37 = vpack.c.bf16 %v4906_v6, %v4902_v47  ;;  %v4903_v27 = vsel %vm4887_vm2, %v4879_v2, %v4895_v48  ;;  %vm4885_vm12 = vcmp.ge.f32.partialorder %v4877_v54, 0.0  ;;  %v4893_v62 = vmul.f32 0.2, %v4877_v54 }
 0x9a1   : > { %4922 = vmatprep.subr.bf16.mxu0 %v4910_v10  ;;  %v4909_v3 = vpack.c.bf16 %v4903_v27, %v4899_v21  ;;  %v4905_v30 = vsel %vm4889_vm14, %v4881_v19, %v4897_v36 }
 0x9a2   : > { %4963 = vmatprep.subr.bf16.mxu1 %v4912_v37  ;;  %v4901_v52 = vsel %vm4885_vm12, %v4877_v54, %v4893_v62 }
 0x9a3   : > { %4923 = vmatpush1.bf16.msra.mxu0 %v4909_v3  ;;  %v4911_v43 = vpack.c.bf16 %v4905_v30, %v4901_v52 }
 0x9a5   : > { %4964 = vmatpush1.bf16.msra.mxu1 %v4911_v43 }
 0x9a6   : > { %5326 = vmatmul.mubr.msk.bf16.vlgmr.msra.gmra.mrb[120].mxu0 %vm4628_vm5, %v4908_v12 }
 0x9a8   : > { %5327 = vmatmul.mubr.msk.bf16.vlgmr.msra.gmra.mrb[120].mxu1 %vm4628_vm5, %v4908_v12  ;;  %vm7096_vm5 = vmmov %vm7090_vm0 }
 0xa79   : > { %v4956_v39 = vpop.f32.mrb[120].mxu0 }
 0xa7a   : > { %v4957_v9 = vadd.f32 %v4956_v39, %v4917_v18  ;;  %v4958_v56 = vpop.f32.mrb[121].mxu0 }
 0xa7b   : > { %v4997_v38 = vpop.f32.mrb[120].mxu1  ;;  %v4959_v31 = vadd.f32 %v4958_v56, %v4917_v18  ;;  %v4960_v24 = vpop.f32.mrb[122].mxu0 }
 0xa7c   : > { %v5004_v50 = vsel %vm7089_vm13, %v4957_v9, -inf  ;;  %v4998_v33 = vadd.f32 %v4997_v38, %v4917_v18  ;;  %v4999_v13 = vpop.f32.mrb[121].mxu1  ;;  %v4961_v34 = vpop.f32.mrb[123].mxu0 }
 0xa7d   : > { %v5005_v57 = vrot.slane %v5004_v50, 4  ;;  %v5011_v28 = vsel %vm7090_vm0, %v4959_v31, -inf  ;;  %v5000_v61 = vadd.f32 %v4999_v13, %v4917_v18  ;;  %v5001_v5 = vpop.f32.mrb[122].mxu1 }
 0xa7e   : > { %v5018_v40 = vsel %vm7091_vm1, %v4998_v33, -inf  ;;  %v5012_v26 = vrot.slane %v5011_v28, 4  ;;  %v5002_v16 = vpop.f32.mrb[123].mxu1 }
 0xa7f   : > { %v5006_v59 = vmax.f32 %v5004_v50, %v5005_v57  ;;  %v5019_v14 = vrot.slane %v5018_v40, 4  ;;  %v5025_v63 = vsel %vm7092_vm6, %v5000_v61, -inf }
 0xa80   : > { %v5013_v58 = vmax.f32 %v5011_v28, %v5012_v26  ;;  %v5026_v4 = vrot.slane %v5025_v63, 4 }
 0xa81   : > { %v5007_v15 = vrot.slane %v5006_v59, 2  ;;  %v5020_v20 = vmax.f32 %v5018_v40, %v5019_v14 }
 0xa82   : > { %v5014_v53 = vrot.slane %v5013_v58, 2  ;;  %v5027_v41 = vmax.f32 %v5025_v63, %v5026_v4 }
 0xa83   : > { %v5008_v7 = vmax.f32 %v5006_v59, %v5007_v15  ;;  %v5021_v8 = vrot.slane %v5020_v20, 2 }
 0xa84   : > { %v5015_v51 = vmax.f32 %v5013_v58, %v5014_v53  ;;  %v5028_v22 = vrot.slane %v5027_v41, 2 }
 0xa85   : > { %v5009_v35 = vrot.slane %v5008_v7, 1  ;;  %v5022_v44 = vmax.f32 %v5020_v20, %v5021_v8 }
 0xa86   : > { %v5016_v2 = vrot.slane %v5015_v51, 1  ;;  %v5029_v45 = vmax.f32 %v5027_v41, %v5028_v22 }
 0xa87   : > { %v5010_v29 = vmax.f32 %v5008_v7, %v5009_v35  ;;  %v5023_v60 = vrot.slane %v5022_v44, 1 }
 0xa88   : > { %v5017_v19 = vmax.f32 %v5015_v51, %v5016_v2  ;;  %v5030_v55 = vrot.slane %v5029_v45, 1 }
 0xa89   : > { %v5032_v25 = vsub.f32 %v4957_v9, %v5010_v29  ;;  %v5024_v32 = vmax.f32 %v5022_v44, %v5023_v60 }
 0xa8a   : > { %v5033_v1 = vsub.f32 %v4959_v31, %v5017_v19  ;;  %v5031_v0 = vmax.f32 %v5029_v45, %v5030_v55 }
 0xa8b   : > { %v5036_v42 = vmul.f32 1.442695, %v5032_v25  ;;  %v5034_v49 = vsub.f32 %v4998_v33, %v5024_v32 }
 0xa8c   : > { %v5038_v46 = vmul.f32 1.442695, %v5033_v1  ;;  %v5035_v6 = vsub.f32 %v5000_v61, %v5031_v0 }
 0xa8d   : > { %5541 = vpow2.f32 %v5036_v42  ;;  %v5040_v11 = vmul.f32 1.442695, %v5034_v49 }
 0xa8e   : > { %5543 = vpow2.f32 %v5038_v46  ;;  %v5042_v23 = vmul.f32 1.442695, %v5035_v6 }
 0xa8f   : > { %5545 = vpow2.f32 %v5040_v11 }
 0xa90   : > { %5547 = vpow2.f32 %v5042_v23 }
 0xa97   : > { %v5542_v48 = vpop.eup %5541 }
 0xa98   : > { %v5544_v54 = vpop.eup %5543  ;;  %v5044_v10 = vsel %vm7093_vm7, %v5542_v48, 0.0 }
 0xa99   : > { %v5546_v47 = vpop.eup %5545  ;;  %v5045_v21 = vrot.slane %v5044_v10, 4  ;;  %v5051_v36 = vsel %vm7094_vm15, %v5544_v54, 0.0 }
 0xa9a   : > { %v5548_v17 = vpop.eup %5547  ;;  %v5058_v37 = vsel %vm7095_vm4, %v5546_v47, 0.0  ;;  %v5052_v27 = vrot.slane %v5051_v36, 4 }
 0xa9b   : > { %v5046_v62 = vadd.f32 %v5045_v21, %v5044_v10  ;;  %v5059_v3 = vrot.slane %v5058_v37, 4  ;;  %v5065_v52 = vsel %vm7096_vm5, %v5548_v17, 0.0 }
 0xa9c   : > { %v5053_v30 = vadd.f32 %v5052_v27, %v5051_v36  ;;  %v5066_v12 = vrot.slane %v5065_v52, 4 }
 0xa9d   : > { %v5047_v43 = vrot.slane %v5046_v62, 2  ;;  %v5060_v18 = vadd.f32 %v5059_v3, %v5058_v37 }
 0xa9e   : > { %v5054_v39 = vrot.slane %v5053_v30, 2  ;;  %v5067_v9 = vadd.f32 %v5066_v12, %v5065_v52 }
 0xa9f   : > { %v5048_v56 = vadd.f32 %v5047_v43, %v5046_v62  ;;  %v5061_v38 = vrot.slane %v5060_v18, 2 }
 0xaa0   : > { %v5055_v31 = vadd.f32 %v5054_v39, %v5053_v30  ;;  %v5068_v24 = vrot.slane %v5067_v9, 2 }
 0xaa1   : > { %v5049_v50 = vrot.slane %v5048_v56, 1  ;;  %v5062_v33 = vadd.f32 %v5061_v38, %v5060_v18 }
 0xaa2   : > { %v5056_v13 = vrot.slane %v5055_v31, 1  ;;  %v5069_v34 = vadd.f32 %v5068_v24, %v5067_v9 }
 0xaa3   : > { %v5050_v57 = vadd.f32 %v5049_v50, %v5048_v56  ;;  %v5063_v28 = vrot.slane %v5062_v33, 1 }
 0xaa4   : > { %v5057_v61 = vadd.f32 %v5056_v13, %v5055_v31  ;;  %v5070_v5 = vrot.slane %v5069_v34, 1 }
 0xaa5   : > { %5549 = vrcp.f32 %v5050_v57  ;;  %v5064_v40 = vadd.f32 %v5063_v28, %v5062_v33 }
 0xaa6   : > { %5551 = vrcp.f32 %v5057_v61  ;;  %v5071_v26 = vadd.f32 %v5070_v5, %v5069_v34 }
 0xaa7   : > { %5553 = vrcp.f32 %v5064_v40 }
 0xaa8   : > { %5555 = vrcp.f32 %v5071_v26 }
 0xaaf   : > { %v5550_v16 = vpop.eup %5549 }
 0xab0   : > { %v5552_v59 = vpop.eup %5551  ;;  %v5076_v14 = vmul.f32 %v5550_v16, %v5542_v48 }
 0xab1   : > { %v5554_v63 = vpop.eup %5553  ;;  %v5077_v58 = vmul.f32 %v5552_v59, %v5544_v54 }
 0xab2   : > { %v5556_v4 = vpop.eup %5555  ;;  %v5078_v15 = vmul.f32 %v5554_v63, %v5546_v47 }
 0xab3   : > { %v5084_v20 = vcombine.low %v5076_v14, %v5077_v58  ;;  %v5079_v53 = vmul.f32 %v5556_v4, %v5548_v17 }
 0xab5   : > { %5088 = vst [vmem:[%s507_s28] sm:$0xff] %v5084_v20  ;;  %v5085_v41 = vcombine.low %v5078_v15, %v5079_v53 }
 0xab7   : > { %5089 = vst [vmem:[%s507_s28 + $0x8] sm:$0xff] %v5085_v41 }
 0xab8 PF: > { %s24_s29 = sadd.s32 1, %s5563_s29  }
 0xab9   : > { %p21_p4 = scmp.ge.s32.totalorder %s24_s29, 4  }
 0xabb   :  { %23 = sbr.rel (!%p21_p4) target bundleno = 1 (0x1), region = 138 }

</bundles_post_ra>
